<compile_context>
chip_gen: v7x
topology: tpu7x:2x2x1
jax: 0.10.0
libtpu: 0.0.40
codegen_flags: <defaults>
</compile_context>

<pallas_src>
import functools

import jax
import jax.numpy as jnp
from jax.experimental import pallas as pl
from jax.experimental.pallas import tpu as pltpu


_TAPS = tuple((dy, dx) for dy in (-1, 0, 1) for dx in (-1, 0, 1))


def _nr_reciprocal(x):
    """EUP approx reciprocal + one Newton-Raphson refinement (~1e-5 rel err)."""
    r = pl.reciprocal(x, approx=True)
    return r * (2.0 - x * r)


# ---------------------------------------------------------------------------
# Fused Pallas kernel: one grid step == one batch element (all N burst frames,
# lane-batched along the last axis).
# ---------------------------------------------------------------------------
def _weighted_sum_kernel(ref_ref, oth_ref, off_ref, mask_ref,
                         w1_ref, b1_ref, w2a_ref, w2b_ref, b2_ref,
                         w3_ref, b3_ref, out_ref,
                         *, N, W, HW, use_softmax, offset_modulo):
    f32 = jnp.float32
    NHW = N * HW

    def conv3x3(parts, b_ref_, relu):
        # 3x3 SAME conv over lane-batched (cin, N*HW) register slabs.  Each of
        # the 9 taps is a pltpu.roll of the slab (XLU), masked by a
        # precomputed per-lane validity mask (kills row/col overflow AND the
        # cyclic cross-frame wrap), feeding one tiny accumulating MXU dot.
        acc = None
        for k, (dy, dx) in enumerate(_TAPS):
            d = dy * W + dx
            mk = None if d == 0 else mask_ref[k:k + 1, :]
            for x, w_ref_ in parts:
                p = x if d == 0 else pltpu.roll(x, shift=(-d) % NHW, axis=1)
                if mk is not None:
                    p = p * mk
                t = jnp.dot(w_ref_[k].astype(f32), p,
                            preferred_element_type=f32)
                acc = t if acc is None else acc + t
        acc = acc + b_ref_[...].astype(f32)
        return jnp.maximum(acc, 0.0) if relu else acc

    # ---- layer 1: offsets (2, N*HW) -> offset features (Fo, N*HW), ReLU ----
    off = off_ref[0].astype(f32)
    if offset_modulo is not None:
        off = off % offset_modulo
    off_feat = conv3x3([(off, w1_ref)], b1_ref, relu=True)

    # ---- layer 2: [oth - ref ; off_feat] -> hidden (P, N*HW), ReLU ---------
    # ref tiled along lanes with an aligned (multiple-of-HW) lane concat; the
    # channel concat is folded into two per-tap dots (w2 split along cin).
    ref_t = jnp.concatenate([ref_ref[0].astype(f32)] * N, axis=1)   # (C, N*HW)
    res = oth_ref[0].astype(f32) - ref_t
    h = conv3x3([(res, w2a_ref), (off_feat, w2b_ref)], b2_ref, relu=True)

    # ---- layer 3: hidden -> per-frame fusion-weight logits (C, N*HW) -------
    logits = conv3x3([(h, w3_ref)], b3_ref, relu=False)

    # ---- softmax (or ReLU-normalize) over the burst dim + weighted sum -----
    frames = [logits[:, n * HW:(n + 1) * HW] for n in range(N)]     # (C, HW)
    if use_softmax:
        m = frames[0]
        for n in range(1, N):
            m = jnp.maximum(m, frames[n])
        wgt = [jnp.exp(f - m) for f in frames]
    else:
        wgt = [jnp.maximum(f, 0.0) for f in frames]
    denom = wgt[0]
    for n in range(1, N):
        denom = denom + wgt[n]
    if use_softmax:
        inv = _nr_reciprocal(denom)          # denom >= 1 -> approx recip safe
    else:
        inv = 1.0 / (denom + 1e-12)          # exact divide: safe as denom -> 0

    acc = None
    for n in range(N):
        xn = oth_ref[0, :, n * HW:(n + 1) * HW].astype(f32)   # VMEM re-read
        t = xn * wgt[n]
        acc = t if acc is None else acc + t
    out_ref[0] = (acc * inv).astype(out_ref.dtype)


# ---------------------------------------------------------------------------
# Wrapper: lane-dense layout plumbing + tiny constant side inputs, one call.
# ---------------------------------------------------------------------------
def weighted_sum_forward(params, ref_feat, oth_feat, offsets,
                         offset_modulo=None, use_softmax=True):
    """Matches WeightedSum.forward (use_bn=False, activation='relu')."""
    B, N, C, H, W = oth_feat.shape
    HW = H * W
    NHW = N * HW
    Fo = params["w1"].shape[-1]
    P = params["w2"].shape[-1]

    # Channels on sublanes, (frame, h, w) flattened on the lane axis so every
    # kernel load / MXU RHS / store is lane-dense.  Tiny one-shot XLA copies.
    ref2 = ref_feat.reshape(B, C, HW)
    oth2 = oth_feat.transpose(0, 2, 1, 3, 4).reshape(B, C, NHW)
    off2 = offsets.transpose(0, 2, 1, 3, 4).reshape(B, 2, NHW)

    # Per-tap validity masks (1.0 where the tap stays inside its frame).
    yy = jnp.arange(HW, dtype=jnp.int32) // W
    xx = jnp.arange(HW, dtype=jnp.int32) % W
    rows = []
    for dy, dx in _TAPS:
        ok = ((yy + dy >= 0) & (yy + dy < H) & (xx + dx >= 0) & (xx + dx < W))
        rows.append(ok)
    mask = jnp.tile(jnp.stack(rows).astype(jnp.float32), (1, N))    # (9, N*HW)

    def taps(w):   # HWIO (3,3,cin,cout) -> (9, cout, cin), k = (dy+1)*3+(dx+1)
        cin, cout = w.shape[2], w.shape[3]
        return w.reshape(9, cin, cout).transpose(0, 2, 1)

    w1 = taps(params["w1"])
    w2 = taps(params["w2"])
    w2a, w2b = w2[:, :, :C], w2[:, :, C:]       # split cin: residual / off_feat
    w3 = taps(params["w3"])
    b1 = params["b1"].reshape(Fo, 1)
    b2 = params["b2"].reshape(P, 1)
    b3 = params["b3"].reshape(C, 1)

    kernel = functools.partial(_weighted_sum_kernel, N=N, W=W, HW=HW,
                               use_softmax=use_softmax,
                               offset_modulo=offset_modulo)

    def full_spec(a):
        nd = a.ndim

        def imap(b):
            return (0,) * nd

        return pl.BlockSpec(a.shape, imap)

    out = pl.pallas_call(
        kernel,
        out_shape=jax.ShapeDtypeStruct((B, C, HW), oth_feat.dtype),
        grid=(B,),
        in_specs=[
            pl.BlockSpec((1, C, HW), lambda b: (b, 0, 0)),
            pl.BlockSpec((1, C, NHW), lambda b: (b, 0, 0)),
            pl.BlockSpec((1, 2, NHW), lambda b: (b, 0, 0)),
            full_spec(mask),
            full_spec(w1), full_spec(b1),
            full_spec(w2a), full_spec(w2b), full_spec(b2),
            full_spec(w3), full_spec(b3),
        ],
        out_specs=pl.BlockSpec((1, C, HW), lambda b: (b, 0, 0)),
        compiler_params=pltpu.CompilerParams(
            dimension_semantics=("parallel",)),
    )(ref2, oth2, off2, mask, w1, b1, w2a, w2b, b2, w3, b3)

    return out.reshape(B, C, H, W)                         # NCHW, zero-copy


# ---------------------------------------------------------------------------
# Deterministic parameter init (HWIO conv weights)
# ---------------------------------------------------------------------------
def init_params(key, input_dim, project_dim, offset_feat_dim):
    ks = jax.random.split(key, 6)

    def conv_init(kw, kb, cin, cout):
        fan_in = 9 * cin
        w = jax.random.normal(kw, (3, 3, cin, cout), jnp.float32) * (2.0 / fan_in) ** 0.5
        b = jax.random.normal(kb, (cout,), jnp.float32) * 0.01
        return w, b

    w1, b1 = conv_init(ks[0], ks[1], 2, offset_feat_dim)
    w2, b2 = conv_init(ks[2], ks[3], input_dim + offset_feat_dim, project_dim)
    w3, b3 = conv_init(ks[4], ks[5], project_dim, input_dim)
    return {"w1": w1, "b1": b1, "w2": w2, "b2": b2, "w3": w3, "b3": b3}


# ---------------------------------------------------------------------------
# Pure-JAX reference (independent path via lax.conv) for verification
# ---------------------------------------------------------------------------
def weighted_sum_reference(params, ref_feat, oth_feat, offsets,
                           offset_modulo=None, use_softmax=True):
    B, N, C, H, W = oth_feat.shape
    res = (oth_feat - ref_feat).reshape(B * N, C, H, W).transpose(0, 2, 3, 1)
    off = offsets.reshape(B * N, 2, H, W).transpose(0, 2, 3, 1)
    if offset_modulo is not None:
        off = off % offset_modulo

    def conv(x, w, b, relu):
        y = jax.lax.conv_general_dilated(
            x, w, window_strides=(1, 1), padding="SAME",
            dimension_numbers=("NHWC", "HWIO", "NHWC")) + b
        return jnp.maximum(y, 0.0) if relu else y

    f = conv(off, params["w1"], params["b1"], True)
    cat = jnp.concatenate([res, f], axis=-1)
    h2 = conv(cat, params["w2"], params["b2"], True)
    logits = conv(h2, params["w3"], params["b3"], False).reshape(B, N, H, W, C)
    if use_softmax:
        wgt = jax.nn.softmax(logits, axis=1)
    else:
        r = jnp.maximum(logits, 0.0)
        wgt = r / (r.sum(axis=1, keepdims=True) + 1e-12)
    out = (oth_feat.transpose(0, 1, 3, 4, 2) * wgt).sum(axis=1)
    return out.transpose(0, 3, 1, 2)


if __name__ == "__main__":
    B, N, C, H, W = 2, 3, 4, 16, 16
    project_dim, offset_feat_dim = 8, 4

    key = jax.random.PRNGKey(0)
    kp, kr, ko, kf = jax.random.split(key, 4)
    params = init_params(kp, input_dim=C, project_dim=project_dim,
                         offset_feat_dim=offset_feat_dim)
    ref_feat = jax.random.normal(kr, (B, 1, C, H, W), jnp.float32)
    oth_feat = jax.random.normal(ko, (B, N, C, H, W), jnp.float32)
    offsets = jax.random.normal(kf, (B, N, 2, H, W), jnp.float32)

    fwd = jax.jit(weighted_sum_forward)
    out = jax.block_until_ready(fwd(params, ref_feat, oth_feat, offsets))

    ref = jax.block_until_ready(
        weighted_sum_reference(params, ref_feat, oth_feat, offsets))

    assert out.shape == (B, C, H, W), out.shape
    max_err = float(jnp.max(jnp.abs(out - ref)))
    assert jnp.allclose(out, ref, rtol=2e-3, atol=2e-3), max_err
    print("KERNEL_OK")
</pallas_src>

<mosaic_0001>
module attributes {stable_mosaic.version = 11 : i64} {
  func.func @_weighted_sum_kernel(%arg0: i32, %arg1: memref<1x4x256xf32, #tpu.memory_space<vmem>>, %arg2: memref<1x4x768xf32, #tpu.memory_space<vmem>>, %arg3: memref<1x2x768xf32, #tpu.memory_space<vmem>>, %arg4: memref<9x768xf32, #tpu.memory_space<vmem>>, %arg5: memref<9x4x2xf32, #tpu.memory_space<vmem>>, %arg6: memref<4x1xf32, #tpu.memory_space<vmem>>, %arg7: memref<9x8x4xf32, #tpu.memory_space<vmem>>, %arg8: memref<9x8x4xf32, #tpu.memory_space<vmem>>, %arg9: memref<8x1xf32, #tpu.memory_space<vmem>>, %arg10: memref<9x4x8xf32, #tpu.memory_space<vmem>>, %arg11: memref<4x1xf32, #tpu.memory_space<vmem>>, %arg12: memref<1x4x256xf32, #tpu.memory_space<vmem>>) attributes {dimension_semantics = [#tpu.dimension_semantics<parallel>], iteration_bounds = array<i64: 2>, scalar_prefetch = 0 : i64, scratch_operands = 0 : i64, tpu.core_type = #tpu.core_type<tc>, window_params = [{transform_indices = @transform_0, window_bounds = array<i64: 1, 4, 256>}, {transform_indices = @transform_1, window_bounds = array<i64: 1, 4, 768>}, {transform_indices = @transform_2, window_bounds = array<i64: 1, 2, 768>}, {pipeline_mode = #tpu.pipeline_mode<synchronous>, transform_indices = @transform_3, window_bounds = array<i64: 9, 768>}, {pipeline_mode = #tpu.pipeline_mode<synchronous>, transform_indices = @transform_4, window_bounds = array<i64: 9, 4, 2>}, {pipeline_mode = #tpu.pipeline_mode<synchronous>, transform_indices = @transform_5, window_bounds = array<i64: 4, 1>}, {pipeline_mode = #tpu.pipeline_mode<synchronous>, transform_indices = @transform_6, window_bounds = array<i64: 9, 8, 4>}, {pipeline_mode = #tpu.pipeline_mode<synchronous>, transform_indices = @transform_7, window_bounds = array<i64: 9, 8, 4>}, {pipeline_mode = #tpu.pipeline_mode<synchronous>, transform_indices = @transform_8, window_bounds = array<i64: 8, 1>}, {pipeline_mode = #tpu.pipeline_mode<synchronous>, transform_indices = @transform_9, window_bounds = array<i64: 9, 4, 8>}, {pipeline_mode = #tpu.pipeline_mode<synchronous>, transform_indices = @transform_10, window_bounds = array<i64: 4, 1>}, {transform_indices = @transform_11, window_bounds = array<i64: 1, 4, 256>}]} {
    %c0 = arith.constant 0 : index
    %c0_0 = arith.constant 0 : index
    %c0_1 = arith.constant 0 : index
    %0 = vector.load %arg3[%c0, %c0_0, %c0_1] : memref<1x2x768xf32, #tpu.memory_space<vmem>>, vector<1x2x768xf32>
    %1 = vector.shape_cast %0 : vector<1x2x768xf32> to vector<2x768xf32>
    %c0_2 = arith.constant 0 : index
    %c0_3 = arith.constant 0 : index
    %2 = vector.load %arg4[%c0_2, %c0_3] : memref<9x768xf32, #tpu.memory_space<vmem>>, vector<1x768xf32>
    %c17_i32 = arith.constant 17 : i32
    %3 = tpu.dynamic_rotate %1 by %c17_i32 dim 1 : vector<2x768xf32>, i32 -> vector<2x768xf32>
    %4 = vector.broadcast %2 : vector<1x768xf32> to vector<2x768xf32>
    %5 = arith.mulf %3, %4 : vector<2x768xf32>
    %c0_4 = arith.constant 0 : index
    %c0_5 = arith.constant 0 : index
    %c0_6 = arith.constant 0 : index
    %6 = vector.load %arg5[%c0_4, %c0_5, %c0_6] : memref<9x4x2xf32, #tpu.memory_space<vmem>>, vector<1x4x2xf32>
    %7 = vector.shape_cast %6 : vector<1x4x2xf32> to vector<4x2xf32>
    %cst = arith.constant dense<0.000000e+00> : vector<4x768xf32>
    %8 = tpu.matmul %7, %5, %cst {dimension_numbers = #tpu.dot_dimension_numbers<[1], [0], [0], [1], [0, 0, 1, 1], [], []>} : vector<4x2xf32>, vector<2x768xf32>, vector<4x768xf32> -> vector<4x768xf32>
    %c1 = arith.constant 1 : index
    %c0_7 = arith.constant 0 : index
    %9 = vector.load %arg4[%c1, %c0_7] : memref<9x768xf32, #tpu.memory_space<vmem>>, vector<1x768xf32>
    %c16_i32 = arith.constant 16 : i32
    %10 = tpu.dynamic_rotate %1 by %c16_i32 dim 1 : vector<2x768xf32>, i32 -> vector<2x768xf32>
    %11 = vector.broadcast %9 : vector<1x768xf32> to vector<2x768xf32>
    %12 = arith.mulf %10, %11 : vector<2x768xf32>
    %c1_8 = arith.constant 1 : index
    %c0_9 = arith.constant 0 : index
    %c0_10 = arith.constant 0 : index
    %13 = vector.load %arg5[%c1_8, %c0_9, %c0_10] : memref<9x4x2xf32, #tpu.memory_space<vmem>>, vector<1x4x2xf32>
    %14 = vector.shape_cast %13 : vector<1x4x2xf32> to vector<4x2xf32>
    %cst_11 = arith.constant dense<0.000000e+00> : vector<4x768xf32>
    %15 = tpu.matmul %14, %12, %cst_11 {dimension_numbers = #tpu.dot_dimension_numbers<[1], [0], [0], [1], [0, 0, 1, 1], [], []>} : vector<4x2xf32>, vector<2x768xf32>, vector<4x768xf32> -> vector<4x768xf32>
    %16 = arith.addf %8, %15 : vector<4x768xf32>
    %c2 = arith.constant 2 : index
    %c0_12 = arith.constant 0 : index
    %17 = vector.load %arg4[%c2, %c0_12] : memref<9x768xf32, #tpu.memory_space<vmem>>, vector<1x768xf32>
    %c15_i32 = arith.constant 15 : i32
    %18 = tpu.dynamic_rotate %1 by %c15_i32 dim 1 : vector<2x768xf32>, i32 -> vector<2x768xf32>
    %19 = vector.broadcast %17 : vector<1x768xf32> to vector<2x768xf32>
    %20 = arith.mulf %18, %19 : vector<2x768xf32>
    %c2_13 = arith.constant 2 : index
    %c0_14 = arith.constant 0 : index
    %c0_15 = arith.constant 0 : index
    %21 = vector.load %arg5[%c2_13, %c0_14, %c0_15] : memref<9x4x2xf32, #tpu.memory_space<vmem>>, vector<1x4x2xf32>
    %22 = vector.shape_cast %21 : vector<1x4x2xf32> to vector<4x2xf32>
    %cst_16 = arith.constant dense<0.000000e+00> : vector<4x768xf32>
    %23 = tpu.matmul %22, %20, %cst_16 {dimension_numbers = #tpu.dot_dimension_numbers<[1], [0], [0], [1], [0, 0, 1, 1], [], []>} : vector<4x2xf32>, vector<2x768xf32>, vector<4x768xf32> -> vector<4x768xf32>
    %24 = arith.addf %16, %23 : vector<4x768xf32>
    %c3 = arith.constant 3 : index
    %c0_17 = arith.constant 0 : index
    %25 = vector.load %arg4[%c3, %c0_17] : memref<9x768xf32, #tpu.memory_space<vmem>>, vector<1x768xf32>
    %c1_i32 = arith.constant 1 : i32
    %26 = tpu.dynamic_rotate %1 by %c1_i32 dim 1 : vector<2x768xf32>, i32 -> vector<2x768xf32>
    %27 = vector.broadcast %25 : vector<1x768xf32> to vector<2x768xf32>
    %28 = arith.mulf %26, %27 : vector<2x768xf32>
    %c3_18 = arith.constant 3 : index
    %c0_19 = arith.constant 0 : index
    %c0_20 = arith.constant 0 : index
    %29 = vector.load %arg5[%c3_18, %c0_19, %c0_20] : memref<9x4x2xf32, #tpu.memory_space<vmem>>, vector<1x4x2xf32>
    %30 = vector.shape_cast %29 : vector<1x4x2xf32> to vector<4x2xf32>
    %cst_21 = arith.constant dense<0.000000e+00> : vector<4x768xf32>
    %31 = tpu.matmul %30, %28, %cst_21 {dimension_numbers = #tpu.dot_dimension_numbers<[1], [0], [0], [1], [0, 0, 1, 1], [], []>} : vector<4x2xf32>, vector<2x768xf32>, vector<4x768xf32> -> vector<4x768xf32>
    %32 = arith.addf %24, %31 : vector<4x768xf32>
    %c4 = arith.constant 4 : index
    %c0_22 = arith.constant 0 : index
    %c0_23 = arith.constant 0 : index
    %33 = vector.load %arg5[%c4, %c0_22, %c0_23] : memref<9x4x2xf32, #tpu.memory_space<vmem>>, vector<1x4x2xf32>
    %34 = vector.shape_cast %33 : vector<1x4x2xf32> to vector<4x2xf32>
    %cst_24 = arith.constant dense<0.000000e+00> : vector<4x768xf32>
    %35 = tpu.matmul %34, %1, %cst_24 {dimension_numbers = #tpu.dot_dimension_numbers<[1], [0], [0], [1], [0, 0, 1, 1], [], []>} : vector<4x2xf32>, vector<2x768xf32>, vector<4x768xf32> -> vector<4x768xf32>
    %36 = arith.addf %32, %35 : vector<4x768xf32>
    %c5 = arith.constant 5 : index
    %c0_25 = arith.constant 0 : index
    %37 = vector.load %arg4[%c5, %c0_25] : memref<9x768xf32, #tpu.memory_space<vmem>>, vector<1x768xf32>
    %c767_i32 = arith.constant 767 : i32
    %38 = tpu.dynamic_rotate %1 by %c767_i32 dim 1 : vector<2x768xf32>, i32 -> vector<2x768xf32>
    %39 = vector.broadcast %37 : vector<1x768xf32> to vector<2x768xf32>
    %40 = arith.mulf %38, %39 : vector<2x768xf32>
    %c5_26 = arith.constant 5 : index
    %c0_27 = arith.constant 0 : index
    %c0_28 = arith.constant 0 : index
    %41 = vector.load %arg5[%c5_26, %c0_27, %c0_28] : memref<9x4x2xf32, #tpu.memory_space<vmem>>, vector<1x4x2xf32>
    %42 = vector.shape_cast %41 : vector<1x4x2xf32> to vector<4x2xf32>
    %cst_29 = arith.constant dense<0.000000e+00> : vector<4x768xf32>
    %43 = tpu.matmul %42, %40, %cst_29 {dimension_numbers = #tpu.dot_dimension_numbers<[1], [0], [0], [1], [0, 0, 1, 1], [], []>} : vector<4x2xf32>, vector<2x768xf32>, vector<4x768xf32> -> vector<4x768xf32>
    %44 = arith.addf %36, %43 : vector<4x768xf32>
    %c6 = arith.constant 6 : index
    %c0_30 = arith.constant 0 : index
    %45 = vector.load %arg4[%c6, %c0_30] : memref<9x768xf32, #tpu.memory_space<vmem>>, vector<1x768xf32>
    %c753_i32 = arith.constant 753 : i32
    %46 = tpu.dynamic_rotate %1 by %c753_i32 dim 1 : vector<2x768xf32>, i32 -> vector<2x768xf32>
    %47 = vector.broadcast %45 : vector<1x768xf32> to vector<2x768xf32>
    %48 = arith.mulf %46, %47 : vector<2x768xf32>
    %c6_31 = arith.constant 6 : index
    %c0_32 = arith.constant 0 : index
    %c0_33 = arith.constant 0 : index
    %49 = vector.load %arg5[%c6_31, %c0_32, %c0_33] : memref<9x4x2xf32, #tpu.memory_space<vmem>>, vector<1x4x2xf32>
    %50 = vector.shape_cast %49 : vector<1x4x2xf32> to vector<4x2xf32>
    %cst_34 = arith.constant dense<0.000000e+00> : vector<4x768xf32>
    %51 = tpu.matmul %50, %48, %cst_34 {dimension_numbers = #tpu.dot_dimension_numbers<[1], [0], [0], [1], [0, 0, 1, 1], [], []>} : vector<4x2xf32>, vector<2x768xf32>, vector<4x768xf32> -> vector<4x768xf32>
    %52 = arith.addf %44, %51 : vector<4x768xf32>
    %c7 = arith.constant 7 : index
    %c0_35 = arith.constant 0 : index
    %53 = vector.load %arg4[%c7, %c0_35] : memref<9x768xf32, #tpu.memory_space<vmem>>, vector<1x768xf32>
    %c752_i32 = arith.constant 752 : i32
    %54 = tpu.dynamic_rotate %1 by %c752_i32 dim 1 : vector<2x768xf32>, i32 -> vector<2x768xf32>
    %55 = vector.broadcast %53 : vector<1x768xf32> to vector<2x768xf32>
    %56 = arith.mulf %54, %55 : vector<2x768xf32>
    %c7_36 = arith.constant 7 : index
    %c0_37 = arith.constant 0 : index
    %c0_38 = arith.constant 0 : index
    %57 = vector.load %arg5[%c7_36, %c0_37, %c0_38] : memref<9x4x2xf32, #tpu.memory_space<vmem>>, vector<1x4x2xf32>
    %58 = vector.shape_cast %57 : vector<1x4x2xf32> to vector<4x2xf32>
    %cst_39 = arith.constant dense<0.000000e+00> : vector<4x768xf32>
    %59 = tpu.matmul %58, %56, %cst_39 {dimension_numbers = #tpu.dot_dimension_numbers<[1], [0], [0], [1], [0, 0, 1, 1], [], []>} : vector<4x2xf32>, vector<2x768xf32>, vector<4x768xf32> -> vector<4x768xf32>
    %60 = arith.addf %52, %59 : vector<4x768xf32>
    %c8 = arith.constant 8 : index
    %c0_40 = arith.constant 0 : index
    %61 = vector.load %arg4[%c8, %c0_40] : memref<9x768xf32, #tpu.memory_space<vmem>>, vector<1x768xf32>
    %c751_i32 = arith.constant 751 : i32
    %62 = tpu.dynamic_rotate %1 by %c751_i32 dim 1 : vector<2x768xf32>, i32 -> vector<2x768xf32>
    %63 = vector.broadcast %61 : vector<1x768xf32> to vector<2x768xf32>
    %64 = arith.mulf %62, %63 : vector<2x768xf32>
    %c8_41 = arith.constant 8 : index
    %c0_42 = arith.constant 0 : index
    %c0_43 = arith.constant 0 : index
    %65 = vector.load %arg5[%c8_41, %c0_42, %c0_43] : memref<9x4x2xf32, #tpu.memory_space<vmem>>, vector<1x4x2xf32>
    %66 = vector.shape_cast %65 : vector<1x4x2xf32> to vector<4x2xf32>
    %cst_44 = arith.constant dense<0.000000e+00> : vector<4x768xf32>
    %67 = tpu.matmul %66, %64, %cst_44 {dimension_numbers = #tpu.dot_dimension_numbers<[1], [0], [0], [1], [0, 0, 1, 1], [], []>} : vector<4x2xf32>, vector<2x768xf32>, vector<4x768xf32> -> vector<4x768xf32>
    %68 = arith.addf %60, %67 : vector<4x768xf32>
    %c0_45 = arith.constant 0 : index
    %c0_46 = arith.constant 0 : index
    %69 = vector.load %arg6[%c0_45, %c0_46] : memref<4x1xf32, #tpu.memory_space<vmem>>, vector<4x1xf32>
    %70 = vector.broadcast %69 : vector<4x1xf32> to vector<4x768xf32>
    %71 = arith.addf %68, %70 : vector<4x768xf32>
    %cst_47 = arith.constant 0.000000e+00 : f32
    %72 = vector.broadcast %cst_47 : f32 to vector<4x768xf32>
    %73 = arith.maximumf %71, %72 : vector<4x768xf32>
    %c0_48 = arith.constant 0 : index
    %c0_49 = arith.constant 0 : index
    %c0_50 = arith.constant 0 : index
    %74 = vector.load %arg1[%c0_48, %c0_49, %c0_50] : memref<1x4x256xf32, #tpu.memory_space<vmem>>, vector<1x4x256xf32>
    %75 = vector.shape_cast %74 : vector<1x4x256xf32> to vector<4x256xf32>
    %76 = tpu.concatenate %75, %75, %75 in 1 : vector<4x256xf32>, vector<4x256xf32>, vector<4x256xf32> -> vector<4x768xf32>
    %c0_51 = arith.constant 0 : index
    %c0_52 = arith.constant 0 : index
    %c0_53 = arith.constant 0 : index
    %77 = vector.load %arg2[%c0_51, %c0_52, %c0_53] : memref<1x4x768xf32, #tpu.memory_space<vmem>>, vector<1x4x768xf32>
    %78 = vector.shape_cast %77 : vector<1x4x768xf32> to vector<4x768xf32>
    %79 = arith.subf %78, %76 : vector<4x768xf32>
    %c0_54 = arith.constant 0 : index
    %c0_55 = arith.constant 0 : index
    %80 = vector.load %arg4[%c0_54, %c0_55] : memref<9x768xf32, #tpu.memory_space<vmem>>, vector<1x768xf32>
    %c17_i32_56 = arith.constant 17 : i32
    %81 = tpu.dynamic_rotate %79 by %c17_i32_56 dim 1 : vector<4x768xf32>, i32 -> vector<4x768xf32>
    %82 = vector.broadcast %80 : vector<1x768xf32> to vector<4x768xf32>
    %83 = arith.mulf %81, %82 : vector<4x768xf32>
    %c0_57 = arith.constant 0 : index
    %c0_58 = arith.constant 0 : index
    %c0_59 = arith.constant 0 : index
    %84 = vector.load %arg7[%c0_57, %c0_58, %c0_59] : memref<9x8x4xf32, #tpu.memory_space<vmem>>, vector<1x8x4xf32>
    %85 = vector.shape_cast %84 : vector<1x8x4xf32> to vector<8x4xf32>
    %cst_60 = arith.constant dense<0.000000e+00> : vector<8x768xf32>
    %86 = tpu.matmul %85, %83, %cst_60 {dimension_numbers = #tpu.dot_dimension_numbers<[1], [0], [0], [1], [0, 0, 1, 1], [], []>} : vector<8x4xf32>, vector<4x768xf32>, vector<8x768xf32> -> vector<8x768xf32>
    %c17_i32_61 = arith.constant 17 : i32
    %87 = tpu.dynamic_rotate %73 by %c17_i32_61 dim 1 : vector<4x768xf32>, i32 -> vector<4x768xf32>
    %88 = vector.broadcast %80 : vector<1x768xf32> to vector<4x768xf32>
    %89 = arith.mulf %87, %88 : vector<4x768xf32>
    %c0_62 = arith.constant 0 : index
    %c0_63 = arith.constant 0 : index
    %c0_64 = arith.constant 0 : index
    %90 = vector.load %arg8[%c0_62, %c0_63, %c0_64] : memref<9x8x4xf32, #tpu.memory_space<vmem>>, vector<1x8x4xf32>
    %91 = vector.shape_cast %90 : vector<1x8x4xf32> to vector<8x4xf32>
    %cst_65 = arith.constant dense<0.000000e+00> : vector<8x768xf32>
    %92 = tpu.matmul %91, %89, %cst_65 {dimension_numbers = #tpu.dot_dimension_numbers<[1], [0], [0], [1], [0, 0, 1, 1], [], []>} : vector<8x4xf32>, vector<4x768xf32>, vector<8x768xf32> -> vector<8x768xf32>
    %93 = arith.addf %86, %92 : vector<8x768xf32>
    %c1_66 = arith.constant 1 : index
    %c0_67 = arith.constant 0 : index
    %94 = vector.load %arg4[%c1_66, %c0_67] : memref<9x768xf32, #tpu.memory_space<vmem>>, vector<1x768xf32>
    %c16_i32_68 = arith.constant 16 : i32
    %95 = tpu.dynamic_rotate %79 by %c16_i32_68 dim 1 : vector<4x768xf32>, i32 -> vector<4x768xf32>
    %96 = vector.broadcast %94 : vector<1x768xf32> to vector<4x768xf32>
    %97 = arith.mulf %95, %96 : vector<4x768xf32>
    %c1_69 = arith.constant 1 : index
    %c0_70 = arith.constant 0 : index
    %c0_71 = arith.constant 0 : index
    %98 = vector.load %arg7[%c1_69, %c0_70, %c0_71] : memref<9x8x4xf32, #tpu.memory_space<vmem>>, vector<1x8x4xf32>
    %99 = vector.shape_cast %98 : vector<1x8x4xf32> to vector<8x4xf32>
    %cst_72 = arith.constant dense<0.000000e+00> : vector<8x768xf32>
    %100 = tpu.matmul %99, %97, %cst_72 {dimension_numbers = #tpu.dot_dimension_numbers<[1], [0], [0], [1], [0, 0, 1, 1], [], []>} : vector<8x4xf32>, vector<4x768xf32>, vector<8x768xf32> -> vector<8x768xf32>
    %101 = arith.addf %93, %100 : vector<8x768xf32>
    %c16_i32_73 = arith.constant 16 : i32
    %102 = tpu.dynamic_rotate %73 by %c16_i32_73 dim 1 : vector<4x768xf32>, i32 -> vector<4x768xf32>
    %103 = vector.broadcast %94 : vector<1x768xf32> to vector<4x768xf32>
    %104 = arith.mulf %102, %103 : vector<4x768xf32>
    %c1_74 = arith.constant 1 : index
    %c0_75 = arith.constant 0 : index
    %c0_76 = arith.constant 0 : index
    %105 = vector.load %arg8[%c1_74, %c0_75, %c0_76] : memref<9x8x4xf32, #tpu.memory_space<vmem>>, vector<1x8x4xf32>
    %106 = vector.shape_cast %105 : vector<1x8x4xf32> to vector<8x4xf32>
    %cst_77 = arith.constant dense<0.000000e+00> : vector<8x768xf32>
    %107 = tpu.matmul %106, %104, %cst_77 {dimension_numbers = #tpu.dot_dimension_numbers<[1], [0], [0], [1], [0, 0, 1, 1], [], []>} : vector<8x4xf32>, vector<4x768xf32>, vector<8x768xf32> -> vector<8x768xf32>
    %108 = arith.addf %101, %107 : vector<8x768xf32>
    %c2_78 = arith.constant 2 : index
    %c0_79 = arith.constant 0 : index
    %109 = vector.load %arg4[%c2_78, %c0_79] : memref<9x768xf32, #tpu.memory_space<vmem>>, vector<1x768xf32>
    %c15_i32_80 = arith.constant 15 : i32
    %110 = tpu.dynamic_rotate %79 by %c15_i32_80 dim 1 : vector<4x768xf32>, i32 -> vector<4x768xf32>
    %111 = vector.broadcast %109 : vector<1x768xf32> to vector<4x768xf32>
    %112 = arith.mulf %110, %111 : vector<4x768xf32>
    %c2_81 = arith.constant 2 : index
    %c0_82 = arith.constant 0 : index
    %c0_83 = arith.constant 0 : index
    %113 = vector.load %arg7[%c2_81, %c0_82, %c0_83] : memref<9x8x4xf32, #tpu.memory_space<vmem>>, vector<1x8x4xf32>
    %114 = vector.shape_cast %113 : vector<1x8x4xf32> to vector<8x4xf32>
    %cst_84 = arith.constant dense<0.000000e+00> : vector<8x768xf32>
    %115 = tpu.matmul %114, %112, %cst_84 {dimension_numbers = #tpu.dot_dimension_numbers<[1], [0], [0], [1], [0, 0, 1, 1], [], []>} : vector<8x4xf32>, vector<4x768xf32>, vector<8x768xf32> -> vector<8x768xf32>
    %116 = arith.addf %108, %115 : vector<8x768xf32>
    %c15_i32_85 = arith.constant 15 : i32
    %117 = tpu.dynamic_rotate %73 by %c15_i32_85 dim 1 : vector<4x768xf32>, i32 -> vector<4x768xf32>
    %118 = vector.broadcast %109 : vector<1x768xf32> to vector<4x768xf32>
    %119 = arith.mulf %117, %118 : vector<4x768xf32>
    %c2_86 = arith.constant 2 : index
    %c0_87 = arith.constant 0 : index
    %c0_88 = arith.constant 0 : index
    %120 = vector.load %arg8[%c2_86, %c0_87, %c0_88] : memref<9x8x4xf32, #tpu.memory_space<vmem>>, vector<1x8x4xf32>
    %121 = vector.shape_cast %120 : vector<1x8x4xf32> to vector<8x4xf32>
    %cst_89 = arith.constant dense<0.000000e+00> : vector<8x768xf32>
    %122 = tpu.matmul %121, %119, %cst_89 {dimension_numbers = #tpu.dot_dimension_numbers<[1], [0], [0], [1], [0, 0, 1, 1], [], []>} : vector<8x4xf32>, vector<4x768xf32>, vector<8x768xf32> -> vector<8x768xf32>
    %123 = arith.addf %116, %122 : vector<8x768xf32>
    %c3_90 = arith.constant 3 : index
    %c0_91 = arith.constant 0 : index
    %124 = vector.load %arg4[%c3_90, %c0_91] : memref<9x768xf32, #tpu.memory_space<vmem>>, vector<1x768xf32>
    %c1_i32_92 = arith.constant 1 : i32
    %125 = tpu.dynamic_rotate %79 by %c1_i32_92 dim 1 : vector<4x768xf32>, i32 -> vector<4x768xf32>
    %126 = vector.broadcast %124 : vector<1x768xf32> to vector<4x768xf32>
    %127 = arith.mulf %125, %126 : vector<4x768xf32>
    %c3_93 = arith.constant 3 : index
    %c0_94 = arith.constant 0 : index
    %c0_95 = arith.constant 0 : index
    %128 = vector.load %arg7[%c3_93, %c0_94, %c0_95] : memref<9x8x4xf32, #tpu.memory_space<vmem>>, vector<1x8x4xf32>
    %129 = vector.shape_cast %128 : vector<1x8x4xf32> to vector<8x4xf32>
    %cst_96 = arith.constant dense<0.000000e+00> : vector<8x768xf32>
    %130 = tpu.matmul %129, %127, %cst_96 {dimension_numbers = #tpu.dot_dimension_numbers<[1], [0], [0], [1], [0, 0, 1, 1], [], []>} : vector<8x4xf32>, vector<4x768xf32>, vector<8x768xf32> -> vector<8x768xf32>
    %131 = arith.addf %123, %130 : vector<8x768xf32>
    %c1_i32_97 = arith.constant 1 : i32
    %132 = tpu.dynamic_rotate %73 by %c1_i32_97 dim 1 : vector<4x768xf32>, i32 -> vector<4x768xf32>
    %133 = vector.broadcast %124 : vector<1x768xf32> to vector<4x768xf32>
    %134 = arith.mulf %132, %133 : vector<4x768xf32>
    %c3_98 = arith.constant 3 : index
    %c0_99 = arith.constant 0 : index
    %c0_100 = arith.constant 0 : index
    %135 = vector.load %arg8[%c3_98, %c0_99, %c0_100] : memref<9x8x4xf32, #tpu.memory_space<vmem>>, vector<1x8x4xf32>
    %136 = vector.shape_cast %135 : vector<1x8x4xf32> to vector<8x4xf32>
    %cst_101 = arith.constant dense<0.000000e+00> : vector<8x768xf32>
    %137 = tpu.matmul %136, %134, %cst_101 {dimension_numbers = #tpu.dot_dimension_numbers<[1], [0], [0], [1], [0, 0, 1, 1], [], []>} : vector<8x4xf32>, vector<4x768xf32>, vector<8x768xf32> -> vector<8x768xf32>
    %138 = arith.addf %131, %137 : vector<8x768xf32>
    %c4_102 = arith.constant 4 : index
    %c0_103 = arith.constant 0 : index
    %c0_104 = arith.constant 0 : index
    %139 = vector.load %arg7[%c4_102, %c0_103, %c0_104] : memref<9x8x4xf32, #tpu.memory_space<vmem>>, vector<1x8x4xf32>
    %140 = vector.shape_cast %139 : vector<1x8x4xf32> to vector<8x4xf32>
    %cst_105 = arith.constant dense<0.000000e+00> : vector<8x768xf32>
    %141 = tpu.matmul %140, %79, %cst_105 {dimension_numbers = #tpu.dot_dimension_numbers<[1], [0], [0], [1], [0, 0, 1, 1], [], []>} : vector<8x4xf32>, vector<4x768xf32>, vector<8x768xf32> -> vector<8x768xf32>
    %142 = arith.addf %138, %141 : vector<8x768xf32>
    %c4_106 = arith.constant 4 : index
    %c0_107 = arith.constant 0 : index
    %c0_108 = arith.constant 0 : index
    %143 = vector.load %arg8[%c4_106, %c0_107, %c0_108] : memref<9x8x4xf32, #tpu.memory_space<vmem>>, vector<1x8x4xf32>
    %144 = vector.shape_cast %143 : vector<1x8x4xf32> to vector<8x4xf32>
    %cst_109 = arith.constant dense<0.000000e+00> : vector<8x768xf32>
    %145 = tpu.matmul %144, %73, %cst_109 {dimension_numbers = #tpu.dot_dimension_numbers<[1], [0], [0], [1], [0, 0, 1, 1], [], []>} : vector<8x4xf32>, vector<4x768xf32>, vector<8x768xf32> -> vector<8x768xf32>
    %146 = arith.addf %142, %145 : vector<8x768xf32>
    %c5_110 = arith.constant 5 : index
    %c0_111 = arith.constant 0 : index
    %147 = vector.load %arg4[%c5_110, %c0_111] : memref<9x768xf32, #tpu.memory_space<vmem>>, vector<1x768xf32>
    %c767_i32_112 = arith.constant 767 : i32
    %148 = tpu.dynamic_rotate %79 by %c767_i32_112 dim 1 : vector<4x768xf32>, i32 -> vector<4x768xf32>
    %149 = vector.broadcast %147 : vector<1x768xf32> to vector<4x768xf32>
    %150 = arith.mulf %148, %149 : vector<4x768xf32>
    %c5_113 = arith.constant 5 : index
    %c0_114 = arith.constant 0 : index
    %c0_115 = arith.constant 0 : index
    %151 = vector.load %arg7[%c5_113, %c0_114, %c0_115] : memref<9x8x4xf32, #tpu.memory_space<vmem>>, vector<1x8x4xf32>
    %152 = vector.shape_cast %151 : vector<1x8x4xf32> to vector<8x4xf32>
    %cst_116 = arith.constant dense<0.000000e+00> : vector<8x768xf32>
    %153 = tpu.matmul %152, %150, %cst_116 {dimension_numbers = #tpu.dot_dimension_numbers<[1], [0], [0], [1], [0, 0, 1, 1], [], []>} : vector<8x4xf32>, vector<4x768xf32>, vector<8x768xf32> -> vector<8x768xf32>
    %154 = arith.addf %146, %153 : vector<8x768xf32>
    %c767_i32_117 = arith.constant 767 : i32
    %155 = tpu.dynamic_rotate %73 by %c767_i32_117 dim 1 : vector<4x768xf32>, i32 -> vector<4x768xf32>
    %156 = vector.broadcast %147 : vector<1x768xf32> to vector<4x768xf32>
    %157 = arith.mulf %155, %156 : vector<4x768xf32>
    %c5_118 = arith.constant 5 : index
    %c0_119 = arith.constant 0 : index
    %c0_120 = arith.constant 0 : index
    %158 = vector.load %arg8[%c5_118, %c0_119, %c0_120] : memref<9x8x4xf32, #tpu.memory_space<vmem>>, vector<1x8x4xf32>
    %159 = vector.shape_cast %158 : vector<1x8x4xf32> to vector<8x4xf32>
    %cst_121 = arith.constant dense<0.000000e+00> : vector<8x768xf32>
    %160 = tpu.matmul %159, %157, %cst_121 {dimension_numbers = #tpu.dot_dimension_numbers<[1], [0], [0], [1], [0, 0, 1, 1], [], []>} : vector<8x4xf32>, vector<4x768xf32>, vector<8x768xf32> -> vector<8x768xf32>
    %161 = arith.addf %154, %160 : vector<8x768xf32>
    %c6_122 = arith.constant 6 : index
    %c0_123 = arith.constant 0 : index
    %162 = vector.load %arg4[%c6_122, %c0_123] : memref<9x768xf32, #tpu.memory_space<vmem>>, vector<1x768xf32>
    %c753_i32_124 = arith.constant 753 : i32
    %163 = tpu.dynamic_rotate %79 by %c753_i32_124 dim 1 : vector<4x768xf32>, i32 -> vector<4x768xf32>
    %164 = vector.broadcast %162 : vector<1x768xf32> to vector<4x768xf32>
    %165 = arith.mulf %163, %164 : vector<4x768xf32>
    %c6_125 = arith.constant 6 : index
    %c0_126 = arith.constant 0 : index
    %c0_127 = arith.constant 0 : index
    %166 = vector.load %arg7[%c6_125, %c0_126, %c0_127] : memref<9x8x4xf32, #tpu.memory_space<vmem>>, vector<1x8x4xf32>
    %167 = vector.shape_cast %166 : vector<1x8x4xf32> to vector<8x4xf32>
    %cst_128 = arith.constant dense<0.000000e+00> : vector<8x768xf32>
    %168 = tpu.matmul %167, %165, %cst_128 {dimension_numbers = #tpu.dot_dimension_numbers<[1], [0], [0], [1], [0, 0, 1, 1], [], []>} : vector<8x4xf32>, vector<4x768xf32>, vector<8x768xf32> -> vector<8x768xf32>
    %169 = arith.addf %161, %168 : vector<8x768xf32>
    %c753_i32_129 = arith.constant 753 : i32
    %170 = tpu.dynamic_rotate %73 by %c753_i32_129 dim 1 : vector<4x768xf32>, i32 -> vector<4x768xf32>
    %171 = vector.broadcast %162 : vector<1x768xf32> to vector<4x768xf32>
    %172 = arith.mulf %170, %171 : vector<4x768xf32>
    %c6_130 = arith.constant 6 : index
    %c0_131 = arith.constant 0 : index
    %c0_132 = arith.constant 0 : index
    %173 = vector.load %arg8[%c6_130, %c0_131, %c0_132] : memref<9x8x4xf32, #tpu.memory_space<vmem>>, vector<1x8x4xf32>
    %174 = vector.shape_cast %173 : vector<1x8x4xf32> to vector<8x4xf32>
    %cst_133 = arith.constant dense<0.000000e+00> : vector<8x768xf32>
    %175 = tpu.matmul %174, %172, %cst_133 {dimension_numbers = #tpu.dot_dimension_numbers<[1], [0], [0], [1], [0, 0, 1, 1], [], []>} : vector<8x4xf32>, vector<4x768xf32>, vector<8x768xf32> -> vector<8x768xf32>
    %176 = arith.addf %169, %175 : vector<8x768xf32>
    %c7_134 = arith.constant 7 : index
    %c0_135 = arith.constant 0 : index
    %177 = vector.load %arg4[%c7_134, %c0_135] : memref<9x768xf32, #tpu.memory_space<vmem>>, vector<1x768xf32>
    %c752_i32_136 = arith.constant 752 : i32
    %178 = tpu.dynamic_rotate %79 by %c752_i32_136 dim 1 : vector<4x768xf32>, i32 -> vector<4x768xf32>
    %179 = vector.broadcast %177 : vector<1x768xf32> to vector<4x768xf32>
    %180 = arith.mulf %178, %179 : vector<4x768xf32>
    %c7_137 = arith.constant 7 : index
    %c0_138 = arith.constant 0 : index
    %c0_139 = arith.constant 0 : index
    %181 = vector.load %arg7[%c7_137, %c0_138, %c0_139] : memref<9x8x4xf32, #tpu.memory_space<vmem>>, vector<1x8x4xf32>
    %182 = vector.shape_cast %181 : vector<1x8x4xf32> to vector<8x4xf32>
    %cst_140 = arith.constant dense<0.000000e+00> : vector<8x768xf32>
    %183 = tpu.matmul %182, %180, %cst_140 {dimension_numbers = #tpu.dot_dimension_numbers<[1], [0], [0], [1], [0, 0, 1, 1], [], []>} : vector<8x4xf32>, vector<4x768xf32>, vector<8x768xf32> -> vector<8x768xf32>
    %184 = arith.addf %176, %183 : vector<8x768xf32>
    %c752_i32_141 = arith.constant 752 : i32
    %185 = tpu.dynamic_rotate %73 by %c752_i32_141 dim 1 : vector<4x768xf32>, i32 -> vector<4x768xf32>
    %186 = vector.broadcast %177 : vector<1x768xf32> to vector<4x768xf32>
    %187 = arith.mulf %185, %186 : vector<4x768xf32>
    %c7_142 = arith.constant 7 : index
    %c0_143 = arith.constant 0 : index
    %c0_144 = arith.constant 0 : index
    %188 = vector.load %arg8[%c7_142, %c0_143, %c0_144] : memref<9x8x4xf32, #tpu.memory_space<vmem>>, vector<1x8x4xf32>
    %189 = vector.shape_cast %188 : vector<1x8x4xf32> to vector<8x4xf32>
    %cst_145 = arith.constant dense<0.000000e+00> : vector<8x768xf32>
    %190 = tpu.matmul %189, %187, %cst_145 {dimension_numbers = #tpu.dot_dimension_numbers<[1], [0], [0], [1], [0, 0, 1, 1], [], []>} : vector<8x4xf32>, vector<4x768xf32>, vector<8x768xf32> -> vector<8x768xf32>
    %191 = arith.addf %184, %190 : vector<8x768xf32>
    %c8_146 = arith.constant 8 : index
    %c0_147 = arith.constant 0 : index
    %192 = vector.load %arg4[%c8_146, %c0_147] : memref<9x768xf32, #tpu.memory_space<vmem>>, vector<1x768xf32>
    %c751_i32_148 = arith.constant 751 : i32
    %193 = tpu.dynamic_rotate %79 by %c751_i32_148 dim 1 : vector<4x768xf32>, i32 -> vector<4x768xf32>
    %194 = vector.broadcast %192 : vector<1x768xf32> to vector<4x768xf32>
    %195 = arith.mulf %193, %194 : vector<4x768xf32>
    %c8_149 = arith.constant 8 : index
    %c0_150 = arith.constant 0 : index
    %c0_151 = arith.constant 0 : index
    %196 = vector.load %arg7[%c8_149, %c0_150, %c0_151] : memref<9x8x4xf32, #tpu.memory_space<vmem>>, vector<1x8x4xf32>
    %197 = vector.shape_cast %196 : vector<1x8x4xf32> to vector<8x4xf32>
    %cst_152 = arith.constant dense<0.000000e+00> : vector<8x768xf32>
    %198 = tpu.matmul %197, %195, %cst_152 {dimension_numbers = #tpu.dot_dimension_numbers<[1], [0], [0], [1], [0, 0, 1, 1], [], []>} : vector<8x4xf32>, vector<4x768xf32>, vector<8x768xf32> -> vector<8x768xf32>
    %199 = arith.addf %191, %198 : vector<8x768xf32>
    %c751_i32_153 = arith.constant 751 : i32
    %200 = tpu.dynamic_rotate %73 by %c751_i32_153 dim 1 : vector<4x768xf32>, i32 -> vector<4x768xf32>
    %201 = vector.broadcast %192 : vector<1x768xf32> to vector<4x768xf32>
    %202 = arith.mulf %200, %201 : vector<4x768xf32>
    %c8_154 = arith.constant 8 : index
    %c0_155 = arith.constant 0 : index
    %c0_156 = arith.constant 0 : index
    %203 = vector.load %arg8[%c8_154, %c0_155, %c0_156] : memref<9x8x4xf32, #tpu.memory_space<vmem>>, vector<1x8x4xf32>
    %204 = vector.shape_cast %203 : vector<1x8x4xf32> to vector<8x4xf32>
    %cst_157 = arith.constant dense<0.000000e+00> : vector<8x768xf32>
    %205 = tpu.matmul %204, %202, %cst_157 {dimension_numbers = #tpu.dot_dimension_numbers<[1], [0], [0], [1], [0, 0, 1, 1], [], []>} : vector<8x4xf32>, vector<4x768xf32>, vector<8x768xf32> -> vector<8x768xf32>
    %206 = arith.addf %199, %205 : vector<8x768xf32>
    %c0_158 = arith.constant 0 : index
    %c0_159 = arith.constant 0 : index
    %207 = vector.load %arg9[%c0_158, %c0_159] : memref<8x1xf32, #tpu.memory_space<vmem>>, vector<8x1xf32>
    %208 = vector.broadcast %207 : vector<8x1xf32> to vector<8x768xf32>
    %209 = arith.addf %206, %208 : vector<8x768xf32>
    %cst_160 = arith.constant 0.000000e+00 : f32
    %210 = vector.broadcast %cst_160 : f32 to vector<8x768xf32>
    %211 = arith.maximumf %209, %210 : vector<8x768xf32>
    %c0_161 = arith.constant 0 : index
    %c0_162 = arith.constant 0 : index
    %212 = vector.load %arg4[%c0_161, %c0_162] : memref<9x768xf32, #tpu.memory_space<vmem>>, vector<1x768xf32>
    %c17_i32_163 = arith.constant 17 : i32
    %213 = tpu.dynamic_rotate %211 by %c17_i32_163 dim 1 : vector<8x768xf32>, i32 -> vector<8x768xf32>
    %214 = vector.broadcast %212 : vector<1x768xf32> to vector<8x768xf32>
    %215 = arith.mulf %213, %214 : vector<8x768xf32>
    %c0_164 = arith.constant 0 : index
    %c0_165 = arith.constant 0 : index
    %c0_166 = arith.constant 0 : index
    %216 = vector.load %arg10[%c0_164, %c0_165, %c0_166] : memref<9x4x8xf32, #tpu.memory_space<vmem>>, vector<1x4x8xf32>
    %217 = vector.shape_cast %216 : vector<1x4x8xf32> to vector<4x8xf32>
    %cst_167 = arith.constant dense<0.000000e+00> : vector<4x768xf32>
    %218 = tpu.matmul %217, %215, %cst_167 {dimension_numbers = #tpu.dot_dimension_numbers<[1], [0], [0], [1], [0, 0, 1, 1], [], []>} : vector<4x8xf32>, vector<8x768xf32>, vector<4x768xf32> -> vector<4x768xf32>
    %c1_168 = arith.constant 1 : index
    %c0_169 = arith.constant 0 : index
    %219 = vector.load %arg4[%c1_168, %c0_169] : memref<9x768xf32, #tpu.memory_space<vmem>>, vector<1x768xf32>
    %c16_i32_170 = arith.constant 16 : i32
    %220 = tpu.dynamic_rotate %211 by %c16_i32_170 dim 1 : vector<8x768xf32>, i32 -> vector<8x768xf32>
    %221 = vector.broadcast %219 : vector<1x768xf32> to vector<8x768xf32>
    %222 = arith.mulf %220, %221 : vector<8x768xf32>
    %c1_171 = arith.constant 1 : index
    %c0_172 = arith.constant 0 : index
    %c0_173 = arith.constant 0 : index
    %223 = vector.load %arg10[%c1_171, %c0_172, %c0_173] : memref<9x4x8xf32, #tpu.memory_space<vmem>>, vector<1x4x8xf32>
    %224 = vector.shape_cast %223 : vector<1x4x8xf32> to vector<4x8xf32>
    %cst_174 = arith.constant dense<0.000000e+00> : vector<4x768xf32>
    %225 = tpu.matmul %224, %222, %cst_174 {dimension_numbers = #tpu.dot_dimension_numbers<[1], [0], [0], [1], [0, 0, 1, 1], [], []>} : vector<4x8xf32>, vector<8x768xf32>, vector<4x768xf32> -> vector<4x768xf32>
    %226 = arith.addf %218, %225 : vector<4x768xf32>
    %c2_175 = arith.constant 2 : index
    %c0_176 = arith.constant 0 : index
    %227 = vector.load %arg4[%c2_175, %c0_176] : memref<9x768xf32, #tpu.memory_space<vmem>>, vector<1x768xf32>
    %c15_i32_177 = arith.constant 15 : i32
    %228 = tpu.dynamic_rotate %211 by %c15_i32_177 dim 1 : vector<8x768xf32>, i32 -> vector<8x768xf32>
    %229 = vector.broadcast %227 : vector<1x768xf32> to vector<8x768xf32>
    %230 = arith.mulf %228, %229 : vector<8x768xf32>
    %c2_178 = arith.constant 2 : index
    %c0_179 = arith.constant 0 : index
    %c0_180 = arith.constant 0 : index
    %231 = vector.load %arg10[%c2_178, %c0_179, %c0_180] : memref<9x4x8xf32, #tpu.memory_space<vmem>>, vector<1x4x8xf32>
    %232 = vector.shape_cast %231 : vector<1x4x8xf32> to vector<4x8xf32>
    %cst_181 = arith.constant dense<0.000000e+00> : vector<4x768xf32>
    %233 = tpu.matmul %232, %230, %cst_181 {dimension_numbers = #tpu.dot_dimension_numbers<[1], [0], [0], [1], [0, 0, 1, 1], [], []>} : vector<4x8xf32>, vector<8x768xf32>, vector<4x768xf32> -> vector<4x768xf32>
    %234 = arith.addf %226, %233 : vector<4x768xf32>
    %c3_182 = arith.constant 3 : index
    %c0_183 = arith.constant 0 : index
    %235 = vector.load %arg4[%c3_182, %c0_183] : memref<9x768xf32, #tpu.memory_space<vmem>>, vector<1x768xf32>
    %c1_i32_184 = arith.constant 1 : i32
    %236 = tpu.dynamic_rotate %211 by %c1_i32_184 dim 1 : vector<8x768xf32>, i32 -> vector<8x768xf32>
    %237 = vector.broadcast %235 : vector<1x768xf32> to vector<8x768xf32>
    %238 = arith.mulf %236, %237 : vector<8x768xf32>
    %c3_185 = arith.constant 3 : index
    %c0_186 = arith.constant 0 : index
    %c0_187 = arith.constant 0 : index
    %239 = vector.load %arg10[%c3_185, %c0_186, %c0_187] : memref<9x4x8xf32, #tpu.memory_space<vmem>>, vector<1x4x8xf32>
    %240 = vector.shape_cast %239 : vector<1x4x8xf32> to vector<4x8xf32>
    %cst_188 = arith.constant dense<0.000000e+00> : vector<4x768xf32>
    %241 = tpu.matmul %240, %238, %cst_188 {dimension_numbers = #tpu.dot_dimension_numbers<[1], [0], [0], [1], [0, 0, 1, 1], [], []>} : vector<4x8xf32>, vector<8x768xf32>, vector<4x768xf32> -> vector<4x768xf32>
    %242 = arith.addf %234, %241 : vector<4x768xf32>
    %c4_189 = arith.constant 4 : index
    %c0_190 = arith.constant 0 : index
    %c0_191 = arith.constant 0 : index
    %243 = vector.load %arg10[%c4_189, %c0_190, %c0_191] : memref<9x4x8xf32, #tpu.memory_space<vmem>>, vector<1x4x8xf32>
    %244 = vector.shape_cast %243 : vector<1x4x8xf32> to vector<4x8xf32>
    %cst_192 = arith.constant dense<0.000000e+00> : vector<4x768xf32>
    %245 = tpu.matmul %244, %211, %cst_192 {dimension_numbers = #tpu.dot_dimension_numbers<[1], [0], [0], [1], [0, 0, 1, 1], [], []>} : vector<4x8xf32>, vector<8x768xf32>, vector<4x768xf32> -> vector<4x768xf32>
    %246 = arith.addf %242, %245 : vector<4x768xf32>
    %c5_193 = arith.constant 5 : index
    %c0_194 = arith.constant 0 : index
    %247 = vector.load %arg4[%c5_193, %c0_194] : memref<9x768xf32, #tpu.memory_space<vmem>>, vector<1x768xf32>
    %c767_i32_195 = arith.constant 767 : i32
    %248 = tpu.dynamic_rotate %211 by %c767_i32_195 dim 1 : vector<8x768xf32>, i32 -> vector<8x768xf32>
    %249 = vector.broadcast %247 : vector<1x768xf32> to vector<8x768xf32>
    %250 = arith.mulf %248, %249 : vector<8x768xf32>
    %c5_196 = arith.constant 5 : index
    %c0_197 = arith.constant 0 : index
    %c0_198 = arith.constant 0 : index
    %251 = vector.load %arg10[%c5_196, %c0_197, %c0_198] : memref<9x4x8xf32, #tpu.memory_space<vmem>>, vector<1x4x8xf32>
    %252 = vector.shape_cast %251 : vector<1x4x8xf32> to vector<4x8xf32>
    %cst_199 = arith.constant dense<0.000000e+00> : vector<4x768xf32>
    %253 = tpu.matmul %252, %250, %cst_199 {dimension_numbers = #tpu.dot_dimension_numbers<[1], [0], [0], [1], [0, 0, 1, 1], [], []>} : vector<4x8xf32>, vector<8x768xf32>, vector<4x768xf32> -> vector<4x768xf32>
    %254 = arith.addf %246, %253 : vector<4x768xf32>
    %c6_200 = arith.constant 6 : index
    %c0_201 = arith.constant 0 : index
    %255 = vector.load %arg4[%c6_200, %c0_201] : memref<9x768xf32, #tpu.memory_space<vmem>>, vector<1x768xf32>
    %c753_i32_202 = arith.constant 753 : i32
    %256 = tpu.dynamic_rotate %211 by %c753_i32_202 dim 1 : vector<8x768xf32>, i32 -> vector<8x768xf32>
    %257 = vector.broadcast %255 : vector<1x768xf32> to vector<8x768xf32>
    %258 = arith.mulf %256, %257 : vector<8x768xf32>
    %c6_203 = arith.constant 6 : index
    %c0_204 = arith.constant 0 : index
    %c0_205 = arith.constant 0 : index
    %259 = vector.load %arg10[%c6_203, %c0_204, %c0_205] : memref<9x4x8xf32, #tpu.memory_space<vmem>>, vector<1x4x8xf32>
    %260 = vector.shape_cast %259 : vector<1x4x8xf32> to vector<4x8xf32>
    %cst_206 = arith.constant dense<0.000000e+00> : vector<4x768xf32>
    %261 = tpu.matmul %260, %258, %cst_206 {dimension_numbers = #tpu.dot_dimension_numbers<[1], [0], [0], [1], [0, 0, 1, 1], [], []>} : vector<4x8xf32>, vector<8x768xf32>, vector<4x768xf32> -> vector<4x768xf32>
    %262 = arith.addf %254, %261 : vector<4x768xf32>
    %c7_207 = arith.constant 7 : index
    %c0_208 = arith.constant 0 : index
    %263 = vector.load %arg4[%c7_207, %c0_208] : memref<9x768xf32, #tpu.memory_space<vmem>>, vector<1x768xf32>
    %c752_i32_209 = arith.constant 752 : i32
    %264 = tpu.dynamic_rotate %211 by %c752_i32_209 dim 1 : vector<8x768xf32>, i32 -> vector<8x768xf32>
    %265 = vector.broadcast %263 : vector<1x768xf32> to vector<8x768xf32>
    %266 = arith.mulf %264, %265 : vector<8x768xf32>
    %c7_210 = arith.constant 7 : index
    %c0_211 = arith.constant 0 : index
    %c0_212 = arith.constant 0 : index
    %267 = vector.load %arg10[%c7_210, %c0_211, %c0_212] : memref<9x4x8xf32, #tpu.memory_space<vmem>>, vector<1x4x8xf32>
    %268 = vector.shape_cast %267 : vector<1x4x8xf32> to vector<4x8xf32>
    %cst_213 = arith.constant dense<0.000000e+00> : vector<4x768xf32>
    %269 = tpu.matmul %268, %266, %cst_213 {dimension_numbers = #tpu.dot_dimension_numbers<[1], [0], [0], [1], [0, 0, 1, 1], [], []>} : vector<4x8xf32>, vector<8x768xf32>, vector<4x768xf32> -> vector<4x768xf32>
    %270 = arith.addf %262, %269 : vector<4x768xf32>
    %c8_214 = arith.constant 8 : index
    %c0_215 = arith.constant 0 : index
    %271 = vector.load %arg4[%c8_214, %c0_215] : memref<9x768xf32, #tpu.memory_space<vmem>>, vector<1x768xf32>
    %c751_i32_216 = arith.constant 751 : i32
    %272 = tpu.dynamic_rotate %211 by %c751_i32_216 dim 1 : vector<8x768xf32>, i32 -> vector<8x768xf32>
    %273 = vector.broadcast %271 : vector<1x768xf32> to vector<8x768xf32>
    %274 = arith.mulf %272, %273 : vector<8x768xf32>
    %c8_217 = arith.constant 8 : index
    %c0_218 = arith.constant 0 : index
    %c0_219 = arith.constant 0 : index
    %275 = vector.load %arg10[%c8_217, %c0_218, %c0_219] : memref<9x4x8xf32, #tpu.memory_space<vmem>>, vector<1x4x8xf32>
    %276 = vector.shape_cast %275 : vector<1x4x8xf32> to vector<4x8xf32>
    %cst_220 = arith.constant dense<0.000000e+00> : vector<4x768xf32>
    %277 = tpu.matmul %276, %274, %cst_220 {dimension_numbers = #tpu.dot_dimension_numbers<[1], [0], [0], [1], [0, 0, 1, 1], [], []>} : vector<4x8xf32>, vector<8x768xf32>, vector<4x768xf32> -> vector<4x768xf32>
    %278 = arith.addf %270, %277 : vector<4x768xf32>
    %c0_221 = arith.constant 0 : index
    %c0_222 = arith.constant 0 : index
    %279 = vector.load %arg11[%c0_221, %c0_222] : memref<4x1xf32, #tpu.memory_space<vmem>>, vector<4x1xf32>
    %280 = vector.broadcast %279 : vector<4x1xf32> to vector<4x768xf32>
    %281 = arith.addf %278, %280 : vector<4x768xf32>
    %282 = vector.extract_strided_slice %281 {offsets = [0, 0], sizes = [4, 256], strides = [1, 1]} : vector<4x768xf32> to vector<4x256xf32>
    %283 = vector.extract_strided_slice %281 {offsets = [0, 256], sizes = [4, 256], strides = [1, 1]} : vector<4x768xf32> to vector<4x256xf32>
    %284 = vector.extract_strided_slice %281 {offsets = [0, 512], sizes = [4, 256], strides = [1, 1]} : vector<4x768xf32> to vector<4x256xf32>
    %285 = arith.maximumf %282, %283 : vector<4x256xf32>
    %286 = arith.maximumf %285, %284 : vector<4x256xf32>
    %287 = arith.subf %282, %286 : vector<4x256xf32>
    %288 = math.exp %287 : vector<4x256xf32>
    %289 = arith.subf %283, %286 : vector<4x256xf32>
    %290 = math.exp %289 : vector<4x256xf32>
    %291 = arith.subf %284, %286 : vector<4x256xf32>
    %292 = math.exp %291 : vector<4x256xf32>
    %293 = arith.addf %288, %290 : vector<4x256xf32>
    %294 = arith.addf %293, %292 : vector<4x256xf32>
    %295 = tpu.reciprocal %294 {approx = true} : vector<4x256xf32> -> vector<4x256xf32>
    %296 = arith.mulf %294, %295 : vector<4x256xf32>
    %cst_223 = arith.constant 2.000000e+00 : f32
    %297 = vector.broadcast %cst_223 : f32 to vector<4x256xf32>
    %298 = arith.subf %297, %296 : vector<4x256xf32>
    %299 = arith.mulf %295, %298 : vector<4x256xf32>
    %c0_224 = arith.constant 0 : index
    %c0_225 = arith.constant 0 : index
    %c0_226 = arith.constant 0 : index
    %300 = vector.load %arg2[%c0_224, %c0_225, %c0_226] : memref<1x4x768xf32, #tpu.memory_space<vmem>>, vector<1x4x256xf32>
    %301 = vector.shape_cast %300 : vector<1x4x256xf32> to vector<4x256xf32>
    %302 = arith.mulf %301, %288 : vector<4x256xf32>
    %c0_227 = arith.constant 0 : index
    %c0_228 = arith.constant 0 : index
    %c256 = arith.constant 256 : index
    %303 = vector.load %arg2[%c0_227, %c0_228, %c256] : memref<1x4x768xf32, #tpu.memory_space<vmem>>, vector<1x4x256xf32>
    %304 = vector.shape_cast %303 : vector<1x4x256xf32> to vector<4x256xf32>
    %305 = arith.mulf %304, %290 : vector<4x256xf32>
    %306 = arith.addf %302, %305 : vector<4x256xf32>
    %c0_229 = arith.constant 0 : index
    %c0_230 = arith.constant 0 : index
    %c512 = arith.constant 512 : index
    %307 = vector.load %arg2[%c0_229, %c0_230, %c512] : memref<1x4x768xf32, #tpu.memory_space<vmem>>, vector<1x4x256xf32>
    %308 = vector.shape_cast %307 : vector<1x4x256xf32> to vector<4x256xf32>
    %309 = arith.mulf %308, %292 : vector<4x256xf32>
    %310 = arith.addf %306, %309 : vector<4x256xf32>
    %311 = arith.mulf %310, %299 : vector<4x256xf32>
    %c0_231 = arith.constant 0 : index
    %c0_232 = arith.constant 0 : index
    %c0_233 = arith.constant 0 : index
    %312 = vector.load %arg12[%c0_231, %c0_232, %c0_233] : memref<1x4x256xf32, #tpu.memory_space<vmem>>, vector<1x4x256xf32>
    %313 = vector.shape_cast %312 : vector<1x4x256xf32> to vector<4x256xf32>
    %314 = vector.shape_cast %311 : vector<4x256xf32> to vector<1x4x256xf32>
    tpu.vector_store %arg12[%c0_231, %c0_232, %c0_233], %314 {strides = array<i32>} : memref<1x4x256xf32, #tpu.memory_space<vmem>>, vector<1x4x256xf32>,
    return
  }
  func.func @transform_0(%arg0: i32) -> (i32, i32, i32) {
    %c0_i32 = arith.constant 0 : i32
    %c0_i32_0 = arith.constant 0 : i32
    %c0_i32_1 = arith.constant 0 : i32
    return %arg0, %c0_i32, %c0_i32_0 : i32, i32, i32
  }
  func.func @transform_1(%arg0: i32) -> (i32, i32, i32) {
    %c0_i32 = arith.constant 0 : i32
    %c0_i32_0 = arith.constant 0 : i32
    %c0_i32_1 = arith.constant 0 : i32
    return %arg0, %c0_i32, %c0_i32_0 : i32, i32, i32
  }
  func.func @transform_2(%arg0: i32) -> (i32, i32, i32) {
    %c0_i32 = arith.constant 0 : i32
    %c0_i32_0 = arith.constant 0 : i32
    %c0_i32_1 = arith.constant 0 : i32
    return %arg0, %c0_i32, %c0_i32_0 : i32, i32, i32
  }
  func.func @transform_3(%arg0: i32) -> (i32, i32) {
    %c0_i32 = arith.constant 0 : i32
    %c0_i32_0 = arith.constant 0 : i32
    %c0_i32_1 = arith.constant 0 : i32
    return %c0_i32, %c0_i32_0 : i32, i32
  }
  func.func @transform_4(%arg0: i32) -> (i32, i32, i32) {
    %c0_i32 = arith.constant 0 : i32
    %c0_i32_0 = arith.constant 0 : i32
    %c0_i32_1 = arith.constant 0 : i32
    %c0_i32_2 = arith.constant 0 : i32
    return %c0_i32, %c0_i32_0, %c0_i32_1 : i32, i32, i32
  }
  func.func @transform_5(%arg0: i32) -> (i32, i32) {
    %c0_i32 = arith.constant 0 : i32
    %c0_i32_0 = arith.constant 0 : i32
    %c0_i32_1 = arith.constant 0 : i32
    return %c0_i32, %c0_i32_0 : i32, i32
  }
  func.func @transform_6(%arg0: i32) -> (i32, i32, i32) {
    %c0_i32 = arith.constant 0 : i32
    %c0_i32_0 = arith.constant 0 : i32
    %c0_i32_1 = arith.constant 0 : i32
    %c0_i32_2 = arith.constant 0 : i32
    return %c0_i32, %c0_i32_0, %c0_i32_1 : i32, i32, i32
  }
  func.func @transform_7(%arg0: i32) -> (i32, i32, i32) {
    %c0_i32 = arith.constant 0 : i32
    %c0_i32_0 = arith.constant 0 : i32
    %c0_i32_1 = arith.constant 0 : i32
    %c0_i32_2 = arith.constant 0 : i32
    return %c0_i32, %c0_i32_0, %c0_i32_1 : i32, i32, i32
  }
  func.func @transform_8(%arg0: i32) -> (i32, i32) {
    %c0_i32 = arith.constant 0 : i32
    %c0_i32_0 = arith.constant 0 : i32
    %c0_i32_1 = arith.constant 0 : i32
    return %c0_i32, %c0_i32_0 : i32, i32
  }
  func.func @transform_9(%arg0: i32) -> (i32, i32, i32) {
    %c0_i32 = arith.constant 0 : i32
    %c0_i32_0 = arith.constant 0 : i32
    %c0_i32_1 = arith.constant 0 : i32
    %c0_i32_2 = arith.constant 0 : i32
    return %c0_i32, %c0_i32_0, %c0_i32_1 : i32, i32, i32
  }
  func.func @transform_10(%arg0: i32) -> (i32, i32) {
    %c0_i32 = arith.constant 0 : i32
    %c0_i32_0 = arith.constant 0 : i32
    %c0_i32_1 = arith.constant 0 : i32
    return %c0_i32, %c0_i32_0 : i32, i32
  }
  func.func @transform_11(%arg0: i32) -> (i32, i32, i32) {
    %c0_i32 = arith.constant 0 : i32
    %c0_i32_0 = arith.constant 0 : i32
    %c0_i32_1 = arith.constant 0 : i32
    return %arg0, %c0_i32, %c0_i32_0 : i32, i32, i32
  }
}

</mosaic_0001>

<bundles_post_ra>
// kernel: weighted_sum_forward.1
= control target key start
LH: loop header
LB: loop body
LE: loop exit
PB: predicated region body
PF: predicated region fallthrough
CT: control target
= control target key end

     0   :  { %s10879_s17 = smov 0   ;;  %s12751_s0 = inlined_call_operand.vmem [shape: f32[2,4,256], index: 0, kind: input, shape index: {}]   ;;  %s12752_s1 = inlined_call_operand.vmem [shape: f32[2,4,768], index: 1, kind: input, shape index: {}]   ;;  %s12753_s2 = inlined_call_operand.vmem [shape: f32[2,2,768], index: 2, kind: input, shape index: {}]   ;;  %s12754_s3 = inlined_call_operand.vmem [shape: f32[9,768], index: 3, kind: input, shape index: {}]   ;;  %s12755_s4 = inlined_call_operand.vmem [shape: f32[9,4,2], index: 4, kind: input, shape index: {}]   ;;  %s12756_s5 = inlined_call_operand.vmem [shape: f32[4,1], index: 5, kind: input, shape index: {}]   ;;  %s12757_s6 = inlined_call_operand.vmem [shape: f32[9,8,4], index: 6, kind: input, shape index: {}]   ;;  %s12758_s7 = inlined_call_operand.vmem [shape: f32[9,8,4], index: 7, kind: input, shape index: {}]   ;;  %s12759_s8 = inlined_call_operand.vmem [shape: f32[8,1], index: 8, kind: input, shape index: {}]   ;;  %s12760_s9 = inlined_call_operand.vmem [shape: f32[9,4,8], index: 9, kind: input, shape index: {}]   ;;  %s12761_s10 = inlined_call_operand.vmem [shape: f32[4,1], index: 10, kind: input, shape index: {}]   ;;  %s12762_s11 = inlined_call_operand.vmem [shape: f32[2,4,256], index: 11, kind: output, shape index: {}]  }
   0x1 LB: > { %s10229_s18 = sadd.s32 4294967295, %s10806_s17   ;;  %p10233_p0 = scmp.ge.s32.totalorder %s10806_s17, 1  ;;  %s10806_s17 = sphi %s10879_s17, %s21_s17  }
   0x2   : > { %p357_p1 = scmp.lt.s32.totalorder %s10806_s17, 3 }
   0x4   : > { %p358_p2 = pnand %p10233_p0, %p357_p1 }
   0x6   : > { %361 = sbr.rel (%p358_p2) target bundleno = 1501 (0x5dd), region = 64 }
   0xd   : > { %p407_p3 = scmp.lt.s32.totalorder %s10229_s18, 1  ;;  %v438_v0 = vlaneseq  ;;  %v10808_v1 = vmov 1983009808   ;;  %s10809_s23 = smov 16   ;;  %v12771_v13 = vmov 0.0   ;;  %v10818_v16 = vmov 0  }
   0xe   : > { %v436_v2 = vunpack.c.l.s4 %v10808_v1  ;;  %673 = vmatprep.mubr.f32.mxu0 %v12771_v13  ;;  %3279 = vmatprep.mubr.f32.mxu1 %v12771_v13  ;;  %s10811_s24 = smov 17   ;;  %s10812_s25 = smov 15   ;;  %v3104_v15 = vld [vmem:[%s12756_s5] sm:$0xf]  ;;  %vm590_vm1 = vcmask 1041408   ;;  %vm586_vm2 = vcmask 15360  }
   0xf   : > { %s12824_s18 = smov (!%p407_p3, %s10229_s18), 1  ;;  %v10890_v3 = vshrl.u32 %v438_v0, 7  ;;  %s10813_s26 = smov 1   ;;  %10780 = vset.pattern.permute.xlu0 %v10818_v16  ;;  %10781 = vset.pattern.permute.xlu1 %v10818_v16  ;;  %v10241_v17 = vld [vmem:[%s12754_s3 + $0x1] ss:$8 sm:$0xf] }
  0x10   : > { %v437_v4 = vunpack.c.0.s8 %v436_v2  ;;  %s10760_s19 = smul.u32 12, %s12824_s18  ;;  %s10814_s27 = smov 127   ;;  %v10242_v18 = vld [vmem:[%s12754_s3 + $0x1] ss:$8 sm:$0x30]  ;;  %v11023_v19 = vand.u32 127, %v438_v0 }
  0x11   : > { %s10815_s28 = smov 113   ;;  %s10816_s29 = smov 112   ;;  %v11026_v20 = vsub.s32 1, %v10890_v3  ;;  %v527_v21 = vor.u32 %v10242_v18, %v10241_v17  ;;  %v11029_v22 = vsub.s32 0, %v10890_v3  ;;  %v11033_v25 = vsub.s32 2, %v10890_v3 }
  0x12   : > { %v440_v5 = vsub.s32 %v437_v4, %v10890_v3  ;;  %s421_s22 = scalar_lea.vmem %s12753_s2, %s10760_s19  ;;  %s10817_s30 = smov 111   ;;  %vm540_vm0 = vcmp.lt.s32.totalorder %v11023_v19, 16  ;;  %v11039_v27 = vsub.s32 3, %v10890_v3  ;;  %v429_v29 = vld [vmem:[%s12754_s3] ss:$8 sm:$0xf] }
  0x13   : > { %v10897_v6 = vld.sshfl [vmem:[%s421_s22 + $0x8] sm:$0x33 pattern:$0x76325410]  ;;  %v427_v7 = vld [vmem:[%s421_s22] sm:$0xff]  ;;  %v11036_v26 = vrot.slane %v527_v21, %v11026_v20  ;;  %v11042_v28 = vrot.slane %v527_v21, %v11029_v22  ;;  %v11053_v34 = vsub.s32 5, %v10890_v3  ;;  %v11065_v40 = vrot.slane %v527_v21, %v11033_v25 }
  0x14   : > { %v10901_v8 = vcombine.high %v10897_v6, %v10897_v6  ;;  %v10903_v9 = vrot.slane %v427_v7, %v440_v5  ;;  %v434_v10 = vcombine.high %v427_v7, %v427_v7  ;;  %v430_v30 = vld [vmem:[%s12754_s3] ss:$8 sm:$0x30]  ;;  %v11058_v36 = vsub.s32 4, %v10890_v3  ;;  %v10243_v42 = vld [vmem:[%s12755_s4 + $0x4] sm:$0xf] }
  0x15   : > { %v11062_v38 = vrot.slane %v527_v21, %v11039_v27  ;;  %v431_v39 = vor.u32 %v430_v30, %v429_v29  ;;  %v11075_v44 = vrot.slane %v527_v21, %v11053_v34  ;;  %vm479_vm3 = vcmp.lt.s32.totalorder %v11023_v19, 17  ;;  %v10262_v61 = vld [vmem:[%s12754_s3 + $0x2] ss:$8 sm:$0xf]  ;;  %s10559_s21 = sshll.u32 %s12824_s18, 3  ;;  %s10759_s14 = smul.u32 24, %s12824_s18 }
  0x16   : > { %538 = vrot.lane.b32.xlu1 %v10901_v8, %s10809_s23  ;;  %528 = vrot.lane.b32.xlu0 %v10903_v9, %s10809_s23  ;;  %v10911_v11 = vcombine.high %v10903_v9, %v10903_v9  ;;  %v10913_v12 = vrot.slane %v434_v10, %v440_v5  ;;  %v11080_v48 = vrot.slane %v527_v21, %v11058_v36  ;;  %v10263_v62 = vld [vmem:[%s12754_s3 + $0x2] ss:$8 sm:$0x30]  ;;  %vm1072_vm4 = vcmp.lt.s32.totalorder %v11023_v19, 15  ;;  %s411_s13 = scalar_lea.vmem %s12751_s0, %s10559_s21 }
  0x17   : > { %v11091_v52 = vrot.slane %v431_v39, %v11026_v20  ;;  %v11105_v60 = vrot.slane %v431_v39, %v11029_v22  ;;  %v11121_v3 = vrot.slane %v431_v39, %v11039_v27  ;;  %v1059_v4 = vor.u32 %v10263_v62, %v10262_v61  ;;  %v523_v7 = vld [vmem:[%s12755_s4] sm:$0xf]  ;;  %s11536_s19 = scalar_lea.vmem %s12752_s1, %s10759_s14 }
  0x18   : > { %v10923_v14 = vcombine.high %v10913_v12, %v10913_v12  ;;  %v11124_v5 = vrot.slane %v431_v39, %v11033_v25  ;;  %v11139_v21 = vrot.slane %v431_v39, %v11058_v36  ;;  %vm1374_vm5 = vcmp.lt.s32.totalorder %v11023_v19, 1 }
  0x19   : > { %v11149_v30 = vrot.slane %v1059_v4, %v11026_v20  ;;  %v11197_v62 = vrot.slane %v1059_v4, %v11058_v36  ;;  %vm1912_vm6 = vcmp.lt.s32.totalorder %v11023_v19, 127  ;;  %vm2214_vm7 = vcmp.lt.s32.totalorder %v11023_v19, 113 }
  0x1a   : > { %530 = vrot.lane.b32.xlu0 %v10911_v11, %s10809_s23  ;;  %532 = vrot.lane.b32.xlu1 %v10913_v12, %s10809_s23  ;;  %vm2516_vm8 = vcmp.lt.s32.totalorder %v11023_v19, 112  ;;  %vm2818_vm9 = vcmp.lt.s32.totalorder %v11023_v19, 111  ;;  %vm3196_vm10 = vcmask 1043456   ;;  %vm3192_vm11 = vcmask 31744  }
  0x1b   : > { %12793 = vst [vmem:[#allocation2_spill] sm:$0xff] %v11197_v62  ;;  %vm7933_vm12 = vcmask 64512  }
  0x1e   : > { %536 = vrot.lane.b32.xlu1 %v10897_v6, %s10809_s23  ;;  %534 = vrot.lane.b32.xlu0 %v10923_v14, %s10809_s23 }
  0x22   : > { %467 = vrot.lane.b32.xlu1 %v10911_v11, %s10811_s24  ;;  %465 = vrot.lane.b32.xlu0 %v10903_v9, %s10811_s24 }
  0x26   : > { %469 = vrot.lane.b32.xlu1 %v10913_v12, %s10811_s24  ;;  %475 = vrot.lane.b32.xlu0 %v10901_v8, %s10811_s24 }
  0x2a   : > { %473 = vrot.lane.b32.xlu1 %v10897_v6, %s10811_s24  ;;  %471 = vrot.lane.b32.xlu0 %v10923_v14, %s10811_s24 }
  0x2e   : > { %1062 = vrot.lane.b32.xlu1 %v10911_v11, %s10812_s25  ;;  %1060 = vrot.lane.b32.xlu0 %v10903_v9, %s10812_s25 }
  0x32   : > { %1064 = vrot.lane.b32.xlu1 %v10913_v12, %s10812_s25  ;;  %1070 = vrot.lane.b32.xlu0 %v10901_v8, %s10812_s25 }
  0x36   : > { %1068 = vrot.lane.b32.xlu1 %v10897_v6, %s10812_s25  ;;  %1066 = vrot.lane.b32.xlu0 %v10923_v14, %s10812_s25 }
  0x3a   : > { %1364 = vrot.lane.b32.xlu1 %v10911_v11, %s10813_s26  ;;  %1362 = vrot.lane.b32.xlu0 %v10903_v9, %s10813_s26 }
  0x3e   : > { %1366 = vrot.lane.b32.xlu1 %v10913_v12, %s10813_s26  ;;  %1372 = vrot.lane.b32.xlu0 %v10901_v8, %s10813_s26 }
  0x42   : > { %1370 = vrot.lane.b32.xlu1 %v10897_v6, %s10813_s26  ;;  %1368 = vrot.lane.b32.xlu0 %v10923_v14, %s10813_s26 }
  0x46   : > { %1904 = vrot.lane.b32.xlu1 %v10913_v12, %s10814_s27  ;;  %1902 = vrot.lane.b32.xlu0 %v10911_v11, %s10814_s27 }
  0x4a   : > { %1906 = vrot.lane.b32.xlu1 %v10923_v14, %s10814_s27  ;;  %1900 = vrot.lane.b32.xlu0 %v10903_v9, %s10814_s27 }
  0x4e   : > { %1910 = vrot.lane.b32.xlu1 %v10901_v8, %s10814_s27  ;;  %1908 = vrot.lane.b32.xlu0 %v10897_v6, %s10814_s27 }
  0x52   : > { %2206 = vrot.lane.b32.xlu1 %v10913_v12, %s10815_s28  ;;  %2204 = vrot.lane.b32.xlu0 %v10911_v11, %s10815_s28 }
  0x56   : > { %2208 = vrot.lane.b32.xlu1 %v10923_v14, %s10815_s28  ;;  %2202 = vrot.lane.b32.xlu0 %v10903_v9, %s10815_s28 }
  0x5a   : > { %2212 = vrot.lane.b32.xlu1 %v10901_v8, %s10815_s28  ;;  %2210 = vrot.lane.b32.xlu0 %v10897_v6, %s10815_s28 }
  0x5e   : > { %2508 = vrot.lane.b32.xlu1 %v10913_v12, %s10816_s29  ;;  %2506 = vrot.lane.b32.xlu0 %v10911_v11, %s10816_s29 }
  0x62   : > { %2510 = vrot.lane.b32.xlu1 %v10923_v14, %s10816_s29  ;;  %2504 = vrot.lane.b32.xlu0 %v10903_v9, %s10816_s29 }
  0x66   : > { %2514 = vrot.lane.b32.xlu1 %v10901_v8, %s10816_s29  ;;  %2512 = vrot.lane.b32.xlu0 %v10897_v6, %s10816_s29 }
  0x6a   : > { %2810 = vrot.lane.b32.xlu1 %v10913_v12, %s10817_s30  ;;  %2808 = vrot.lane.b32.xlu0 %v10911_v11, %s10817_s30 }
  0x6e   : > { %2812 = vrot.lane.b32.xlu1 %v10923_v14, %s10817_s30  ;;  %2806 = vrot.lane.b32.xlu0 %v10903_v9, %s10817_s30 }
  0x72   : > { %2816 = vrot.lane.b32.xlu1 %v10901_v8, %s10817_s30  ;;  %2814 = vrot.lane.b32.xlu0 %v10897_v6, %s10817_s30 }
  0x76   : > { %3107 = vperm.xlu0 %10780, %v3104_v15   ;;  %v11133_v15 = vrot.slane %v431_v39, %v11053_v34 }
  0x88   : > { %v539_v23 = vpop.permute.xlu1 %538  ;;  %v529_v24 = vpop.permute.xlu0 %528 }
  0x89   : > { %v546_v31 = vsel %vm540_vm0, %v539_v23, %v529_v24 }
  0x8a   : > { %v578_v41 = vmul.f32 %v11042_v28, %v546_v31 }
  0x8c   : > { %v531_v32 = vpop.permute.xlu0 %530  ;;  %v533_v33 = vpop.permute.xlu1 %532 }
  0x8d   : > { %v545_v35 = vsel %vm540_vm0, %v529_v24, %v531_v32  ;;  %v544_v43 = vsel %vm540_vm0, %v531_v32, %v533_v33 }
  0x8e   : > { %v579_v37 = vmul.f32 %v11036_v26, %v545_v35  ;;  %v580_v53 = vmul.f32 %v11065_v40, %v544_v43  ;;  %v10274_v43 = vld [vmem:[%s12754_s3 + $0x3] ss:$8 sm:$0xf] }
  0x90   : > { %10244 = vmatprep.subr.msk.mxu0 %vm590_vm1, %v579_v37  ;;  %v537_v45 = vpop.permute.xlu1 %536  ;;  %v535_v46 = vpop.permute.xlu0 %534 }
  0x91   : > { %v541_v47 = vsel %vm540_vm0, %v537_v45, %v539_v23  ;;  %v543_v49 = vsel %vm540_vm0, %v533_v33, %v535_v46  ;;  %10245 = vmatpush1.msk.msra.mxu0 %vm590_vm1, %v578_v41  ;;  %v542_v50 = vsel %vm540_vm0, %v535_v46, %v537_v45  ;;  %v10275_v45 = vld [vmem:[%s12754_s3 + $0x3] ss:$8 sm:$0x30] }
  0x92   : > { %v581_v51 = vmul.f32 %v11062_v38, %v543_v49  ;;  %10246 = vmatmul.mubr.msk.f32.vlgmr.msra.gmra.mrb[0].mxu0 %vm586_vm2, %v10243_v42  ;;  %v583_v54 = vmul.f32 %v11075_v44, %v541_v47  ;;  %v582_v57 = vmul.f32 %v11080_v48, %v542_v50 }
  0x93   : > { %744 = vmatprep.mubr.f32.mxu0 %v12771_v13 }
  0x94   : > { %v468_v55 = vpop.permute.xlu1 %467  ;;  %10247 = vmatprep.subr.msk.mxu0 %vm590_vm1, %v581_v51  ;;  %v466_v56 = vpop.permute.xlu0 %465  ;;  %v11179_v51 = vrot.slane %v1059_v4, %v11039_v27 }
  0x95   : > { %v484_v58 = vsel %vm479_vm3, %v466_v56, %v468_v55  ;;  %10248 = vmatpush1.msk.msra.mxu0 %vm590_vm1, %v580_v53  ;;  %v1361_v53 = vor.u32 %v10275_v45, %v10274_v43 }
  0x96   : > { %v518_v59 = vmul.f32 %v11091_v52, %v484_v58  ;;  %10249 = vmatmul.mubr.msk.f32.vlgmr.msra.gmra.mrb[2].mxu0 %vm586_vm2, %v10243_v42  ;;  %10250 = vmatprep.subr.msk.mxu0 %vm590_vm1, %v583_v54  ;;  %v11182_v54 = vrot.slane %v1059_v4, %v11033_v25 }
  0x97   : > { %10251 = vmatpush1.msk.msra.mxu0 %vm590_vm1, %v582_v57  ;;  %815 = vmatprep.mubr.f32.mxu0 %v12771_v13  ;;  %v11191_v57 = vrot.slane %v1059_v4, %v11053_v34  ;;  %v11243_v43 = vrot.slane %v1361_v53, %v11053_v34 }
  0x98   : > { %v470_v63 = vpop.permute.xlu1 %469  ;;  %10253 = vmatprep.subr.msk.mxu0 %vm590_vm1, %v518_v59  ;;  %v476_v0 = vpop.permute.xlu0 %475 }
  0x99   : > { %v485_v1 = vsel %vm479_vm3, %v476_v0, %v466_v56  ;;  %v483_v10 = vsel %vm479_vm3, %v468_v55, %v470_v63  ;;  %v10264_v55 = vld [vmem:[%s12755_s4 + $0x8] sm:$0xf] }
  0x9a   : > { %v517_v2 = vmul.f32 %v11105_v60, %v485_v1  ;;  %10252 = vmatmul.mubr.msk.f32.vlgmr.msra.gmra.mrb[4].mxu0 %vm586_vm2, %v10243_v42  ;;  %v519_v31 = vmul.f32 %v11124_v5, %v483_v10  ;;  %v11163_v42 = vrot.slane %v1059_v4, %v11029_v22 }
  0x9b   : > { %907 = vmatprep.mubr.f32.mxu0 %v12771_v13 }
  0x9c   : > { %v474_v16 = vpop.permute.xlu1 %473  ;;  %10254 = vmatpush1.msk.msra.mxu0 %vm590_vm1, %v517_v2  ;;  %v472_v17 = vpop.permute.xlu0 %471  ;;  %v11207_v2 = vrot.slane %v1361_v53, %v11026_v20 }
  0x9d   : > { %v480_v18 = vsel %vm479_vm3, %v474_v16, %v476_v0  ;;  %v482_v23 = vsel %vm479_vm3, %v470_v63, %v472_v17  ;;  %v481_v24 = vsel %vm479_vm3, %v472_v17, %v474_v16 }
  0x9e   : > { %v520_v29 = vmul.f32 %v11121_v3, %v482_v23  ;;  %10255 = vmatmul.mubr.msk.f32.vlgmr.msra.gmra.mrb[0].mxu0 %vm586_vm2, %v523_v7  ;;  %v522_v32 = vmul.f32 %v11133_v15, %v480_v18  ;;  %v521_v37 = vmul.f32 %v11139_v21, %v481_v24  ;;  %v11221_v24 = vrot.slane %v1361_v53, %v11029_v22 }
  0x9f   : > { %978 = vmatprep.mubr.f32.mxu0 %v12771_v13 }
  0xa0   : > { %v1063_v33 = vpop.permute.xlu1 %1062  ;;  %10256 = vmatprep.subr.msk.mxu0 %vm590_vm1, %v520_v29  ;;  %v1061_v35 = vpop.permute.xlu0 %1060 }
  0xa1   : > { %v1077_v39 = vsel %vm1072_vm4, %v1061_v35, %v1063_v33  ;;  %10257 = vmatpush1.msk.msra.mxu0 %vm590_vm1, %v519_v31 }
  0xa2   : > { %v1111_v41 = vmul.f32 %v11149_v30, %v1077_v39  ;;  %10258 = vmatmul.mubr.msk.f32.vlgmr.msra.gmra.mrb[2].mxu0 %vm586_vm2, %v523_v7  ;;  %10259 = vmatprep.subr.msk.mxu0 %vm590_vm1, %v522_v32  ;;  %v10276_v39 = vld [vmem:[%s12755_s4 + $0xc] sm:$0xf] }
  0xa3   : > { %10260 = vmatpush1.msk.msra.mxu0 %vm590_vm1, %v521_v37  ;;  %1049 = vmatprep.mubr.f32.mxu0 %v12771_v13  ;;  %v11234_v37 = vrot.slane %v1361_v53, %v11033_v25 }
  0xa4   : > { %v1065_v46 = vpop.permute.xlu1 %1064  ;;  %10265 = vmatprep.subr.msk.mxu0 %vm590_vm1, %v1111_v41  ;;  %v1071_v47 = vpop.permute.xlu0 %1070 }
  0xa5   : > { %v1078_v49 = vsel %vm1072_vm4, %v1071_v47, %v1061_v35  ;;  %v1076_v56 = vsel %vm1072_vm4, %v1063_v33, %v1065_v46  ;;  %v11231_v35 = vrot.slane %v1361_v53, %v11039_v27 }
  0xa6   : > { %v1110_v50 = vmul.f32 %v11163_v42, %v1078_v49  ;;  %10261 = vmatmul.mubr.msk.f32.vlgmr.msra.gmra.mrb[4].mxu0 %vm586_vm2, %v523_v7  ;;  %v1112_v7 = vmul.f32 %v11182_v54, %v1076_v56  ;;  %v11249_v49 = vrot.slane %v1361_v53, %v11058_v36 }
  0xa7   : > { %1203 = vmatprep.mubr.f32.mxu0 %v12771_v13 }
  0xa8   : > { %v1069_v58 = vpop.permute.xlu1 %1068  ;;  %10266 = vmatpush1.msk.msra.mxu0 %vm590_vm1, %v1110_v50  ;;  %v1067_v59 = vpop.permute.xlu0 %1066 }
  0xa9   : > { %v1073_v61 = vsel %vm1072_vm4, %v1069_v58, %v1071_v47  ;;  %v1075_v63 = vsel %vm1072_vm4, %v1065_v46, %v1067_v59  ;;  %v1074_v0 = vsel %vm1072_vm4, %v1067_v59, %v1069_v58 }
  0xaa   : > { %v1113_v1 = vmul.f32 %v11179_v51, %v1075_v63  ;;  %10267 = vmatmul.mubr.msk.f32.vlgmr.msra.gmra.mrb[0].mxu0 %vm586_vm2, %v10264_v55  ;;  %v1115_v4 = vmul.f32 %v11191_v57, %v1073_v61  ;;  %v1114_v17 = vmul.f32 %v11197_v62, %v1074_v0  ;;  %v10296_v0 = vld [vmem:[%s12754_s3 + $0x5] ss:$8 sm:$0xf] }
  0xab   : > { %1274 = vmatprep.mubr.f32.mxu0 %v12771_v13 }
  0xac   : > { %v1365_v10 = vpop.permute.xlu1 %1364  ;;  %10268 = vmatprep.subr.msk.mxu0 %vm590_vm1, %v1113_v1  ;;  %v1363_v16 = vpop.permute.xlu0 %1362  ;;  %v10297_v1 = vld [vmem:[%s12754_s3 + $0x5] ss:$8 sm:$0x30] }
  0xad   : > { %v1379_v18 = vsel %vm1374_vm5, %v1363_v16, %v1365_v10  ;;  %10269 = vmatpush1.msk.msra.mxu0 %vm590_vm1, %v1112_v7  ;;  %v1899_v7 = vor.u32 %v10297_v1, %v10296_v0 }
  0xae   : > { %v1413_v23 = vmul.f32 %v11207_v2, %v1379_v18  ;;  %10270 = vmatmul.mubr.msk.f32.vlgmr.msra.gmra.mrb[2].mxu0 %vm586_vm2, %v10264_v55  ;;  %10271 = vmatprep.subr.msk.mxu0 %vm590_vm1, %v1115_v4 }
  0xaf   : > { %10272 = vmatpush1.msk.msra.mxu0 %vm590_vm1, %v1114_v17  ;;  %1345 = vmatprep.mubr.f32.mxu0 %v12771_v13  ;;  %v11284_v17 = vrot.slane %v1899_v7, %v11026_v20  ;;  %v11343_v1 = vrot.slane %v1899_v7, %v11058_v36 }
  0xb0   : > { %v1367_v29 = vpop.permute.xlu1 %1366  ;;  %10277 = vmatprep.subr.msk.mxu0 %vm590_vm1, %v1413_v23  ;;  %v1373_v31 = vpop.permute.xlu0 %1372 }
  0xb1   : > { %v1380_v32 = vsel %vm1374_vm5, %v1373_v31, %v1363_v16  ;;  %v1378_v41 = vsel %vm1374_vm5, %v1365_v10, %v1367_v29  ;;  %v10286_v16 = vld [vmem:[%s12755_s4 + $0x10] sm:$0xf] }
  0xb2   : > { %v1412_v33 = vmul.f32 %v11221_v24, %v1380_v32  ;;  %10273 = vmatmul.mubr.msk.f32.vlgmr.msra.gmra.mrb[4].mxu0 %vm586_vm2, %v10264_v55  ;;  %v1414_v58 = vmul.f32 %v11234_v37, %v1378_v41  ;;  %v11301_v32 = vrot.slane %v1899_v7, %v11029_v22 }
  0xb3   : > { %1505 = vmatprep.mubr.f32.mxu0 %v12771_v13 }
  0xb4   : > { %v1371_v45 = vpop.permute.xlu1 %1370  ;;  %10278 = vmatpush1.msk.msra.mxu0 %vm590_vm1, %v1412_v33  ;;  %v1369_v46 = vpop.permute.xlu0 %1368 }
  0xb5   : > { %v1375_v47 = vsel %vm1374_vm5, %v1371_v45, %v1373_v31  ;;  %v1377_v50 = vsel %vm1374_vm5, %v1367_v29, %v1369_v46  ;;  %v1376_v55 = vsel %vm1374_vm5, %v1369_v46, %v1371_v45  ;;  %v11298_v29 = vrot.slane %v1899_v7, %v11039_v27 }
  0xb6   : > { %v1415_v56 = vmul.f32 %v11231_v35, %v1377_v50  ;;  %10279 = vmatmul.mubr.msk.f32.vlgmr.msra.gmra.mrb[0].mxu0 %vm586_vm2, %v10276_v39  ;;  %v1417_v59 = vmul.f32 %v11243_v43, %v1375_v47  ;;  %v1416_v63 = vmul.f32 %v11249_v49, %v1376_v55  ;;  %v11320_v50 = vrot.slane %v1899_v7, %v11033_v25 }
  0xb7   : > { %1576 = vmatprep.mubr.f32.mxu0 %v12771_v13 }
  0xb8   : > { %10280 = vmatprep.subr.msk.mxu0 %vm590_vm1, %v1415_v56  ;;  %v1905_v53 = vpop.permute.xlu1 %1904  ;;  %v1903_v61 = vpop.permute.xlu0 %1902 }
  0xb9   : > { %10281 = vmatpush1.msk.msra.mxu0 %vm590_vm1, %v1414_v58  ;;  %v1916_v23 = vsel %vm1912_vm6, %v1903_v61, %v1905_v53 }
  0xba   : > { %10282 = vmatmul.mubr.msk.f32.vlgmr.msra.gmra.mrb[2].mxu0 %vm586_vm2, %v10276_v39  ;;  %10283 = vmatprep.subr.msk.mxu0 %vm590_vm1, %v1417_v59  ;;  %v10298_v59 = vld [vmem:[%s12755_s4 + $0x14] sm:$0xf] }
  0xbb   : > { %10284 = vmatpush1.msk.msra.mxu0 %vm590_vm1, %v1416_v63  ;;  %1647 = vmatprep.mubr.f32.mxu0 %v12771_v13 }
  0xbc   : > { %10287 = vmatprep.subr.msk.mxu0 %vm590_vm1, %v10911_v11  ;;  %v1907_v4 = vpop.permute.xlu1 %1906  ;;  %v1901_v10 = vpop.permute.xlu0 %1900 }
  0xbd   : > { %v1915_v56 = vsel %vm1912_vm6, %v1905_v53, %v1907_v4 }
  0xbe   : > { %10285 = vmatmul.mubr.msk.f32.vlgmr.msra.gmra.mrb[4].mxu0 %vm586_vm2, %v10276_v39  ;;  %v10309_v39 = vld [vmem:[%s12754_s3 + $0x6] ss:$8 sm:$0x30]  ;;  %v1952_v0 = vmul.f32 %v11320_v50, %v1915_v56 }
  0xbf   : > { %10288 = vmatpush1.msk.msra.mxu0 %vm590_vm1, %v10903_v9  ;;  %1741 = vmatprep.mubr.f32.mxu0 %v12771_v13  ;;  %v1951_v9 = vmul.f32 %v11284_v17, %v1916_v23 }
  0xc0   : > { %10290 = vmatprep.subr.msk.mxu0 %vm590_vm1, %v10923_v14  ;;  %v1911_v11 = vpop.permute.xlu1 %1910  ;;  %v1909_v18 = vpop.permute.xlu0 %1908 }
  0xc1   : > { %v1914_v33 = vsel %vm1912_vm6, %v1907_v4, %v1909_v18  ;;  %v1918_v58 = vsel %vm1912_vm6, %v1911_v11, %v1901_v10 }
  0xc2   : > { %10289 = vmatmul.mubr.msk.f32.vlgmr.msra.gmra.mrb[0].mxu0 %vm586_vm2, %v10286_v16  ;;  %v1953_v41 = vmul.f32 %v11298_v29, %v1914_v33 }
  0xc3   : > { %10291 = vmatpush1.msk.msra.mxu0 %vm590_vm1, %v10913_v12  ;;  %1812 = vmatprep.mubr.f32.mxu0 %v12771_v13  ;;  %v10308_v12 = vld [vmem:[%s12754_s3 + $0x6] ss:$8 sm:$0xf] }
  0xc4   : > { %10293 = vmatprep.subr.msk.mxu0 %vm590_vm1, %v10901_v8  ;;  %v2207_v14 = vpop.permute.xlu1 %2206  ;;  %v2205_v31 = vpop.permute.xlu0 %2204  ;;  %v1917_v8 = vsel %vm1912_vm6, %v1901_v10, %v1903_v61  ;;  %v2201_v45 = vor.u32 %v10309_v39, %v10308_v12 }
  0xc5   : > { %v1950_v55 = vmul.f32 %v11301_v32, %v1917_v8  ;;  %v2218_v4 = vsel %vm2214_vm7, %v2205_v31, %v2207_v14  ;;  %v10321_v8 = vld [vmem:[%s12754_s3 + $0x7] ss:$8 sm:$0x30] }
  0xc6   : > { %10292 = vmatmul.mubr.msk.f32.vlgmr.msra.gmra.mrb[2].mxu0 %vm586_vm2, %v10286_v16  ;;  %v11338_v61 = vrot.slane %v2201_v45, %v11026_v20  ;;  %v11360_v39 = vrot.slane %v2201_v45, %v11029_v22 }
  0xc7   : > { %10294 = vmatpush1.msk.msra.mxu0 %vm590_vm1, %v10897_v6  ;;  %1883 = vmatprep.mubr.f32.mxu0 %v12771_v13  ;;  %v11327_v6 = vrot.slane %v1899_v7, %v11053_v34  ;;  %v11356_v7 = vrot.slane %v2201_v45, %v11039_v27 }
  0xc8   : > { %10299 = vmatprep.subr.msk.mxu0 %vm590_vm1, %v1951_v9  ;;  %v2209_v46 = vpop.permute.xlu1 %2208  ;;  %v2203_v47 = vpop.permute.xlu0 %2202  ;;  %v2253_v23 = vmul.f32 %v11338_v61, %v2218_v4  ;;  %v11378_v4 = vrot.slane %v2201_v45, %v11033_v25 }
  0xc9   : > { %v1955_v10 = vmul.f32 %v11327_v6, %v1918_v58 }
  0xca   : > { %10295 = vmatmul.mubr.msk.f32.vlgmr.msra.gmra.mrb[4].mxu0 %vm586_vm2, %v10286_v16  ;;  %v1913_v16 = vsel %vm1912_vm6, %v1909_v18, %v1911_v11  ;;  %v10320_v18 = vld [vmem:[%s12754_s3 + $0x7] ss:$8 sm:$0xf]  ;;  %12794 = vst [vmem:[#allocation3_spill] sm:$0xff] %v11378_v4 }
  0xcb   : > { %10300 = vmatpush1.msk.msra.mxu0 %vm590_vm1, %v1950_v55  ;;  %2043 = vmatprep.mubr.f32.mxu0 %v12771_v13  ;;  %v1954_v12 = vmul.f32 %v11343_v1, %v1913_v16  ;;  %v2503_v56 = vor.u32 %v10321_v8, %v10320_v18  ;;  %v11385_v16 = vrot.slane %v2201_v45, %v11053_v34 }
  0xcc   : > { %10302 = vmatprep.subr.msk.mxu0 %vm590_vm1, %v1953_v41  ;;  %v2213_v53 = vpop.permute.xlu1 %2212  ;;  %v2211_v63 = vpop.permute.xlu0 %2210  ;;  %v2219_v41 = vsel %vm2214_vm7, %v2203_v47, %v2205_v31  ;;  %v2217_v31 = vsel %vm2214_vm7, %v2207_v14, %v2209_v46 }
  0xcd   : > { %v2216_v11 = vsel %vm2214_vm7, %v2209_v46, %v2211_v63  ;;  %12795 = vst [vmem:[#allocation4_spill] sm:$0xff] %v11385_v16  ;;  %v2254_v46 = vmul.f32 %v11378_v4, %v2217_v31  ;;  %v2215_v8 = vsel %vm2214_vm7, %v2211_v63, %v2213_v53  ;;  %v10332_v63 = vld [vmem:[%s12754_s3 + $0x30] ss:$8 sm:$0xf] }
  0xce   : > { %10301 = vmatmul.mubr.msk.f32.vlgmr.msra.gmra.mrb[0].mxu0 %vm586_vm2, %v10298_v59  ;;  %v2255_v55 = vmul.f32 %v11356_v7, %v2216_v11  ;;  %v11396_v11 = vrot.slane %v2503_v56, %v11026_v20 }
  0xcf   : > { %10303 = vmatpush1.msk.msra.mxu0 %vm590_vm1, %v1952_v0  ;;  %2114 = vmatprep.mubr.f32.mxu0 %v12771_v13 }
  0xd0   : > { %10305 = vmatprep.subr.msk.mxu0 %vm590_vm1, %v1955_v10  ;;  %v2509_v9 = vpop.permute.xlu1 %2508  ;;  %v2507_v33 = vpop.permute.xlu0 %2506  ;;  %v2252_v10 = vmul.f32 %v11360_v39, %v2219_v41  ;;  %12796 = vst [vmem:[#allocation5_spill] sm:$0xff] %v11396_v11 }
  0xd2   : > { %10304 = vmatmul.mubr.msk.f32.vlgmr.msra.gmra.mrb[2].mxu0 %vm586_vm2, %v10298_v59 }
  0xd3   : > { %10306 = vmatpush1.msk.msra.mxu0 %vm590_vm1, %v1954_v12  ;;  %2185 = vmatprep.mubr.f32.mxu0 %v12771_v13  ;;  %v10310_v12 = vld [vmem:[%s12755_s4 + $0x18] sm:$0xf] }
  0xd4   : > { %10311 = vmatprep.subr.msk.mxu0 %vm590_vm1, %v2253_v23  ;;  %v2511_v58 = vpop.permute.xlu1 %2510  ;;  %v2505_v0 = vpop.permute.xlu0 %2504  ;;  %v2220_v23 = vsel %vm2214_vm7, %v2213_v53, %v2203_v47  ;;  %v2520_v47 = vsel %vm2516_vm8, %v2507_v33, %v2509_v9 }
  0xd5   : > { %v2257_v18 = vmul.f32 %v11385_v16, %v2220_v23  ;;  %v11418_v23 = vrot.slane %v2503_v56, %v11029_v22  ;;  %v11436_v16 = vrot.slane %v2503_v56, %v11033_v25 }
  0xd6   : > { %10307 = vmatmul.mubr.msk.f32.vlgmr.msra.gmra.mrb[4].mxu0 %vm586_vm2, %v10298_v59  ;;  %v11401_v59 = vrot.slane %v2201_v45, %v11058_v36  ;;  %v11414_v45 = vrot.slane %v2503_v56, %v11039_v27 }
  0xd7   : > { %10312 = vmatpush1.msk.msra.mxu0 %vm590_vm1, %v2252_v10  ;;  %2345 = vmatprep.mubr.f32.mxu0 %v12771_v13 }
  0xd8   : > { %10314 = vmatprep.subr.msk.mxu0 %vm590_vm1, %v2255_v55  ;;  %v2513_v14 = vpop.permute.xlu0 %2512  ;;  %12797 = vst [vmem:[#allocation6_spill] sm:$0xff] %v11401_v59  ;;  %v2515_v41 = vpop.permute.xlu1 %2514  ;;  %v2555_v55 = vmul.f32 %v11396_v11, %v2520_v47  ;;  %v2256_v31 = vmul.f32 %v11401_v59, %v2215_v8  ;;  %v2521_v47 = vsel %vm2516_vm8, %v2505_v0, %v2507_v33 }
  0xd9   : > { %v2518_v53 = vsel %vm2516_vm8, %v2511_v58, %v2513_v14  ;;  %v2554_v4 = vmul.f32 %v11418_v23, %v2521_v47  ;;  %v2519_v33 = vsel %vm2516_vm8, %v2509_v9, %v2511_v58  ;;  %v11459_v58 = vrot.slane %v2503_v56, %v11058_v36 }
  0xda   : > { %10313 = vmatmul.mubr.msk.f32.vlgmr.msra.gmra.mrb[0].mxu0 %vm586_vm2, %v10310_v12  ;;  %v2556_v9 = vmul.f32 %v11436_v16, %v2519_v33 }
  0xdb   : > { %10315 = vmatpush1.msk.msra.mxu0 %vm590_vm1, %v2254_v46  ;;  %2416 = vmatprep.mubr.f32.mxu0 %v12771_v13  ;;  %v10333_v46 = vld [vmem:[%s12754_s3 + $0x30] ss:$8 sm:$0x30]  ;;  %12799 = vst [vmem:[#allocation8_spill] sm:$0xff] %v11459_v58 }
  0xdc   : > { %10317 = vmatprep.subr.msk.mxu0 %vm590_vm1, %v2257_v18  ;;  %v2809_v10 = vpop.permute.xlu0 %2808  ;;  %v2557_v18 = vmul.f32 %v11414_v45, %v2518_v53  ;;  %v2811_v8 = vpop.permute.xlu1 %2810  ;;  %v2805_v11 = vor.u32 %v10333_v46, %v10332_v63  ;;  %v10322_v53 = vld [vmem:[%s12755_s4 + $0x1c] sm:$0xf] }
  0xde   : > { %10316 = vmatmul.mubr.msk.f32.vlgmr.msra.gmra.mrb[2].mxu0 %vm586_vm2, %v10310_v12  ;;  %v11454_v63 = vrot.slane %v2805_v11, %v11026_v20  ;;  %v11476_v33 = vrot.slane %v2805_v11, %v11029_v22  ;;  %v11488_v22 = vrot.slane %v2805_v11, %v11033_v25  ;;  %v10334_v25 = vld [vmem:[%s12755_s4 + $0x20] sm:$0xf] }
  0xdf   : > { %10318 = vmatpush1.msk.msra.mxu0 %vm590_vm1, %v2256_v31  ;;  %2487 = vmatprep.mubr.f32.mxu0 %v12771_v13  ;;  %v11443_v31 = vrot.slane %v2503_v56, %v11053_v34  ;;  %v11472_v56 = vrot.slane %v2805_v11, %v11039_v27 }
  0xe0   : > { %10323 = vmatprep.subr.msk.mxu0 %vm590_vm1, %v2555_v55  ;;  %v2807_v59 = vpop.permute.xlu0 %2806  ;;  %v2522_v55 = vsel %vm2516_vm8, %v2515_v41, %v2505_v0  ;;  %12798 = vst [vmem:[#allocation7_spill] sm:$0xff] %v11454_v63  ;;  %v2822_v0 = vsel %vm2818_vm9, %v2809_v10, %v2811_v8  ;;  %v2813_v46 = vpop.permute.xlu1 %2812  ;;  %12801 = vst [vmem:[#allocation10_spill] sm:$0xff] %v11476_v33 }
  0xe1   : > { %v2857_v47 = vmul.f32 %v11454_v63, %v2822_v0  ;;  %12800 = vst [vmem:[#allocation9_spill] sm:$0xff] %v11472_v56  ;;  %12802 = vst [vmem:[#allocation11_spill] sm:$0xff] %v11488_v22  ;;  %v2821_v0 = vsel %vm2818_vm9, %v2811_v8, %v2813_v46 }
  0xe2   : > { %10319 = vmatmul.mubr.msk.f32.vlgmr.msra.gmra.mrb[4].mxu0 %vm586_vm2, %v10310_v12  ;;  %v2517_v12 = vsel %vm2516_vm8, %v2513_v14, %v2515_v41  ;;  %v2823_v41 = vsel %vm2818_vm9, %v2807_v59, %v2809_v10  ;;  %v11494_v10 = vrot.slane %v2805_v11, %v11053_v34  ;;  %v2858_v8 = vmul.f32 %v11488_v22, %v2821_v0 }
  0xe3   : > { %10324 = vmatpush1.msk.msra.mxu0 %vm590_vm1, %v2554_v4  ;;  %2647 = vmatprep.mubr.f32.mxu0 %v12771_v13  ;;  %v2559_v4 = vmul.f32 %v11443_v31, %v2522_v55  ;;  %v11507_v34 = vrot.slane %v2805_v11, %v11058_v36 }
  0xe4   : > { %10326 = vmatprep.subr.msk.mxu0 %vm590_vm1, %v2557_v18  ;;  %v2815_v20 = vpop.permute.xlu0 %2814  ;;  %v2558_v18 = vmul.f32 %v11459_v58, %v2517_v12  ;;  %v2817_v55 = vpop.permute.xlu1 %2816  ;;  %12803 = vst [vmem:[#allocation12_spill] sm:$0xff] %v11494_v10 }
  0xe5   : > { %v2820_v14 = vsel %vm2818_vm9, %v2813_v46, %v2815_v20  ;;  %12804 = vst [vmem:[#allocation13_spill] sm:$0xff] %v11507_v34 }
  0xe6   : > { %10325 = vmatmul.mubr.msk.f32.vlgmr.msra.gmra.mrb[0].mxu0 %vm586_vm2, %v10322_v53  ;;  %v2859_v27 = vmul.f32 %v11472_v56, %v2820_v14 }
  0xe7   : > { %10327 = vmatpush1.msk.msra.mxu0 %vm590_vm1, %v2556_v9  ;;  %2718 = vmatprep.mubr.f32.mxu0 %v12771_v13  ;;  %v2856_v9 = vmul.f32 %v11476_v33, %v2823_v41 }
  0xe8   : > { %10329 = vmatprep.subr.msk.mxu0 %vm590_vm1, %v2559_v4  ;;  %v2824_v4 = vsel %vm2818_vm9, %v2817_v55, %v2807_v59  ;;  %v2819_v59 = vsel %vm2818_vm9, %v2815_v20, %v2817_v55 }
  0xe9   : > { %v2860_v12 = vmul.f32 %v11507_v34, %v2819_v59 }
  0xea   : > { %10328 = vmatmul.mubr.msk.f32.vlgmr.msra.gmra.mrb[2].mxu0 %vm586_vm2, %v10322_v53 }
  0xeb   : > { %10330 = vmatpush1.msk.msra.mxu0 %vm590_vm1, %v2558_v18  ;;  %2789 = vmatprep.mubr.f32.mxu0 %v12771_v13 }
  0xec   : > { %10335 = vmatprep.subr.msk.mxu0 %vm590_vm1, %v2857_v47  ;;  %v3122_v47 = vld [vmem:[%s411_s13] sm:$0xff] }
  0xed   : > { %v3124_v55 = vcombine.high %v3122_v47, %v3122_v47 }
  0xee   : > { %10331 = vmatmul.mubr.msk.f32.vlgmr.msra.gmra.mrb[4].mxu0 %vm586_vm2, %v10322_v53  ;;  %v2861_v53 = vmul.f32 %v11494_v10, %v2824_v4 }
  0xef   : > { %10336 = vmatpush1.msk.msra.mxu0 %vm590_vm1, %v2856_v9  ;;  %2949 = vmatprep.mubr.f32.mxu0 %v12771_v13 }
  0xf0   : > { %10338 = vmatprep.subr.msk.mxu0 %vm590_vm1, %v2859_v27 }
  0xf2   : > { %10337 = vmatmul.mubr.msk.f32.vlgmr.msra.gmra.mrb[0].mxu0 %vm586_vm2, %v10334_v25 }
  0xf3   : > { %10339 = vmatpush1.msk.msra.mxu0 %vm590_vm1, %v2858_v8  ;;  %3020 = vmatprep.mubr.f32.mxu0 %v12771_v13 }
  0xf4   : > { %10341 = vmatprep.subr.msk.mxu0 %vm590_vm1, %v2861_v53  ;;  %v3125_v53 = vld [vmem:[%s11536_s19] sm:$0xff] }
  0xf5   : > { %v3108_v36 = vpop.permute.xlu0 %3107 }
  0xf6   : > { %10340 = vmatmul.mubr.msk.f32.vlgmr.msra.gmra.mrb[2].mxu0 %vm586_vm2, %v10334_v25 }
  0xf7   : > { %10342 = vmatpush1.msk.msra.mxu0 %vm590_vm1, %v2860_v12  ;;  %3091 = vmatprep.mubr.f32.mxu0 %v12771_v13 }
  0xfa   : > { %10343 = vmatmul.mubr.msk.f32.vlgmr.msra.gmra.mrb[4].mxu0 %vm586_vm2, %v10334_v25  ;;  %v3128_v25 = vcombine.low %v3122_v47, %v3124_v55  ;;  %v3127_v47 = vld [vmem:[%s11536_s19 + $0x10] sm:$0xff] }
  0xfb   : > { %8001 = vmatprep.mubr.f32.mxu0 %v12771_v13 }
  0xfc   : > { %v11547_v13 = vsub.f32 %v3125_v53, %v3128_v25  ;;  %v11564_v55 = vsub.f32 %v3127_v47, %v3128_v25 }
 0x1c5   : > { %v2951_v11 = vpop.f32.mrb[0].mxu0 }
 0x1c6   : > { %v3110_v46 = vadd.f32 %v3108_v36, %v2951_v11  ;;  %v2953_v20 = vpop.f32.mrb[1].mxu0 }
 0x1c7   : > { %v3111_v14 = vadd.f32 %v3108_v36, %v2953_v20 }
 0x1c8   : > { %v11529_v18 = vmax.f32 %v3110_v46, 0.0 }
 0x1c9   : > { %v3022_v41 = vpop.f32.mrb[2].mxu0  ;;  %v11538_v9 = vmax.f32 %v3111_v14, 0.0 }
 0x1ca   : > { %v3024_v27 = vpop.f32.mrb[3].mxu0  ;;  %3167 = vrot.lane.b32.xlu1 %v11529_v18, %s10811_s24  ;;  %v3112_v0 = vadd.f32 %v3108_v36, %v3022_v41 }
 0x1cb   : > { %v3113_v46 = vadd.f32 %v3108_v36, %v3024_v27  ;;  %v3126_v27 = vld [vmem:[%s11536_s19 + $0x8] sm:$0xff] }
 0x1cc   : > { %v11543_v12 = vmax.f32 %v3112_v0, 0.0  ;;  %v11571_v0 = vsub.f32 %v3126_v27, %v3128_v25 }
 0x1cd   : > { %v3093_v4 = vpop.f32.mrb[4].mxu0  ;;  %v11556_v41 = vmax.f32 %v3113_v46, 0.0 }
 0x1ce   : > { %v3095_v8 = vpop.f32.mrb[5].mxu0  ;;  %3169 = vrot.lane.b32.xlu1 %v11538_v9, %s10811_s24  ;;  %v3114_v11 = vadd.f32 %v3108_v36, %v3093_v4  ;;  %v11577_v4 = vcombine.high %v11564_v55, %v11564_v55 }
 0x1cf   : > { %v3115_v59 = vadd.f32 %v3108_v36, %v3095_v8  ;;  %v11562_v36 = vcombine.high %v11547_v13, %v11547_v13  ;;  %v11585_v8 = vcombine.high %v11571_v0, %v11571_v0 }
 0x1d0   : > { %v11554_v14 = vmax.f32 %v3114_v11, 0.0 }
 0x1d1   : > { %v11545_v20 = vmax.f32 %v3115_v59, 0.0 }
 0x1d2   : > { %3171 = vrot.lane.b32.xlu1 %v11543_v12, %s10811_s24 }
 0x1d3   : > { %3177 = vrot.lane.b32.xlu0 %v11545_v20, %s10811_s24 }
 0x1d6   : > { %3175 = vrot.lane.b32.xlu1 %v11554_v14, %s10811_s24 }
 0x1d7   : > { %3173 = vrot.lane.b32.xlu0 %v11556_v41, %s10811_s24 }
 0x1da   : > { %3144 = vrot.lane.b32.xlu1 %v11562_v36, %s10811_s24 }
 0x1db   : > { %3142 = vrot.lane.b32.xlu0 %v11547_v13, %s10811_s24 }
 0x1de   : > { %3146 = vrot.lane.b32.xlu1 %v11571_v0, %s10811_s24 }
 0x1df   : > { %3152 = vrot.lane.b32.xlu0 %v11577_v4, %s10811_s24 }
 0x1e2   : > { %3150 = vrot.lane.b32.xlu1 %v11564_v55, %s10811_s24 }
 0x1e3   : > { %3148 = vrot.lane.b32.xlu0 %v11585_v8, %s10811_s24 }
 0x1e6   : > { %3664 = vrot.lane.b32.xlu1 %v11562_v36, %s10809_s23 }
 0x1e7   : > { %3662 = vrot.lane.b32.xlu0 %v11547_v13, %s10809_s23 }
 0x1ea   : > { %3666 = vrot.lane.b32.xlu1 %v11571_v0, %s10809_s23 }
 0x1eb   : > { %3672 = vrot.lane.b32.xlu0 %v11577_v4, %s10809_s23 }
 0x1ee   : > { %3670 = vrot.lane.b32.xlu1 %v11564_v55, %s10809_s23 }
 0x1ef   : > { %3668 = vrot.lane.b32.xlu0 %v11585_v8, %s10809_s23 }
 0x1f2   : > { %3930 = vrot.lane.b32.xlu1 %v11538_v9, %s10809_s23 }
 0x1f3   : > { %3928 = vrot.lane.b32.xlu0 %v11529_v18, %s10809_s23 }
 0x1f6   : > { %3932 = vrot.lane.b32.xlu1 %v11543_v12, %s10809_s23 }
 0x1f7   : > { %3938 = vrot.lane.b32.xlu0 %v11545_v20, %s10809_s23 }
 0x1fa   : > { %3936 = vrot.lane.b32.xlu1 %v11554_v14, %s10809_s23 }
 0x1fb   : > { %3934 = vrot.lane.b32.xlu0 %v11556_v41, %s10809_s23 }
 0x1fe   : > { %4196 = vrot.lane.b32.xlu1 %v11562_v36, %s10812_s25 }
 0x1ff   : > { %4194 = vrot.lane.b32.xlu0 %v11547_v13, %s10812_s25 }
 0x202   : > { %4198 = vrot.lane.b32.xlu1 %v11571_v0, %s10812_s25 }
 0x203   : > { %4204 = vrot.lane.b32.xlu0 %v11577_v4, %s10812_s25 }
 0x206   : > { %4202 = vrot.lane.b32.xlu1 %v11564_v55, %s10812_s25 }
 0x207   : > { %4200 = vrot.lane.b32.xlu0 %v11585_v8, %s10812_s25 }
 0x20a   : > { %4462 = vrot.lane.b32.xlu1 %v11538_v9, %s10812_s25 }
 0x20b   : > { %4460 = vrot.lane.b32.xlu0 %v11529_v18, %s10812_s25 }
 0x20e   : > { %4464 = vrot.lane.b32.xlu1 %v11543_v12, %s10812_s25 }
 0x20f   : > { %4470 = vrot.lane.b32.xlu0 %v11545_v20, %s10812_s25 }
 0x212   : > { %4468 = vrot.lane.b32.xlu1 %v11554_v14, %s10812_s25 }
 0x213   : > { %4466 = vrot.lane.b32.xlu0 %v11556_v41, %s10812_s25 }
 0x216   : > { %4728 = vrot.lane.b32.xlu1 %v11562_v36, %s10813_s26 }
 0x217   : > { %4726 = vrot.lane.b32.xlu0 %v11547_v13, %s10813_s26 }
 0x21a   : > { %4730 = vrot.lane.b32.xlu1 %v11571_v0, %s10813_s26 }
 0x21b   : > { %4736 = vrot.lane.b32.xlu0 %v11577_v4, %s10813_s26 }
 0x21e   : > { %4734 = vrot.lane.b32.xlu1 %v11564_v55, %s10813_s26 }
 0x21f   : > { %4732 = vrot.lane.b32.xlu0 %v11585_v8, %s10813_s26 }
 0x222   : > { %4994 = vrot.lane.b32.xlu1 %v11538_v9, %s10813_s26 }
 0x223   : > { %4992 = vrot.lane.b32.xlu0 %v11529_v18, %s10813_s26 }
 0x226   : > { %4996 = vrot.lane.b32.xlu1 %v11543_v12, %s10813_s26 }
 0x227   : > { %5002 = vrot.lane.b32.xlu0 %v11545_v20, %s10813_s26 }
 0x22a   : > { %5000 = vrot.lane.b32.xlu1 %v11554_v14, %s10813_s26 }
 0x22b   : > { %4998 = vrot.lane.b32.xlu0 %v11556_v41, %s10813_s26 }
 0x22e   : > { %5740 = vrot.lane.b32.xlu1 %v11571_v0, %s10814_s27 }
 0x22f   : > { %5738 = vrot.lane.b32.xlu0 %v11562_v36, %s10814_s27 }
 0x232   : > { %5742 = vrot.lane.b32.xlu1 %v11585_v8, %s10814_s27 }
 0x233   : > { %5736 = vrot.lane.b32.xlu0 %v11547_v13, %s10814_s27 }
 0x236   : > { %5746 = vrot.lane.b32.xlu1 %v11577_v4, %s10814_s27 }
 0x237   : > { %5744 = vrot.lane.b32.xlu0 %v11564_v55, %s10814_s27 }
 0x23a   : > { %6006 = vrot.lane.b32.xlu1 %v11543_v12, %s10814_s27 }
 0x23b   : > { %6004 = vrot.lane.b32.xlu0 %v11538_v9, %s10814_s27 }
 0x23c   : > { %v3168_v25 = vpop.permute.xlu1 %3167 }
 0x23e   : > { %6008 = vrot.lane.b32.xlu1 %v11556_v41, %s10814_s27 }
 0x23f   : > { %6002 = vrot.lane.b32.xlu0 %v11529_v18, %s10814_s27 }
 0x240   : > { %v3170_v53 = vpop.permute.xlu1 %3169 }
 0x241   : > { %v3183_v59 = vsel %vm479_vm3, %v3168_v25, %v3170_v53 }
 0x242   : > { %6012 = vrot.lane.b32.xlu1 %v11545_v20, %s10814_s27  ;;  %v3186_v11 = vmul.f32 %v3183_v59, %v11091_v52  ;;  %v3191_v59 = vld [vmem:[%s12758_s7] sm:$0xff] }
 0x243   : > { %6010 = vrot.lane.b32.xlu0 %v11554_v14, %s10814_s27 }
 0x244   : > { %10344 = vmatprep.subr.msk.mxu1 %vm3196_vm10, %v3186_v11  ;;  %v3172_v46 = vpop.permute.xlu1 %3171 }
 0x245   : > { %v3178_v47 = vpop.permute.xlu0 %3177  ;;  %v3182_v11 = vsel %vm479_vm3, %v3170_v53, %v3172_v46 }
 0x246   : > { %v3184_v27 = vsel %vm479_vm3, %v3178_v47, %v3168_v25  ;;  %6272 = vrot.lane.b32.xlu1 %v11571_v0, %s10815_s28  ;;  %v3187_v53 = vmul.f32 %v3182_v11, %v11124_v5 }
 0x247   : > { %6270 = vrot.lane.b32.xlu0 %v11562_v36, %s10815_s28  ;;  %v3185_v34 = vmul.f32 %v3184_v27, %v11105_v60 }
 0x248   : > { %v3176_v10 = vpop.permute.xlu1 %3175 }
 0x249   : > { %v3174_v22 = vpop.permute.xlu0 %3173  ;;  %10345 = vmatpush1.msk.msra.mxu1 %vm3196_vm10, %v3185_v34  ;;  %v3179_v25 = vsel %vm479_vm3, %v3176_v10, %v3178_v47  ;;  %v12805_v34 = vmov 0.0  }
 0x24a   : > { %v3181_v33 = vsel %vm479_vm3, %v3172_v46, %v3174_v22  ;;  %6274 = vrot.lane.b32.xlu1 %v11585_v8, %s10815_s28  ;;  %10346 = vmatmul.mubr.msk.f32.vlgmr.msra.gmra.mrb[0].mxu1 %vm3192_vm11, %v3191_v59  ;;  %v3180_v27 = vsel %vm479_vm3, %v3174_v22, %v3176_v10  ;;  %v3190_v46 = vmul.f32 %v3179_v25, %v11133_v15 }
 0x24b   : > { %v3188_v56 = vmul.f32 %v3181_v33, %v11121_v3  ;;  %6268 = vrot.lane.b32.xlu0 %v11547_v13, %s10815_s28  ;;  %3350 = vmatprep.mubr.f32.mxu1 %v12805_v34  ;;  %v3189_v58 = vmul.f32 %v3180_v27, %v11139_v21  ;;  %v3166_v27 = vld [vmem:[%s12757_s6] sm:$0xff] }
 0x24c   : > { %v3145_v47 = vpop.permute.xlu1 %3144 }
 0x24d   : > { %10347 = vmatprep.subr.msk.mxu1 %vm3196_vm10, %v3188_v56  ;;  %v3143_v63 = vpop.permute.xlu0 %3142 }
 0x24e   : > { %v3158_v22 = vsel %vm479_vm3, %v3143_v63, %v3145_v47  ;;  %10348 = vmatpush1.msk.msra.mxu1 %vm3196_vm10, %v3187_v53  ;;  %6278 = vrot.lane.b32.xlu1 %v11577_v4, %s10815_s28 }
 0x24f   : > { %v3161_v33 = vmul.f32 %v3158_v22, %v11091_v52  ;;  %10349 = vmatmul.mubr.msk.f32.vlgmr.msra.gmra.mrb[2].mxu1 %vm3192_vm11, %v3191_v59  ;;  %10350 = vmatprep.subr.msk.mxu1 %vm3196_vm10, %v3190_v46 }
 0x250   : > { %6276 = vrot.lane.b32.xlu0 %v11564_v55, %s10815_s28  ;;  %10351 = vmatpush1.msk.msra.mxu1 %vm3196_vm10, %v3189_v58  ;;  %v3147_v56 = vpop.permute.xlu1 %3146 }
 0x251   : > { %v3153_v10 = vpop.permute.xlu0 %3152  ;;  %10353 = vmatprep.subr.msk.mxu1 %vm3196_vm10, %v3161_v33  ;;  %3421 = vmatprep.mubr.f32.mxu1 %v12805_v34 }
 0x252   : > { %v3159_v11 = vsel %vm479_vm3, %v3153_v10, %v3143_v63  ;;  %6538 = vrot.lane.b32.xlu1 %v11543_v12, %s10815_s28  ;;  %v3157_v63 = vsel %vm479_vm3, %v3145_v47, %v3147_v56 }
 0x253   : > { %v3160_v25 = vmul.f32 %v3159_v11, %v11105_v60  ;;  %10352 = vmatmul.mubr.msk.f32.vlgmr.msra.gmra.mrb[4].mxu1 %vm3192_vm11, %v3191_v59  ;;  %v3162_v47 = vmul.f32 %v3157_v63, %v11124_v5 }
 0x254   : > { %6536 = vrot.lane.b32.xlu0 %v11538_v9, %s10815_s28  ;;  %v3151_v58 = vpop.permute.xlu1 %3150  ;;  %3513 = vmatprep.mubr.f32.mxu1 %v12805_v34 }
 0x255   : > { %v3149_v53 = vpop.permute.xlu0 %3148  ;;  %10354 = vmatpush1.msk.msra.mxu1 %vm3196_vm10, %v3160_v25  ;;  %v3154_v46 = vsel %vm479_vm3, %v3151_v58, %v3153_v10 }
 0x256   : > { %v3156_v59 = vsel %vm479_vm3, %v3147_v56, %v3149_v53  ;;  %6540 = vrot.lane.b32.xlu1 %v11556_v41, %s10815_s28  ;;  %v3155_v22 = vsel %vm479_vm3, %v3149_v53, %v3151_v58  ;;  %v3165_v56 = vmul.f32 %v3154_v46, %v11133_v15 }
 0x257   : > { %v3163_v33 = vmul.f32 %v3156_v59, %v11121_v3  ;;  %10355 = vmatmul.mubr.msk.f32.vlgmr.msra.gmra.mrb[0].mxu1 %vm3192_vm11, %v3166_v27  ;;  %v3164_v25 = vmul.f32 %v3155_v22, %v11139_v21 }
 0x258   : > { %6534 = vrot.lane.b32.xlu0 %v11529_v18, %s10815_s28  ;;  %v3665_v11 = vpop.permute.xlu1 %3664  ;;  %3584 = vmatprep.mubr.f32.mxu1 %v12805_v34 }
 0x259   : > { %v3663_v10 = vpop.permute.xlu0 %3662  ;;  %10356 = vmatprep.subr.msk.mxu1 %vm3196_vm10, %v3163_v33 }
 0x25a   : > { %v3678_v58 = vsel %vm540_vm0, %v3663_v10, %v3665_v11  ;;  %6544 = vrot.lane.b32.xlu1 %v11545_v20, %s10815_s28  ;;  %10357 = vmatpush1.msk.msra.mxu1 %vm3196_vm10, %v3162_v47  ;;  %v10362_v47 = vld [vmem:[%s12757_s6 + $0x8] sm:$0xff] }
 0x25b   : > { %v3681_v63 = vmul.f32 %v3678_v58, %v11036_v26  ;;  %10358 = vmatmul.mubr.msk.f32.vlgmr.msra.gmra.mrb[2].mxu1 %vm3192_vm11, %v3166_v27  ;;  %10359 = vmatprep.subr.msk.mxu1 %vm3196_vm10, %v3165_v56 }
 0x25c   : > { %6542 = vrot.lane.b32.xlu0 %v11554_v14, %s10815_s28  ;;  %10360 = vmatpush1.msk.msra.mxu1 %vm3196_vm10, %v3164_v25  ;;  %v3667_v53 = vpop.permute.xlu1 %3666 }
 0x25d   : > { %v3673_v46 = vpop.permute.xlu0 %3672  ;;  %10363 = vmatprep.subr.msk.mxu1 %vm3196_vm10, %v3681_v63  ;;  %3655 = vmatprep.mubr.f32.mxu1 %v12805_v34  ;;  %v3677_v56 = vsel %vm540_vm0, %v3665_v11, %v3667_v53 }
 0x25e   : > { %v3679_v59 = vsel %vm540_vm0, %v3673_v46, %v3663_v10  ;;  %6804 = vrot.lane.b32.xlu1 %v11571_v0, %s10816_s29  ;;  %v3682_v11 = vmul.f32 %v3677_v56, %v11065_v40 }
 0x25f   : > { %v3680_v22 = vmul.f32 %v3679_v59, %v11042_v28  ;;  %10361 = vmatmul.mubr.msk.f32.vlgmr.msra.gmra.mrb[4].mxu1 %vm3192_vm11, %v3166_v27 }
 0x260   : > { %6802 = vrot.lane.b32.xlu0 %v11562_v36, %s10816_s29  ;;  %v3671_v33 = vpop.permute.xlu1 %3670  ;;  %3773 = vmatprep.mubr.f32.mxu1 %v12805_v34 }
 0x261   : > { %v3669_v10 = vpop.permute.xlu0 %3668  ;;  %10364 = vmatpush1.msk.msra.mxu1 %vm3196_vm10, %v3680_v22  ;;  %v3674_v25 = vsel %vm540_vm0, %v3671_v33, %v3673_v46 }
 0x262   : > { %v3676_v27 = vsel %vm540_vm0, %v3667_v53, %v3669_v10  ;;  %6806 = vrot.lane.b32.xlu1 %v11585_v8, %s10816_s29  ;;  %v3675_v58 = vsel %vm540_vm0, %v3669_v10, %v3671_v33  ;;  %v3685_v53 = vmul.f32 %v3674_v25, %v11075_v44 }
 0x263   : > { %v3683_v63 = vmul.f32 %v3676_v27, %v11062_v38  ;;  %10365 = vmatmul.mubr.msk.f32.vlgmr.msra.gmra.mrb[0].mxu1 %vm3192_vm11, %v10362_v47  ;;  %v3684_v22 = vmul.f32 %v3675_v58, %v11080_v48 }
 0x264   : > { %6800 = vrot.lane.b32.xlu0 %v11547_v13, %s10816_s29  ;;  %v3931_v59 = vpop.permute.xlu1 %3930  ;;  %3844 = vmatprep.mubr.f32.mxu1 %v12805_v34 }
 0x265   : > { %v3929_v46 = vpop.permute.xlu0 %3928  ;;  %10366 = vmatprep.subr.msk.mxu1 %vm3196_vm10, %v3683_v63 }
 0x266   : > { %v3944_v33 = vsel %vm540_vm0, %v3929_v46, %v3931_v59  ;;  %6810 = vrot.lane.b32.xlu1 %v11577_v4, %s10816_s29  ;;  %10367 = vmatpush1.msk.msra.mxu1 %vm3196_vm10, %v3682_v11  ;;  %v10372_v11 = vld [vmem:[%s12758_s7 + $0x8] sm:$0xff] }
 0x267   : > { %v3947_v56 = vmul.f32 %v3944_v33, %v11036_v26  ;;  %10368 = vmatmul.mubr.msk.f32.vlgmr.msra.gmra.mrb[2].mxu1 %vm3192_vm11, %v10362_v47  ;;  %10369 = vmatprep.subr.msk.mxu1 %vm3196_vm10, %v3685_v53 }
 0x268   : > { %6808 = vrot.lane.b32.xlu0 %v11564_v55, %s10816_s29  ;;  %10370 = vmatpush1.msk.msra.mxu1 %vm3196_vm10, %v3684_v22  ;;  %v3933_v10 = vpop.permute.xlu1 %3932 }
 0x269   : > { %v3939_v25 = vpop.permute.xlu0 %3938  ;;  %10373 = vmatprep.subr.msk.mxu1 %vm3196_vm10, %v3947_v56  ;;  %3915 = vmatprep.mubr.f32.mxu1 %v12805_v34  ;;  %v3943_v53 = vsel %vm540_vm0, %v3931_v59, %v3933_v10 }
 0x26a   : > { %v3945_v27 = vsel %vm540_vm0, %v3939_v25, %v3929_v46  ;;  %7070 = vrot.lane.b32.xlu1 %v11543_v12, %s10816_s29  ;;  %v3948_v59 = vmul.f32 %v3943_v53, %v11065_v40 }
 0x26b   : > { %v3946_v58 = vmul.f32 %v3945_v27, %v11042_v28  ;;  %10371 = vmatmul.mubr.msk.f32.vlgmr.msra.gmra.mrb[4].mxu1 %vm3192_vm11, %v10362_v47 }
 0x26c   : > { %7068 = vrot.lane.b32.xlu0 %v11538_v9, %s10816_s29  ;;  %v3937_v63 = vpop.permute.xlu1 %3936  ;;  %4039 = vmatprep.mubr.f32.mxu1 %v12805_v34 }
 0x26d   : > { %v3935_v46 = vpop.permute.xlu0 %3934  ;;  %10374 = vmatpush1.msk.msra.mxu1 %vm3196_vm10, %v3946_v58  ;;  %v3940_v22 = vsel %vm540_vm0, %v3937_v63, %v3939_v25 }
 0x26e   : > { %v3942_v47 = vsel %vm540_vm0, %v3933_v10, %v3935_v46  ;;  %7072 = vrot.lane.b32.xlu1 %v11556_v41, %s10816_s29  ;;  %v3941_v33 = vsel %vm540_vm0, %v3935_v46, %v3937_v63  ;;  %v3951_v10 = vmul.f32 %v3940_v22, %v11075_v44 }
 0x26f   : > { %v3949_v56 = vmul.f32 %v3942_v47, %v11062_v38  ;;  %10375 = vmatmul.mubr.msk.f32.vlgmr.msra.gmra.mrb[0].mxu1 %vm3192_vm11, %v10372_v11  ;;  %v3950_v58 = vmul.f32 %v3941_v33, %v11080_v48 }
 0x270   : > { %7066 = vrot.lane.b32.xlu0 %v11529_v18, %s10816_s29  ;;  %v4197_v27 = vpop.permute.xlu1 %4196  ;;  %4110 = vmatprep.mubr.f32.mxu1 %v12805_v34 }
 0x271   : > { %v4195_v25 = vpop.permute.xlu0 %4194  ;;  %10376 = vmatprep.subr.msk.mxu1 %vm3196_vm10, %v3949_v56 }
 0x272   : > { %v4210_v63 = vsel %vm1072_vm4, %v4195_v25, %v4197_v27  ;;  %7076 = vrot.lane.b32.xlu1 %v11545_v20, %s10816_s29  ;;  %10377 = vmatpush1.msk.msra.mxu1 %vm3196_vm10, %v3948_v59  ;;  %v10382_v59 = vld [vmem:[%s12757_s6 + $0x10] sm:$0xff] }
 0x273   : > { %v4213_v53 = vmul.f32 %v4210_v63, %v11149_v30  ;;  %10378 = vmatmul.mubr.msk.f32.vlgmr.msra.gmra.mrb[2].mxu1 %vm3192_vm11, %v10372_v11  ;;  %10379 = vmatprep.subr.msk.mxu1 %vm3196_vm10, %v3951_v10 }
 0x274   : > { %7074 = vrot.lane.b32.xlu0 %v11554_v14, %s10816_s29  ;;  %10380 = vmatpush1.msk.msra.mxu1 %vm3196_vm10, %v3950_v58  ;;  %v4199_v46 = vpop.permute.xlu1 %4198 }
 0x275   : > { %v4205_v22 = vpop.permute.xlu0 %4204  ;;  %10383 = vmatprep.subr.msk.mxu1 %vm3196_vm10, %v4213_v53  ;;  %4181 = vmatprep.mubr.f32.mxu1 %v12805_v34  ;;  %v4209_v10 = vsel %vm1072_vm4, %v4197_v27, %v4199_v46 }
 0x276   : > { %v4211_v47 = vsel %vm1072_vm4, %v4205_v22, %v4195_v25  ;;  %7336 = vrot.lane.b32.xlu1 %v11571_v0, %s10817_s30  ;;  %v4214_v27 = vmul.f32 %v4209_v10, %v11182_v54 }
 0x277   : > { %v4212_v33 = vmul.f32 %v4211_v47, %v11163_v42  ;;  %10381 = vmatmul.mubr.msk.f32.vlgmr.msra.gmra.mrb[4].mxu1 %vm3192_vm11, %v10372_v11 }
 0x278   : > { %7334 = vrot.lane.b32.xlu0 %v11562_v36, %s10817_s30  ;;  %v4203_v56 = vpop.permute.xlu1 %4202  ;;  %4305 = vmatprep.mubr.f32.mxu1 %v12805_v34 }
 0x279   : > { %v4201_v25 = vpop.permute.xlu0 %4200  ;;  %10384 = vmatpush1.msk.msra.mxu1 %vm3196_vm10, %v4212_v33  ;;  %v4206_v58 = vsel %vm1072_vm4, %v4203_v56, %v4205_v22 }
 0x27a   : > { %v4208_v11 = vsel %vm1072_vm4, %v4199_v46, %v4201_v25  ;;  %7338 = vrot.lane.b32.xlu1 %v11585_v8, %s10817_s30  ;;  %v4207_v63 = vsel %vm1072_vm4, %v4201_v25, %v4203_v56  ;;  %v4217_v46 = vmul.f32 %v4206_v58, %v11191_v57 }
 0x27b   : > { %v4215_v53 = vmul.f32 %v4208_v11, %v11179_v51  ;;  %10385 = vmatmul.mubr.msk.f32.vlgmr.msra.gmra.mrb[0].mxu1 %vm3192_vm11, %v10382_v59  ;;  %v4216_v33 = vmul.f32 %v4207_v63, %v11197_v62 }
 0x27c   : > { %7332 = vrot.lane.b32.xlu0 %v11547_v13, %s10817_s30  ;;  %v4463_v47 = vpop.permute.xlu1 %4462  ;;  %4376 = vmatprep.mubr.f32.mxu1 %v12805_v34 }
 0x27d   : > { %v4461_v22 = vpop.permute.xlu0 %4460  ;;  %10386 = vmatprep.subr.msk.mxu1 %vm3196_vm10, %v4215_v53 }
 0x27e   : > { %v4476_v56 = vsel %vm1072_vm4, %v4461_v22, %v4463_v47  ;;  %7342 = vrot.lane.b32.xlu1 %v11577_v4, %s10817_s30  ;;  %10387 = vmatpush1.msk.msra.mxu1 %vm3196_vm10, %v4214_v27  ;;  %v10392_v27 = vld [vmem:[%s12758_s7 + $0x10] sm:$0xff] }
 0x27f   : > { %v4479_v10 = vmul.f32 %v4476_v56, %v11149_v30  ;;  %10388 = vmatmul.mubr.msk.f32.vlgmr.msra.gmra.mrb[2].mxu1 %vm3192_vm11, %v10382_v59  ;;  %10389 = vmatprep.subr.msk.mxu1 %vm3196_vm10, %v4217_v46 }
 0x280   : > { %7340 = vrot.lane.b32.xlu0 %v11564_v55, %s10817_s30  ;;  %10390 = vmatpush1.msk.msra.mxu1 %vm3196_vm10, %v4216_v33  ;;  %v4465_v25 = vpop.permute.xlu1 %4464 }
 0x281   : > { %v4471_v58 = vpop.permute.xlu0 %4470  ;;  %10393 = vmatprep.subr.msk.mxu1 %vm3196_vm10, %v4479_v10  ;;  %4447 = vmatprep.mubr.f32.mxu1 %v12805_v34  ;;  %v4475_v46 = vsel %vm1072_vm4, %v4463_v47, %v4465_v25 }
 0x282   : > { %v4477_v11 = vsel %vm1072_vm4, %v4471_v58, %v4461_v22  ;;  %7602 = vrot.lane.b32.xlu1 %v11543_v12, %s10817_s30  ;;  %v4480_v47 = vmul.f32 %v4475_v46, %v11182_v54 }
 0x283   : > { %v4478_v63 = vmul.f32 %v4477_v11, %v11163_v42  ;;  %10391 = vmatmul.mubr.msk.f32.vlgmr.msra.gmra.mrb[4].mxu1 %vm3192_vm11, %v10382_v59 }
 0x284   : > { %7600 = vrot.lane.b32.xlu0 %v11538_v9, %s10817_s30  ;;  %v4469_v53 = vpop.permute.xlu1 %4468  ;;  %4571 = vmatprep.mubr.f32.mxu1 %v12805_v34 }
 0x285   : > { %v4467_v22 = vpop.permute.xlu0 %4466  ;;  %10394 = vmatpush1.msk.msra.mxu1 %vm3196_vm10, %v4478_v63  ;;  %v4472_v33 = vsel %vm1072_vm4, %v4469_v53, %v4471_v58 }
 0x286   : > { %v4474_v59 = vsel %vm1072_vm4, %v4465_v25, %v4467_v22  ;;  %7604 = vrot.lane.b32.xlu1 %v11556_v41, %s10817_s30  ;;  %v4473_v56 = vsel %vm1072_vm4, %v4467_v22, %v4469_v53  ;;  %v4483_v25 = vmul.f32 %v4472_v33, %v11191_v57 }
 0x287   : > { %v4481_v10 = vmul.f32 %v4474_v59, %v11179_v51  ;;  %10395 = vmatmul.mubr.msk.f32.vlgmr.msra.gmra.mrb[0].mxu1 %vm3192_vm11, %v10392_v27  ;;  %v4482_v63 = vmul.f32 %v4473_v56, %v11197_v62  ;;  %v7864_v59 = vld [vmem:[%s12759_s8] sm:$0xff] }
 0x288   : > { %7598 = vrot.lane.b32.xlu0 %v11529_v18, %s10817_s30  ;;  %v4729_v11 = vpop.permute.xlu1 %4728  ;;  %4642 = vmatprep.mubr.f32.mxu1 %v12805_v34 }
 0x289   : > { %v4727_v58 = vpop.permute.xlu0 %4726  ;;  %10396 = vmatprep.subr.msk.mxu1 %vm3196_vm10, %v4481_v10 }
 0x28a   : > { %v4742_v53 = vsel %vm1374_vm5, %v4727_v58, %v4729_v11  ;;  %7608 = vrot.lane.b32.xlu1 %v11545_v20, %s10817_s30  ;;  %10397 = vmatpush1.msk.msra.mxu1 %vm3196_vm10, %v4480_v47 }
 0x28b   : > { %v4745_v46 = vmul.f32 %v4742_v53, %v11207_v2  ;;  %10398 = vmatmul.mubr.msk.f32.vlgmr.msra.gmra.mrb[2].mxu1 %vm3192_vm11, %v10392_v27  ;;  %10399 = vmatprep.subr.msk.mxu1 %vm3196_vm10, %v4483_v25  ;;  %v10402_v25 = vld [vmem:[%s12757_s6 + $0x18] sm:$0xff] }
 0x28c   : > { %7606 = vrot.lane.b32.xlu0 %v11554_v14, %s10817_s30  ;;  %10400 = vmatpush1.msk.msra.mxu1 %vm3196_vm10, %v4482_v63  ;;  %v4731_v22 = vpop.permute.xlu1 %4730 }
 0x28d   : > { %v4737_v33 = vpop.permute.xlu0 %4736  ;;  %10403 = vmatprep.subr.msk.mxu1 %vm3196_vm10, %v4745_v46  ;;  %4713 = vmatprep.mubr.f32.mxu1 %v12805_v34  ;;  %v4741_v63 = vsel %vm1374_vm5, %v4729_v11, %v4731_v22 }
 0x28e   : > { %v4743_v56 = vsel %vm1374_vm5, %v4737_v33, %v4727_v58 }
 0x28f   : > { %v4744_v10 = vmul.f32 %v4743_v56, %v11221_v24  ;;  %10401 = vmatmul.mubr.msk.f32.vlgmr.msra.gmra.mrb[4].mxu1 %vm3192_vm11, %v10392_v27  ;;  %v4746_v56 = vmul.f32 %v4741_v63, %v11234_v37 }
 0x290   : > { %7867 = vperm.xlu0 %10780, %v7864_v59   ;;  %v4735_v47 = vpop.permute.xlu1 %4734  ;;  %4837 = vmatprep.mubr.f32.mxu1 %v12805_v34 }
 0x291   : > { %v4733_v53 = vpop.permute.xlu0 %4732  ;;  %10404 = vmatpush1.msk.msra.mxu1 %vm3196_vm10, %v4744_v10  ;;  %v4738_v58 = vsel %vm1374_vm5, %v4735_v47, %v4737_v33 }
 0x292   : > { %v4740_v27 = vsel %vm1374_vm5, %v4731_v22, %v4733_v53  ;;  %v4739_v46 = vsel %vm1374_vm5, %v4733_v53, %v4735_v47  ;;  %v4749_v11 = vmul.f32 %v4738_v58, %v11243_v43 }
 0x293   : > { %v4747_v59 = vmul.f32 %v4740_v27, %v11231_v35  ;;  %10405 = vmatmul.mubr.msk.f32.vlgmr.msra.gmra.mrb[0].mxu1 %vm3192_vm11, %v10402_v25  ;;  %v4748_v33 = vmul.f32 %v4739_v46, %v11249_v49 }
 0x294   : > { %v4995_v62 = vpop.permute.xlu1 %4994  ;;  %4908 = vmatprep.mubr.f32.mxu1 %v12805_v34 }
 0x295   : > { %v4993_v10 = vpop.permute.xlu0 %4992  ;;  %10406 = vmatprep.subr.msk.mxu1 %vm3196_vm10, %v4747_v59  ;;  %v10412_v59 = vld [vmem:[%s12758_s7 + $0x18] sm:$0xff] }
 0x296   : > { %v5008_v22 = vsel %vm1374_vm5, %v4993_v10, %v4995_v62  ;;  %10407 = vmatpush1.msk.msra.mxu1 %vm3196_vm10, %v4746_v56 }
 0x297   : > { %v5011_v47 = vmul.f32 %v5008_v22, %v11207_v2  ;;  %10408 = vmatmul.mubr.msk.f32.vlgmr.msra.gmra.mrb[2].mxu1 %vm3192_vm11, %v10402_v25  ;;  %10409 = vmatprep.subr.msk.mxu1 %vm3196_vm10, %v4749_v11 }
 0x298   : > { %10410 = vmatpush1.msk.msra.mxu1 %vm3196_vm10, %v4748_v33  ;;  %v4997_v63 = vpop.permute.xlu1 %4996  ;;  %4979 = vmatprep.mubr.f32.mxu1 %v12805_v34 }
 0x299   : > { %v5003_v53 = vpop.permute.xlu0 %5002  ;;  %10413 = vmatprep.subr.msk.mxu1 %vm3196_vm10, %v5011_v47  ;;  %v5007_v56 = vsel %vm1374_vm5, %v4995_v62, %v4997_v63 }
 0x29a   : > { %v5009_v58 = vsel %vm1374_vm5, %v5003_v53, %v4993_v10  ;;  %v5012_v47 = vmul.f32 %v5007_v56, %v11234_v37 }
 0x29b   : > { %v5010_v27 = vmul.f32 %v5009_v58, %v11221_v24  ;;  %10411 = vmatmul.mubr.msk.f32.vlgmr.msra.gmra.mrb[4].mxu1 %vm3192_vm11, %v10402_v25 }
 0x29c   : > { %v5001_v46 = vpop.permute.xlu1 %5000  ;;  %5103 = vmatprep.mubr.f32.mxu1 %v12805_v34 }
 0x29d   : > { %v4999_v11 = vpop.permute.xlu0 %4998  ;;  %10414 = vmatpush1.msk.msra.mxu1 %vm3196_vm10, %v5010_v27  ;;  %v5004_v10 = vsel %vm1374_vm5, %v5001_v46, %v5003_v53 }
 0x29e   : > { %v5006_v33 = vsel %vm1374_vm5, %v4997_v63, %v4999_v11  ;;  %v5005_v25 = vsel %vm1374_vm5, %v4999_v11, %v5001_v46  ;;  %v5015_v62 = vmul.f32 %v5004_v10, %v11243_v43  ;;  %v10422_v11 = vld [vmem:[%s12757_s6 + $0x20] sm:$0xff] }
 0x29f   : > { %v5013_v22 = vmul.f32 %v5006_v33, %v11231_v35  ;;  %10415 = vmatmul.mubr.msk.f32.vlgmr.msra.gmra.mrb[0].mxu1 %vm3192_vm11, %v10412_v59  ;;  %v5014_v53 = vmul.f32 %v5005_v25, %v11249_v49 }
 0x2a0   : > { %v5741_v58 = vpop.permute.xlu1 %5740  ;;  %5174 = vmatprep.mubr.f32.mxu1 %v12805_v34 }
 0x2a1   : > { %v5739_v27 = vpop.permute.xlu0 %5738  ;;  %10416 = vmatprep.subr.msk.mxu1 %vm3196_vm10, %v5013_v22 }
 0x2a2   : > { %10417 = vmatpush1.msk.msra.mxu1 %vm3196_vm10, %v5012_v47 }
 0x2a3   : > { %10418 = vmatmul.mubr.msk.f32.vlgmr.msra.gmra.mrb[2].mxu1 %vm3192_vm11, %v10412_v59  ;;  %10419 = vmatprep.subr.msk.mxu1 %vm3196_vm10, %v5015_v62 }
 0x2a4   : > { %10420 = vmatpush1.msk.msra.mxu1 %vm3196_vm10, %v5014_v53  ;;  %v5743_v63 = vpop.permute.xlu1 %5742  ;;  %5245 = vmatprep.mubr.f32.mxu1 %v12805_v34 }
 0x2a5   : > { %v5737_v46 = vpop.permute.xlu0 %5736  ;;  %10423 = vmatprep.subr.msk.mxu1 %vm3196_vm10, %v11562_v36 }
 0x2a6   : > { %v5752_v22 = vsel %vm1912_vm6, %v5737_v46, %v5739_v27 }
 0x2a7   : > { %10421 = vmatmul.mubr.msk.f32.vlgmr.msra.gmra.mrb[4].mxu1 %vm3192_vm11, %v10412_v59  ;;  %v5754_v62 = vmul.f32 %v5752_v22, %v11301_v32 }
 0x2a8   : > { %v5747_v56 = vpop.permute.xlu1 %5746  ;;  %10424 = vmatpush1.msk.msra.mxu1 %vm3196_vm10, %v11547_v13  ;;  %5339 = vmatprep.mubr.f32.mxu1 %v12805_v34 }
 0x2a9   : > { %v5745_v10 = vpop.permute.xlu0 %5744  ;;  %10426 = vmatprep.subr.msk.mxu1 %vm3196_vm10, %v11585_v8 }
 0x2aa   : > { %v5749_v25 = vsel %vm1912_vm6, %v5743_v63, %v5745_v10 }
 0x2ab   : > { %10425 = vmatmul.mubr.msk.f32.vlgmr.msra.gmra.mrb[0].mxu1 %vm3192_vm11, %v10422_v11  ;;  %v5757_v47 = vmul.f32 %v5749_v25, %v11298_v29 }
 0x2ac   : > { %v12036_v33 = vpop.permute.xlu1 %6006  ;;  %10427 = vmatpush1.msk.msra.mxu1 %vm3196_vm10, %v11571_v0  ;;  %5410 = vmatprep.mubr.f32.mxu1 %v12805_v34 }
 0x2ad   : > { %v6005_v13 = vpop.permute.xlu0 %6004  ;;  %10429 = vmatprep.subr.msk.mxu1 %vm3196_vm10, %v11577_v4 }
 0x2af   : > { %10428 = vmatmul.mubr.msk.f32.vlgmr.msra.gmra.mrb[2].mxu1 %vm3192_vm11, %v10422_v11 }
 0x2b0   : > { %10430 = vmatpush1.msk.msra.mxu1 %vm3196_vm10, %v11564_v55  ;;  %v6009_v36 = vpop.permute.xlu1 %6008  ;;  %5481 = vmatprep.mubr.f32.mxu1 %v12805_v34  ;;  %v10432_v55 = vld [vmem:[%s12758_s7 + $0x20] sm:$0xff] }
 0x2b1   : > { %10433 = vmatprep.subr.msk.mxu1 %vm3196_vm10, %v11538_v9  ;;  %v6003_v8 = vpop.permute.xlu0 %6002  ;;  %v5751_v9 = vsel %vm1912_vm6, %v5739_v27, %v5741_v58  ;;  %v5750_v27 = vsel %vm1912_vm6, %v5741_v58, %v5743_v63 }
 0x2b2   : > { %v5755_v59 = vmul.f32 %v5751_v9, %v11284_v17  ;;  %v5756_v9 = vmul.f32 %v5750_v27, %v11320_v50 }
 0x2b3   : > { %10431 = vmatmul.mubr.msk.f32.vlgmr.msra.gmra.mrb[4].mxu1 %vm3192_vm11, %v10422_v11  ;;  %v10442_v11 = vld [vmem:[%s12757_s6 + $0x28] sm:$0xff] }
 0x2b4   : > { %10434 = vmatpush1.msk.msra.mxu1 %vm3196_vm10, %v11529_v18  ;;  %v12052_v0 = vpop.permute.xlu1 %6012  ;;  %5581 = vmatprep.mubr.f32.mxu1 %v12805_v34 }
 0x2b5   : > { %10436 = vmatprep.subr.msk.mxu1 %vm3196_vm10, %v11556_v41  ;;  %v12060_v4 = vpop.permute.xlu0 %6010 }
 0x2b7   : > { %10435 = vmatmul.mubr.msk.f32.vlgmr.msra.gmra.mrb[0].mxu1 %vm3192_vm11, %v10432_v55 }
 0x2b8   : > { %10437 = vmatpush1.msk.msra.mxu1 %vm3196_vm10, %v11543_v12  ;;  %v12067_v18 = vpop.permute.xlu1 %6272  ;;  %5652 = vmatprep.mubr.f32.mxu1 %v12805_v34 }
 0x2b9   : > { %10439 = vmatprep.subr.msk.mxu1 %vm3196_vm10, %v11545_v20  ;;  %v12073_v41 = vpop.permute.xlu0 %6270 }
 0x2bb   : > { %10438 = vmatmul.mubr.msk.f32.vlgmr.msra.gmra.mrb[2].mxu1 %vm3192_vm11, %v10432_v55 }
 0x2bc   : > { %10440 = vmatpush1.msk.msra.mxu1 %vm3196_vm10, %v11554_v14  ;;  %v12082_v12 = vpop.permute.xlu1 %6274  ;;  %5723 = vmatprep.mubr.f32.mxu1 %v12805_v34  ;;  %v5753_v14 = vsel %vm1912_vm6, %v5747_v56, %v5737_v46  ;;  %v5748_v46 = vsel %vm1912_vm6, %v5745_v10, %v5747_v56  ;;  %v6018_v10 = vsel %vm1912_vm6, %v6003_v8, %v6005_v13 }
 0x2bd   : > { %v12086_v20 = vpop.permute.xlu0 %6268  ;;  %10443 = vmatprep.subr.msk.mxu1 %vm3196_vm10, %v5755_v59  ;;  %v5759_v63 = vmul.f32 %v5753_v14, %v11327_v6  ;;  %v5758_v25 = vmul.f32 %v5748_v46, %v11343_v1  ;;  %v6020_v27 = vmul.f32 %v6018_v10, %v11301_v32 }
 0x2bf   : > { %10441 = vmatmul.mubr.msk.f32.vlgmr.msra.gmra.mrb[4].mxu1 %vm3192_vm11, %v10432_v55  ;;  %v6017_v55 = vsel %vm1912_vm6, %v6005_v13, %v12036_v33  ;;  %v6016_v13 = vsel %vm1912_vm6, %v12036_v33, %v6009_v36 }
 0x2c0   : > { %10444 = vmatpush1.msk.msra.mxu1 %vm3196_vm10, %v5754_v62  ;;  %v12096_v53 = vpop.permute.xlu1 %6278  ;;  %5847 = vmatprep.mubr.f32.mxu1 %v12805_v34  ;;  %v6021_v56 = vmul.f32 %v6017_v55, %v11284_v17  ;;  %v10452_v55 = vld [vmem:[%s12758_s7 + $0x28] sm:$0xff]  ;;  %v6022_v33 = vmul.f32 %v6016_v13, %v11320_v50 }
 0x2c1   : > { %10446 = vmatprep.subr.msk.mxu1 %vm3196_vm10, %v5757_v47  ;;  %v6015_v47 = vsel %vm1912_vm6, %v6009_v36, %v12060_v4  ;;  %v6283_v36 = vsel %vm2214_vm7, %v12073_v41, %v12067_v18 }
 0x2c2   : > { %v12104_v58 = vpop.permute.xlu0 %6276  ;;  %v6287_v10 = vmul.f32 %v6283_v36, %v11338_v61  ;;  %v6285_v36 = vsel %vm2214_vm7, %v12096_v53, %v12086_v20 }
 0x2c3   : > { %10445 = vmatmul.mubr.msk.f32.vlgmr.msra.gmra.mrb[0].mxu1 %vm3192_vm11, %v10442_v11 }
 0x2c4   : > { %10447 = vmatpush1.msk.msra.mxu1 %vm3196_vm10, %v5756_v9  ;;  %v12114_v59 = vpop.permute.xlu1 %6538  ;;  %5918 = vmatprep.mubr.f32.mxu1 %v12805_v34  ;;  %v6023_v9 = vmul.f32 %v6015_v47, %v11298_v29 }
 0x2c5   : > { %10449 = vmatprep.subr.msk.mxu1 %vm3196_vm10, %v5759_v63  ;;  %v6019_v63 = vsel %vm1912_vm6, %v12052_v0, %v6003_v8 }
 0x2c6   : > { %v12119_v22 = vpop.permute.xlu0 %6536 }
 0x2c7   : > { %10448 = vmatmul.mubr.msk.f32.vlgmr.msra.gmra.mrb[2].mxu1 %vm3192_vm11, %v10442_v11 }
 0x2c8   : > { %10450 = vmatpush1.msk.msra.mxu1 %vm3196_vm10, %v5758_v25  ;;  %v12129_v62 = vpop.permute.xlu1 %6540  ;;  %5989 = vmatprep.mubr.f32.mxu1 %v12805_v34  ;;  %v6014_v25 = vsel %vm1912_vm6, %v12060_v4, %v12052_v0  ;;  %v6284_v4 = vsel %vm2214_vm7, %v12086_v20, %v12073_v41  ;;  %v6282_v41 = vsel %vm2214_vm7, %v12067_v18, %v12082_v12 }
 0x2c9   : > { %10453 = vmatprep.subr.msk.mxu1 %vm3196_vm10, %v6021_v56  ;;  %v6024_v47 = vmul.f32 %v6014_v25, %v11343_v1  ;;  %v12806_v25 = vld [vmem:[#allocation3_spill] sm:$0xff]  ;;  %v6280_v20 = vsel %vm2214_vm7, %v12104_v58, %v12096_v53 }
 0x2ca   : > { %v12134_v14 = vpop.permute.xlu0 %6534 }
 0x2cb   : > { %10451 = vmatmul.mubr.msk.f32.vlgmr.msra.gmra.mrb[4].mxu1 %vm3192_vm11, %v10442_v11  ;;  %v6025_v11 = vmul.f32 %v6019_v63, %v11327_v6  ;;  %v6286_v63 = vmul.f32 %v6284_v4, %v11360_v39  ;;  %v12808_v4 = vld [vmem:[#allocation6_spill] sm:$0xff]  ;;  %v6550_v53 = vsel %vm2214_vm7, %v12134_v14, %v12119_v22 }
 0x2cc   : > { %10454 = vmatpush1.msk.msra.mxu1 %vm3196_vm10, %v6020_v27  ;;  %v12145_v46 = vpop.permute.xlu1 %6544  ;;  %6113 = vmatprep.mubr.f32.mxu1 %v12805_v34  ;;  %v6281_v27 = vsel %vm2214_vm7, %v12082_v12, %v12104_v58  ;;  %v12807_v12 = vld [vmem:[#allocation4_spill] sm:$0xff] }
 0x2cd   : > { %10456 = vmatprep.subr.msk.mxu1 %vm3196_vm10, %v6023_v9  ;;  %v6289_v13 = vmul.f32 %v6281_v27, %v11356_v7  ;;  %v6549_v27 = vsel %vm2214_vm7, %v12119_v22, %v12114_v59  ;;  %v6548_v22 = vsel %vm2214_vm7, %v12114_v59, %v12129_v62 }
 0x2ce   : > { %v6543_v8 = vpop.permute.xlu0 %6542  ;;  %v6554_v59 = vmul.f32 %v6548_v22, %v12806_v25 }
 0x2cf   : > { %10455 = vmatmul.mubr.msk.f32.vlgmr.msra.gmra.mrb[0].mxu1 %vm3192_vm11, %v10452_v55  ;;  %v6547_v58 = vsel %vm2214_vm7, %v12129_v62, %v6543_v8 }
 0x2d0   : > { %10457 = vmatpush1.msk.msra.mxu1 %vm3196_vm10, %v6022_v33  ;;  %v12164_v56 = vpop.permute.xlu1 %6804  ;;  %6184 = vmatprep.mubr.f32.mxu1 %v12805_v34 }
 0x2d1   : > { %10459 = vmatprep.subr.msk.mxu1 %vm3196_vm10, %v6025_v11  ;;  %v10462_v11 = vld [vmem:[%s12757_s6 + $0x30] sm:$0xff] }
 0x2d2   : > { %v6803_v0 = vpop.permute.xlu0 %6802 }
 0x2d3   : > { %10458 = vmatmul.mubr.msk.f32.vlgmr.msra.gmra.mrb[2].mxu1 %vm3192_vm11, %v10452_v55  ;;  %v6815_v62 = vsel %vm2516_vm8, %v6803_v0, %v12164_v56 }
 0x2d4   : > { %10460 = vmatpush1.msk.msra.mxu1 %vm3196_vm10, %v6024_v47  ;;  %6255 = vmatprep.mubr.f32.mxu1 %v12805_v34  ;;  %v12182_v9 = vpop.permute.xlu1 %6806 }
 0x2d5   : > { %10463 = vmatprep.subr.msk.mxu1 %vm3196_vm10, %v6287_v10  ;;  %v6288_v10 = vmul.f32 %v6282_v41, %v12806_v25  ;;  %v6553_v41 = vmul.f32 %v6549_v27, %v11338_v61  ;;  %v6551_v27 = vsel %vm2214_vm7, %v12145_v46, %v12134_v14  ;;  %v6546_v14 = vsel %vm2214_vm7, %v6543_v8, %v12145_v46 }
 0x2d6   : > { %v12186_v33 = vpop.permute.xlu0 %6800  ;;  %v6556_v22 = vmul.f32 %v6546_v14, %v12808_v4  ;;  %v10482_v14 = vld [vmem:[%s12757_s6 + $0x38] sm:$0xff] }
 0x2d7   : > { %10461 = vmatmul.mubr.msk.f32.vlgmr.msra.gmra.mrb[4].mxu1 %vm3192_vm11, %v10452_v55  ;;  %v6291_v55 = vmul.f32 %v6285_v36, %v12807_v12  ;;  %v6816_v46 = vsel %vm2516_vm8, %v12186_v33, %v6803_v0 }
 0x2d8   : > { %10464 = vmatpush1.msk.msra.mxu1 %vm3196_vm10, %v6286_v63  ;;  %6379 = vmatprep.mubr.f32.mxu1 %v12805_v34  ;;  %v6811_v47 = vpop.permute.xlu1 %6810 }
 0x2d9   : > { %10466 = vmatprep.subr.msk.mxu1 %vm3196_vm10, %v6289_v13  ;;  %v6290_v13 = vmul.f32 %v6280_v20, %v12808_v4  ;;  %v6817_v0 = vsel %vm2516_vm8, %v6811_v47, %v12186_v33 }
 0x2da   : > { %v6809_v18 = vpop.permute.xlu0 %6808 }
 0x2db   : > { %10465 = vmatmul.mubr.msk.f32.vlgmr.msra.gmra.mrb[0].mxu1 %vm3192_vm11, %v10462_v11 }
 0x2dc   : > { %10467 = vmatpush1.msk.msra.mxu1 %vm3196_vm10, %v6288_v10  ;;  %6450 = vmatprep.mubr.f32.mxu1 %v12805_v34  ;;  %v7071_v36 = vpop.permute.xlu1 %7070  ;;  %v6552_v10 = vmul.f32 %v6550_v53, %v11360_v39  ;;  %v12809_v53 = vld [vmem:[#allocation5_spill] sm:$0xff] }
 0x2dd   : > { %10469 = vmatprep.subr.msk.mxu1 %vm3196_vm10, %v6291_v55  ;;  %v6555_v55 = vmul.f32 %v6547_v58, %v11356_v7  ;;  %v6819_v58 = vmul.f32 %v6815_v62, %v12809_v53  ;;  %v6814_v62 = vsel %vm2516_vm8, %v12164_v56, %v12182_v9  ;;  %v6823_v56 = vmul.f32 %v6817_v0, %v11443_v31 }
 0x2de   : > { %v7069_v63 = vpop.permute.xlu0 %7068 }
 0x2df   : > { %10468 = vmatmul.mubr.msk.f32.vlgmr.msra.gmra.mrb[2].mxu1 %vm3192_vm11, %v10462_v11  ;;  %v7081_v33 = vsel %vm2516_vm8, %v7069_v63, %v7071_v36 }
 0x2e0   : > { %10470 = vmatpush1.msk.msra.mxu1 %vm3196_vm10, %v6290_v13  ;;  %6521 = vmatprep.mubr.f32.mxu1 %v12805_v34  ;;  %v10472_v13 = vld [vmem:[%s12758_s7 + $0x30] sm:$0xff] }
 0x2e1   : > { %10473 = vmatprep.subr.msk.mxu1 %vm3196_vm10, %v6553_v41  ;;  %v7073_v41 = vpop.permute.xlu1 %7072 }
 0x2e2   : > { %v7067_v20 = vpop.permute.xlu0 %7066  ;;  %v7080_v0 = vsel %vm2516_vm8, %v7071_v36, %v7073_v41 }
 0x2e3   : > { %10471 = vmatmul.mubr.msk.f32.vlgmr.msra.gmra.mrb[4].mxu1 %vm3192_vm11, %v10462_v11  ;;  %v6557_v11 = vmul.f32 %v6551_v27, %v12807_v12  ;;  %v7086_v36 = vmul.f32 %v7080_v0, %v11436_v16 }
 0x2e4   : > { %10474 = vmatpush1.msk.msra.mxu1 %vm3196_vm10, %v6552_v10  ;;  %6645 = vmatprep.mubr.f32.mxu1 %v12805_v34 }
 0x2e5   : > { %10476 = vmatprep.subr.msk.mxu1 %vm3196_vm10, %v6555_v55  ;;  %v6813_v55 = vsel %vm2516_vm8, %v12182_v9, %v6809_v18  ;;  %v7077_v27 = vpop.permute.xlu1 %7076  ;;  %v6812_v9 = vsel %vm2516_vm8, %v6809_v18, %v6811_v47  ;;  %v7082_v18 = vsel %vm2516_vm8, %v7067_v20, %v7069_v63 }
 0x2e6   : > { %v7075_v10 = vpop.permute.xlu0 %7074  ;;  %v6821_v8 = vmul.f32 %v6813_v55, %v11414_v45  ;;  %v12810_v55 = vld [vmem:[#allocation8_spill] sm:$0xff] }
 0x2e7   : > { %10475 = vmatmul.mubr.msk.f32.vlgmr.msra.gmra.mrb[0].mxu1 %vm3192_vm11, %v10472_v13  ;;  %v7079_v47 = vsel %vm2516_vm8, %v7073_v41, %v7075_v10 }
 0x2e8   : > { %10477 = vmatpush1.msk.msra.mxu1 %vm3196_vm10, %v6554_v59  ;;  %6716 = vmatprep.mubr.f32.mxu1 %v12805_v34  ;;  %v6818_v59 = vmul.f32 %v6816_v46, %v11418_v23  ;;  %v6822_v46 = vmul.f32 %v6812_v9, %v12810_v55  ;;  %v10492_v9 = vld [vmem:[%s12758_s7 + $0x38] sm:$0xff] }
 0x2e9   : > { %10479 = vmatprep.subr.msk.mxu1 %vm3196_vm10, %v6557_v11 }
 0x2ea   : > { %v7335_v11 = vpop.permute.xlu0 %7334 }
 0x2eb   : > { %10478 = vmatmul.mubr.msk.f32.vlgmr.msra.gmra.mrb[2].mxu1 %vm3192_vm11, %v10472_v13 }
 0x2ec   : > { %10480 = vmatpush1.msk.msra.mxu1 %vm3196_vm10, %v6556_v22  ;;  %6787 = vmatprep.mubr.f32.mxu1 %v12805_v34 }
 0x2ed   : > { %10483 = vmatprep.subr.msk.mxu1 %vm3196_vm10, %v6819_v58  ;;  %v6820_v58 = vmul.f32 %v6814_v62, %v11436_v16  ;;  %v7084_v62 = vmul.f32 %v7082_v18, %v11418_v23 }
 0x2ee   : > { %v7333_v22 = vpop.permute.xlu0 %7332 }
 0x2ef   : > { %10481 = vmatmul.mubr.msk.f32.vlgmr.msra.gmra.mrb[4].mxu1 %vm3192_vm11, %v10472_v13  ;;  %v7337_v13 = vpop.permute.xlu1 %7336 }
 0x2f0   : > { %10484 = vmatpush1.msk.msra.mxu1 %vm3196_vm10, %v6818_v59  ;;  %6911 = vmatprep.mubr.f32.mxu1 %v12805_v34  ;;  %v7347_v41 = vsel %vm2818_vm9, %v7335_v11, %v7337_v13 }
 0x2f1   : > { %10486 = vmatprep.subr.msk.mxu1 %vm3196_vm10, %v6821_v8  ;;  %v7085_v8 = vmul.f32 %v7081_v33, %v12809_v53 }
 0x2f2   : > { %v7341_v63 = vpop.permute.xlu0 %7340 }
 0x2f3   : > { %10485 = vmatmul.mubr.msk.f32.vlgmr.msra.gmra.mrb[0].mxu1 %vm3192_vm11, %v10482_v14  ;;  %v7339_v59 = vpop.permute.xlu1 %7338 }
 0x2f4   : > { %10487 = vmatpush1.msk.msra.mxu1 %vm3196_vm10, %v6820_v58  ;;  %6982 = vmatprep.mubr.f32.mxu1 %v12805_v34  ;;  %v7087_v58 = vmul.f32 %v7079_v47, %v11414_v45 }
 0x2f5   : > { %10489 = vmatprep.subr.msk.mxu1 %vm3196_vm10, %v6823_v56  ;;  %v7083_v56 = vsel %vm2516_vm8, %v7077_v27, %v7067_v20  ;;  %v7078_v20 = vsel %vm2516_vm8, %v7075_v10, %v7077_v27  ;;  %v7348_v10 = vsel %vm2818_vm9, %v7333_v22, %v7335_v11  ;;  %v12812_v27 = vld [vmem:[#allocation9_spill] sm:$0xff] }
 0x2f6   : > { %v7601_v18 = vpop.permute.xlu0 %7600  ;;  %v7088_v47 = vmul.f32 %v7078_v20, %v12810_v55  ;;  %v10502_v20 = vld [vmem:[%s12757_s6 + $0x40] sm:$0xff] }
 0x2f7   : > { %10488 = vmatmul.mubr.msk.f32.vlgmr.msra.gmra.mrb[2].mxu1 %vm3192_vm11, %v10482_v14  ;;  %v7343_v33 = vpop.permute.xlu1 %7342 }
 0x2f8   : > { %10490 = vmatpush1.msk.msra.mxu1 %vm3196_vm10, %v6822_v46  ;;  %7053 = vmatprep.mubr.f32.mxu1 %v12805_v34  ;;  %v12811_v46 = vld [vmem:[#allocation7_spill] sm:$0xff]  ;;  %v7349_v11 = vsel %vm2818_vm9, %v7343_v33, %v7333_v22 }
 0x2f9   : > { %10493 = vmatprep.subr.msk.mxu1 %vm3196_vm10, %v7085_v8  ;;  %v7351_v8 = vmul.f32 %v7347_v41, %v12811_v46  ;;  %v7346_v41 = vsel %vm2818_vm9, %v7337_v13, %v7339_v59 }
 0x2fb   : > { %10491 = vmatmul.mubr.msk.f32.vlgmr.msra.gmra.mrb[4].mxu1 %vm3192_vm11, %v10482_v14  ;;  %v7089_v14 = vmul.f32 %v7083_v56, %v11443_v31  ;;  %v12813_v56 = vld [vmem:[#allocation10_spill] sm:$0xff] }
 0x2fc   : > { %10494 = vmatpush1.msk.msra.mxu1 %vm3196_vm10, %v7084_v62  ;;  %7177 = vmatprep.mubr.f32.mxu1 %v12805_v34  ;;  %v7345_v62 = vsel %vm2818_vm9, %v7339_v59, %v7341_v63  ;;  %v7344_v59 = vsel %vm2818_vm9, %v7341_v63, %v7343_v33 }
 0x2fd   : > { %10496 = vmatprep.subr.msk.mxu1 %vm3196_vm10, %v7087_v58  ;;  %v7353_v0 = vmul.f32 %v7345_v62, %v12812_v27  ;;  %v7603_v58 = vpop.permute.xlu1 %7602  ;;  %v12815_v62 = vld [vmem:[#allocation12_spill] sm:$0xff] }
 0x2fe   : > { %v7355_v13 = vmul.f32 %v7349_v11, %v12815_v62  ;;  %v7613_v22 = vsel %vm2818_vm9, %v7601_v18, %v7603_v58 }
 0x2ff   : > { %10495 = vmatmul.mubr.msk.f32.vlgmr.msra.gmra.mrb[0].mxu1 %vm3192_vm11, %v10492_v9 }
 0x300   : > { %10497 = vmatpush1.msk.msra.mxu1 %vm3196_vm10, %v7086_v36  ;;  %7248 = vmatprep.mubr.f32.mxu1 %v12805_v34  ;;  %v7350_v36 = vmul.f32 %v7348_v10, %v12813_v56 }
 0x301   : > { %10499 = vmatprep.subr.msk.mxu1 %vm3196_vm10, %v7089_v14  ;;  %v7599_v14 = vpop.permute.xlu0 %7598 }
 0x302   : > { %v7614_v63 = vsel %vm2818_vm9, %v7599_v14, %v7601_v18 }
 0x303   : > { %10498 = vmatmul.mubr.msk.f32.vlgmr.msra.gmra.mrb[2].mxu1 %vm3192_vm11, %v10492_v9 }
 0x304   : > { %10500 = vmatpush1.msk.msra.mxu1 %vm3196_vm10, %v7088_v47  ;;  %7319 = vmatprep.mubr.f32.mxu1 %v12805_v34 }
 0x305   : > { %10503 = vmatprep.subr.msk.mxu1 %vm3196_vm10, %v7351_v8  ;;  %v12814_v8 = vld [vmem:[#allocation11_spill] sm:$0xff]  ;;  %v7607_v10 = vpop.permute.xlu0 %7606 }
 0x306   : > { %v7352_v47 = vmul.f32 %v7346_v41, %v12814_v8  ;;  %v7617_v41 = vmul.f32 %v7613_v22, %v12811_v46  ;;  %v10512_v22 = vld [vmem:[%s12758_s7 + $0x40] sm:$0xff] }
 0x307   : > { %10501 = vmatmul.mubr.msk.f32.vlgmr.msra.gmra.mrb[4].mxu1 %vm3192_vm11, %v10492_v9  ;;  %v7605_v9 = vpop.permute.xlu1 %7604 }
 0x308   : > { %10504 = vmatpush1.msk.msra.mxu1 %vm3196_vm10, %v7350_v36  ;;  %7443 = vmatprep.mubr.f32.mxu1 %v12805_v34  ;;  %v7611_v33 = vsel %vm2818_vm9, %v7605_v9, %v7607_v10 }
 0x309   : > { %10506 = vmatprep.subr.msk.mxu1 %vm3196_vm10, %v7353_v0  ;;  %v12816_v0 = vld [vmem:[#allocation13_spill] sm:$0xff] }
 0x30a   : > { %v7354_v36 = vmul.f32 %v7344_v59, %v12816_v0  ;;  %v7619_v59 = vmul.f32 %v7611_v33, %v12812_v27 }
 0x30b   : > { %10505 = vmatmul.mubr.msk.f32.vlgmr.msra.gmra.mrb[0].mxu1 %vm3192_vm11, %v10502_v20  ;;  %v7609_v11 = vpop.permute.xlu1 %7608 }
 0x30c   : > { %10507 = vmatpush1.msk.msra.mxu1 %vm3196_vm10, %v7352_v47  ;;  %7514 = vmatprep.mubr.f32.mxu1 %v12805_v34  ;;  %v7616_v47 = vmul.f32 %v7614_v63, %v12813_v56  ;;  %v7615_v18 = vsel %vm2818_vm9, %v7609_v11, %v7599_v14 }
 0x30d   : > { %10509 = vmatprep.subr.msk.mxu1 %vm3196_vm10, %v7355_v13  ;;  %v7612_v13 = vsel %vm2818_vm9, %v7603_v58, %v7605_v9  ;;  %v7621_v58 = vmul.f32 %v7615_v18, %v12815_v62 }
 0x30f   : > { %10508 = vmatmul.mubr.msk.f32.vlgmr.msra.gmra.mrb[2].mxu1 %vm3192_vm11, %v10502_v20  ;;  %v7868_v9 = vpop.permute.xlu0 %7867 }
 0x310   : > { %10510 = vmatpush1.msk.msra.mxu1 %vm3196_vm10, %v7354_v36  ;;  %7585 = vmatprep.mubr.f32.mxu1 %v12805_v34  ;;  %v7618_v36 = vmul.f32 %v7612_v13, %v12814_v8 }
 0x311   : > { %10513 = vmatprep.subr.msk.mxu1 %vm3196_vm10, %v7617_v41 }
 0x313   : > { %10511 = vmatmul.mubr.msk.f32.vlgmr.msra.gmra.mrb[4].mxu1 %vm3192_vm11, %v10502_v20  ;;  %v7610_v20 = vsel %vm2818_vm9, %v7607_v10, %v7609_v11 }
 0x314   : > { %10514 = vmatpush1.msk.msra.mxu1 %vm3196_vm10, %v7616_v47  ;;  %7709 = vmatprep.mubr.f32.mxu1 %v12805_v34  ;;  %v7620_v14 = vmul.f32 %v7610_v20, %v12816_v0 }
 0x315   : > { %10516 = vmatprep.subr.msk.mxu1 %vm3196_vm10, %v7619_v59 }
 0x317   : > { %10515 = vmatmul.mubr.msk.f32.vlgmr.msra.gmra.mrb[0].mxu1 %vm3192_vm11, %v10512_v22 }
 0x318   : > { %10517 = vmatpush1.msk.msra.mxu1 %vm3196_vm10, %v7618_v36  ;;  %7780 = vmatprep.mubr.f32.mxu1 %v12805_v34 }
 0x319   : > { %10519 = vmatprep.subr.msk.mxu1 %vm3196_vm10, %v7621_v58 }
 0x31b   : > { %10518 = vmatmul.mubr.msk.f32.vlgmr.msra.gmra.mrb[2].mxu1 %vm3192_vm11, %v10512_v22 }
 0x31c   : > { %10520 = vmatpush1.msk.msra.mxu1 %vm3196_vm10, %v7620_v14  ;;  %7851 = vmatprep.mubr.f32.mxu1 %v12805_v34 }
 0x31f   : > { %10521 = vmatmul.mubr.msk.f32.vlgmr.msra.gmra.mrb[4].mxu1 %vm3192_vm11, %v10512_v22 }
 0x3ea   : > { %v7711_v10 = vpop.f32.mrb[0].mxu1 }
 0x3eb   : > { %v7870_v41 = vadd.f32 %v7868_v9, %v7711_v10  ;;  %v7713_v63 = vpop.f32.mrb[1].mxu1 }
 0x3ec   : > { %v7871_v33 = vadd.f32 %v7868_v9, %v7713_v63 }
 0x3ed   : > { %v12399_v11 = vmax.f32 %v7870_v41, 0.0 }
 0x3ee   : > { %v12401_v47 = vmax.f32 %v7871_v33, 0.0  ;;  %v7782_v13 = vpop.f32.mrb[2].mxu1 }
 0x3ef   : > { %v7872_v59 = vadd.f32 %v7868_v9, %v7782_v13  ;;  %7907 = vrot.lane.b32.xlu1 %v12399_v11, %s10809_s23  ;;  %v7784_v18 = vpop.f32.mrb[3].mxu1 }
 0x3f0   : > { %7909 = vrot.lane.b32.xlu0 %v12401_v47, %s10809_s23  ;;  %v7873_v41 = vadd.f32 %v7868_v9, %v7784_v18 }
 0x3f1   : > { %v12407_v36 = vmax.f32 %v7872_v59, 0.0 }
 0x3f2   : > { %v7853_v22 = vpop.f32.mrb[4].mxu1  ;;  %v12419_v33 = vmax.f32 %v7873_v41, 0.0 }
 0x3f3   : > { %v7874_v58 = vadd.f32 %v7868_v9, %v7853_v22  ;;  %v7855_v20 = vpop.f32.mrb[5].mxu1 }
 0x3f4   : > { %v7875_v14 = vadd.f32 %v7868_v9, %v7855_v20  ;;  %7911 = vrot.lane.b32.xlu0 %v12407_v36, %s10809_s23  ;;  %v10078_v9 = vld [vmem:[%s12761_s10] sm:$0xf] }
 0x3f5   : > { %v12411_v10 = vmax.f32 %v7874_v58, 0.0 }
 0x3f6   : > { %v12413_v63 = vmax.f32 %v7875_v14, 0.0 }
 0x3f8   : > { %7915 = vrot.lane.b32.xlu0 %v12411_v10, %s10809_s23  ;;  %7917 = vrot.lane.b32.xlu1 %v12413_v63, %s10809_s23 }
 0x3fc   : > { %7884 = vrot.lane.b32.xlu0 %v12401_v47, %s10811_s24  ;;  %7913 = vrot.lane.b32.xlu1 %v12419_v33, %s10809_s23 }
 0x400   : > { %7886 = vrot.lane.b32.xlu0 %v12407_v36, %s10811_s24  ;;  %7882 = vrot.lane.b32.xlu1 %v12399_v11, %s10811_s24 }
 0x404   : > { %7890 = vrot.lane.b32.xlu0 %v12411_v10, %s10811_s24  ;;  %7892 = vrot.lane.b32.xlu1 %v12413_v63, %s10811_s24 }
 0x408   : > { %8368 = vrot.lane.b32.xlu0 %v12401_v47, %s10812_s25  ;;  %7888 = vrot.lane.b32.xlu1 %v12419_v33, %s10811_s24 }
 0x40c   : > { %8370 = vrot.lane.b32.xlu0 %v12407_v36, %s10812_s25  ;;  %8366 = vrot.lane.b32.xlu1 %v12399_v11, %s10812_s25 }
 0x410   : > { %8374 = vrot.lane.b32.xlu0 %v12411_v10, %s10812_s25  ;;  %8376 = vrot.lane.b32.xlu1 %v12413_v63, %s10812_s25 }
 0x414   : > { %8616 = vrot.lane.b32.xlu0 %v12401_v47, %s10813_s26  ;;  %8372 = vrot.lane.b32.xlu1 %v12419_v33, %s10812_s25 }
 0x418   : > { %8618 = vrot.lane.b32.xlu0 %v12407_v36, %s10813_s26  ;;  %8614 = vrot.lane.b32.xlu1 %v12399_v11, %s10813_s26 }
 0x41c   : > { %8622 = vrot.lane.b32.xlu0 %v12411_v10, %s10813_s26  ;;  %8624 = vrot.lane.b32.xlu1 %v12413_v63, %s10813_s26 }
 0x420   : > { %9090 = vrot.lane.b32.xlu0 %v12407_v36, %s10814_s27  ;;  %8620 = vrot.lane.b32.xlu1 %v12419_v33, %s10813_s26 }
 0x424   : > { %9092 = vrot.lane.b32.xlu0 %v12419_v33, %s10814_s27  ;;  %9088 = vrot.lane.b32.xlu1 %v12401_v47, %s10814_s27 }
 0x428   : > { %9096 = vrot.lane.b32.xlu0 %v12413_v63, %s10814_s27  ;;  %9086 = vrot.lane.b32.xlu1 %v12399_v11, %s10814_s27 }
 0x42c   : > { %9338 = vrot.lane.b32.xlu0 %v12407_v36, %s10815_s28  ;;  %9094 = vrot.lane.b32.xlu1 %v12411_v10, %s10814_s27 }
 0x430   : > { %9340 = vrot.lane.b32.xlu0 %v12419_v33, %s10815_s28  ;;  %9336 = vrot.lane.b32.xlu1 %v12401_v47, %s10815_s28 }
 0x434   : > { %9344 = vrot.lane.b32.xlu0 %v12413_v63, %s10815_s28  ;;  %9334 = vrot.lane.b32.xlu1 %v12399_v11, %s10815_s28 }
 0x438   : > { %9586 = vrot.lane.b32.xlu0 %v12407_v36, %s10816_s29  ;;  %9342 = vrot.lane.b32.xlu1 %v12411_v10, %s10815_s28 }
 0x43c   : > { %9588 = vrot.lane.b32.xlu0 %v12419_v33, %s10816_s29  ;;  %9584 = vrot.lane.b32.xlu1 %v12401_v47, %s10816_s29 }
 0x440   : > { %9592 = vrot.lane.b32.xlu0 %v12413_v63, %s10816_s29  ;;  %9582 = vrot.lane.b32.xlu1 %v12399_v11, %s10816_s29 }
 0x444   : > { %9834 = vrot.lane.b32.xlu0 %v12407_v36, %s10817_s30  ;;  %9590 = vrot.lane.b32.xlu1 %v12411_v10, %s10816_s29  ;;  %s426_s29 = scalar_lea.vmem %s12762_s11, %s10559_s21 }
 0x448   : > { %9836 = vrot.lane.b32.xlu0 %v12419_v33, %s10817_s30  ;;  %9832 = vrot.lane.b32.xlu1 %v12401_v47, %s10817_s30 }
 0x44c   : > { %9840 = vrot.lane.b32.xlu0 %v12413_v63, %s10817_s30  ;;  %9830 = vrot.lane.b32.xlu1 %v12399_v11, %s10817_s30 }
 0x450   : > { %9838 = vrot.lane.b32.xlu1 %v12411_v10, %s10817_s30 }
 0x454   : > { %10081 = vperm.xlu1 %10781, %v10078_v9   ;;  %v10522_v9 = vld [vmem:[%s12760_s9 + $0x4] sm:$0xf] }
 0x461   : > { %v7908_v13 = vpop.permute.xlu1 %7907 }
 0x462   : > { %v7910_v59 = vpop.permute.xlu0 %7909 }
 0x463   : > { %v7923_v18 = vsel %vm540_vm0, %v7908_v13, %v7910_v59 }
 0x464   : > { %v7926_v22 = vmul.f32 %v7923_v18, %v11036_v26 }
 0x466   : > { %v7912_v58 = vpop.permute.xlu0 %7911  ;;  %7937 = vmatprep.subr.mxu0 %v7926_v22 }
 0x467   : > { %v7922_v62 = vsel %vm540_vm0, %v7910_v59, %v7912_v58 }
 0x468   : > { %v7927_v59 = vmul.f32 %v7922_v62, %v11065_v40 }
 0x46a   : > { %v7916_v20 = vpop.permute.xlu0 %7915  ;;  %v7918_v14 = vpop.permute.xlu1 %7917 }
 0x46b   : > { %v7924_v41 = vsel %vm540_vm0, %v7918_v14, %v7908_v13  ;;  %v7919_v18 = vsel %vm540_vm0, %v7916_v20, %v7918_v14 }
 0x46c   : > { %v7925_v0 = vmul.f32 %v7924_v41, %v11042_v28 }
 0x46e   : > { %v7885_v8 = vpop.permute.xlu0 %7884  ;;  %7938 = vmatpush1.msra.mxu0 %v7925_v0  ;;  %v7914_v26 = vpop.permute.xlu1 %7913  ;;  %v7930_v0 = vmul.f32 %v7919_v18, %v11075_v44 }
 0x46f   : > { %v7921_v22 = vsel %vm540_vm0, %v7912_v58, %v7914_v26  ;;  %10523 = vmatmul.mubr.msk.f32.vlgmr.msra.gmra.mrb[6].mxu0 %vm7933_vm12, %v10522_v9  ;;  %v7920_v28 = vsel %vm540_vm0, %v7914_v26, %v7916_v20 }
 0x470   : > { %v7928_v13 = vmul.f32 %v7921_v22, %v11062_v38  ;;  %8072 = vmatprep.mubr.f32.mxu0 %v12805_v34  ;;  %v7929_v14 = vmul.f32 %v7920_v28, %v11080_v48 }
 0x472   : > { %v7887_v41 = vpop.permute.xlu0 %7886  ;;  %8008 = vmatprep.subr.mxu0 %v7928_v13  ;;  %v7883_v27 = vpop.permute.xlu1 %7882 }
 0x473   : > { %v7898_v58 = vsel %vm479_vm3, %v7883_v27, %v7885_v8  ;;  %8009 = vmatpush1.msra.mxu0 %v7927_v59  ;;  %v7897_v62 = vsel %vm479_vm3, %v7885_v8, %v7887_v41 }
 0x474   : > { %v7901_v56 = vmul.f32 %v7898_v58, %v11091_v52  ;;  %10524 = vmatmul.mubr.msk.f32.vlgmr.msra.gmra.mrb[8].mxu0 %vm7933_vm12, %v10522_v9  ;;  %8079 = vmatprep.subr.mxu0 %v7930_v0  ;;  %v7906_v52 = vld [vmem:[%s12760_s9] sm:$0xf]  ;;  %v7902_v18 = vmul.f32 %v7897_v62, %v11124_v5 }
 0x475   : > { %8080 = vmatpush1.msra.mxu0 %v7929_v14  ;;  %8143 = vmatprep.mubr.f32.mxu0 %v12805_v34 }
 0x476   : > { %v7891_v38 = vpop.permute.xlu0 %7890  ;;  %8153 = vmatprep.subr.mxu0 %v7901_v56  ;;  %v7893_v40 = vpop.permute.xlu1 %7892 }
 0x477   : > { %v7899_v44 = vsel %vm479_vm3, %v7893_v40, %v7883_v27  ;;  %v7894_v26 = vsel %vm479_vm3, %v7891_v38, %v7893_v40 }
 0x478   : > { %v7900_v48 = vmul.f32 %v7899_v44, %v11105_v60  ;;  %10525 = vmatmul.mubr.msk.f32.vlgmr.msra.gmra.mrb[10].mxu0 %vm7933_vm12, %v10522_v9  ;;  %v7905_v8 = vmul.f32 %v7894_v26, %v11133_v15 }
 0x479   : > { %8217 = vmatprep.mubr.f32.mxu0 %v12805_v34 }
 0x47a   : > { %v8369_v20 = vpop.permute.xlu0 %8368  ;;  %8154 = vmatpush1.msra.mxu0 %v7900_v48  ;;  %v7889_v56 = vpop.permute.xlu1 %7888 }
 0x47b   : > { %v7896_v60 = vsel %vm479_vm3, %v7887_v41, %v7889_v56  ;;  %v7895_v27 = vsel %vm479_vm3, %v7889_v56, %v7891_v38  ;;  %v12817_v56 = vld [vmem:[#allocation2_spill] sm:$0xff] }
 0x47c   : > { %v7903_v9 = vmul.f32 %v7896_v60, %v11121_v3  ;;  %10526 = vmatmul.mubr.msk.f32.vlgmr.msra.gmra.mrb[6].mxu0 %vm7933_vm12, %v7906_v52  ;;  %v7904_v13 = vmul.f32 %v7895_v27, %v11139_v21 }
 0x47d   : > { %8288 = vmatprep.mubr.f32.mxu0 %v12805_v34 }
 0x47e   : > { %v8371_v22 = vpop.permute.xlu0 %8370  ;;  %8224 = vmatprep.subr.mxu0 %v7903_v9  ;;  %v8367_v28 = vpop.permute.xlu1 %8366 }
 0x47f   : > { %v8382_v59 = vsel %vm1072_vm4, %v8367_v28, %v8369_v20  ;;  %8225 = vmatpush1.msra.mxu0 %v7902_v18  ;;  %v8381_v41 = vsel %vm1072_vm4, %v8369_v20, %v8371_v22 }
 0x480   : > { %v8385_v0 = vmul.f32 %v8382_v59, %v11149_v30  ;;  %10527 = vmatmul.mubr.msk.f32.vlgmr.msra.gmra.mrb[8].mxu0 %vm7933_vm12, %v7906_v52  ;;  %8295 = vmatprep.subr.mxu0 %v7905_v8  ;;  %v10529_v30 = vld [vmem:[%s12760_s9 + $0x8] sm:$0xf]  ;;  %v8386_v48 = vmul.f32 %v8381_v41, %v11182_v54 }
 0x481   : > { %8296 = vmatpush1.msra.mxu0 %v7904_v13  ;;  %8359 = vmatprep.mubr.f32.mxu0 %v12805_v34 }
 0x482   : > { %v8375_v3 = vpop.permute.xlu0 %8374  ;;  %8395 = vmatprep.subr.mxu0 %v8385_v0  ;;  %v8377_v5 = vpop.permute.xlu1 %8376 }
 0x483   : > { %v8383_v15 = vsel %vm1072_vm4, %v8377_v5, %v8367_v28  ;;  %v8378_v38 = vsel %vm1072_vm4, %v8375_v3, %v8377_v5 }
 0x484   : > { %v8384_v21 = vmul.f32 %v8383_v15, %v11163_v42  ;;  %10528 = vmatmul.mubr.msk.f32.vlgmr.msra.gmra.mrb[10].mxu0 %vm7933_vm12, %v7906_v52  ;;  %v8389_v52 = vmul.f32 %v8378_v38, %v11191_v57 }
 0x485   : > { %8459 = vmatprep.mubr.f32.mxu0 %v12805_v34 }
 0x486   : > { %v8617_v14 = vpop.permute.xlu0 %8616  ;;  %8396 = vmatpush1.msra.mxu0 %v8384_v21  ;;  %v8373_v58 = vpop.permute.xlu1 %8372 }
 0x487   : > { %v8380_v42 = vsel %vm1072_vm4, %v8371_v22, %v8373_v58  ;;  %v8379_v40 = vsel %vm1072_vm4, %v8373_v58, %v8375_v3 }
 0x488   : > { %v8387_v44 = vmul.f32 %v8380_v42, %v11179_v51  ;;  %10530 = vmatmul.mubr.msk.f32.vlgmr.msra.gmra.mrb[6].mxu0 %vm7933_vm12, %v10529_v30  ;;  %v8388_v26 = vmul.f32 %v8379_v40, %v12817_v56 }
 0x489   : > { %8530 = vmatprep.mubr.f32.mxu0 %v12805_v34 }
 0x48a   : > { %v8619_v62 = vpop.permute.xlu0 %8618  ;;  %8466 = vmatprep.subr.mxu0 %v8387_v44  ;;  %v8615_v20 = vpop.permute.xlu1 %8614 }
 0x48b   : > { %v8630_v60 = vsel %vm1374_vm5, %v8615_v20, %v8617_v14  ;;  %8467 = vmatpush1.msra.mxu0 %v8386_v48  ;;  %v8629_v18 = vsel %vm1374_vm5, %v8617_v14, %v8619_v62 }
 0x48c   : > { %v8633_v27 = vmul.f32 %v8630_v60, %v11207_v2  ;;  %10531 = vmatmul.mubr.msk.f32.vlgmr.msra.gmra.mrb[8].mxu0 %vm7933_vm12, %v10529_v30  ;;  %8537 = vmatprep.subr.mxu0 %v8389_v52  ;;  %v10533_v2 = vld [vmem:[%s12760_s9 + $0xc] sm:$0xf]  ;;  %v8634_v0 = vmul.f32 %v8629_v18, %v11234_v37 }
 0x48d   : > { %8538 = vmatpush1.msra.mxu0 %v8388_v26  ;;  %8601 = vmatprep.mubr.f32.mxu0 %v12805_v34 }
 0x48e   : > { %v8623_v51 = vpop.permute.xlu0 %8622  ;;  %8643 = vmatprep.subr.mxu0 %v8633_v27  ;;  %v8625_v54 = vpop.permute.xlu1 %8624 }
 0x48f   : > { %v8631_v57 = vsel %vm1374_vm5, %v8625_v54, %v8615_v20  ;;  %v8626_v28 = vsel %vm1374_vm5, %v8623_v51, %v8625_v54 }
 0x490   : > { %v8632_v9 = vmul.f32 %v8631_v57, %v11221_v24  ;;  %10532 = vmatmul.mubr.msk.f32.vlgmr.msra.gmra.mrb[10].mxu0 %vm7933_vm12, %v10529_v30  ;;  %v8637_v3 = vmul.f32 %v8626_v28, %v11243_v43  ;;  %v10537_v43 = vld [vmem:[%s12760_s9 + $0x10] sm:$0xf]  ;;  %v10545_v57 = vld [vmem:[%s12760_s9 + $0x18] sm:$0xf] }
 0x491   : > { %8707 = vmatprep.mubr.f32.mxu0 %v12805_v34 }
 0x492   : > { %v9091_v8 = vpop.permute.xlu0 %9090  ;;  %8644 = vmatpush1.msra.mxu0 %v8632_v9  ;;  %v8621_v22 = vpop.permute.xlu1 %8620 }
 0x493   : > { %v8628_v24 = vsel %vm1374_vm5, %v8619_v62, %v8621_v22  ;;  %v8627_v13 = vsel %vm1374_vm5, %v8621_v22, %v8623_v51 }
 0x494   : > { %v8635_v59 = vmul.f32 %v8628_v24, %v11231_v35  ;;  %10534 = vmatmul.mubr.msk.f32.vlgmr.msra.gmra.mrb[6].mxu0 %vm7933_vm12, %v10533_v2  ;;  %v8636_v21 = vmul.f32 %v8627_v13, %v11249_v49 }
 0x495   : > { %8778 = vmatprep.mubr.f32.mxu0 %v12805_v34 }
 0x496   : > { %v9093_v5 = vpop.permute.xlu0 %9092  ;;  %8714 = vmatprep.subr.mxu0 %v8635_v59  ;;  %v9089_v15 = vpop.permute.xlu1 %9088 }
 0x497   : > { %8715 = vmatpush1.msra.mxu0 %v8634_v0 }
 0x498   : > { %10535 = vmatmul.mubr.msk.f32.vlgmr.msra.gmra.mrb[8].mxu0 %vm7933_vm12, %v10533_v2  ;;  %8785 = vmatprep.subr.mxu0 %v8637_v3 }
 0x499   : > { %8786 = vmatpush1.msra.mxu0 %v8636_v21  ;;  %8849 = vmatprep.mubr.f32.mxu0 %v12805_v34 }
 0x49a   : > { %v9097_v35 = vpop.permute.xlu0 %9096  ;;  %8867 = vmatprep.subr.mxu0 %v12401_v47  ;;  %v9087_v37 = vpop.permute.xlu1 %9086  ;;  %v9101_v47 = vsel %vm1912_vm6, %v9089_v15, %v9091_v8 }
 0x49b   : > { %v9105_v14 = vmul.f32 %v9101_v47, %v11284_v17  ;;  %v9100_v17 = vsel %vm1912_vm6, %v9091_v8, %v9093_v5  ;;  %v9103_v40 = vsel %vm1912_vm6, %v9097_v35, %v9087_v37  ;;  %v12818_v47 = vld [vmem:[#allocation10_spill] sm:$0xff] }
 0x49c   : > { %10536 = vmatmul.mubr.msk.f32.vlgmr.msra.gmra.mrb[10].mxu0 %vm7933_vm12, %v10533_v2  ;;  %v9109_v48 = vmul.f32 %v9103_v40, %v11327_v6 }
 0x49d   : > { %8868 = vmatpush1.msra.mxu0 %v12399_v11  ;;  %8931 = vmatprep.mubr.f32.mxu0 %v12805_v34 }
 0x49e   : > { %8938 = vmatprep.subr.mxu0 %v12419_v33  ;;  %v9339_v49 = vpop.permute.xlu0 %9338  ;;  %v9095_v30 = vpop.permute.xlu1 %9094  ;;  %v9102_v33 = vsel %vm1912_vm6, %v9087_v37, %v9089_v15 }
 0x49f   : > { %v9099_v58 = vsel %vm1912_vm6, %v9093_v5, %v9095_v30  ;;  %v10549_v5 = vld [vmem:[%s12760_s9 + $0x1c] sm:$0xf] }
 0x4a0   : > { %10538 = vmatmul.mubr.msk.f32.vlgmr.msra.gmra.mrb[6].mxu0 %vm7933_vm12, %v10537_v43  ;;  %v9107_v42 = vmul.f32 %v9099_v58, %v11298_v29  ;;  %v9098_v29 = vsel %vm1912_vm6, %v9095_v30, %v9097_v35  ;;  %v12820_v58 = vld [vmem:[#allocation11_spill] sm:$0xff] }
 0x4a1   : > { %8939 = vmatpush1.msra.mxu0 %v12407_v36  ;;  %9002 = vmatprep.mubr.f32.mxu0 %v12805_v34  ;;  %v9108_v56 = vmul.f32 %v9098_v29, %v11343_v1 }
 0x4a2   : > { %9009 = vmatprep.subr.mxu0 %v12413_v63  ;;  %v9341_v11 = vpop.permute.xlu0 %9340  ;;  %v9337_v41 = vpop.permute.xlu1 %9336  ;;  %v9104_v63 = vmul.f32 %v9102_v33, %v11301_v32  ;;  %v9106_v32 = vmul.f32 %v9100_v17, %v11320_v50  ;;  %v10553_v33 = vld [vmem:[%s12760_s9 + $0x20] sm:$0xf] }
 0x4a3   : > { %v9349_v62 = vsel %vm2214_vm7, %v9337_v41, %v9339_v49  ;;  %v9348_v1 = vsel %vm2214_vm7, %v9339_v49, %v9341_v11 }
 0x4a4   : > { %10539 = vmatmul.mubr.msk.f32.vlgmr.msra.gmra.mrb[8].mxu0 %vm7933_vm12, %v10537_v43  ;;  %v9353_v50 = vmul.f32 %v9349_v62, %v11338_v61 }
 0x4a5   : > { %9010 = vmatpush1.msra.mxu0 %v12411_v10  ;;  %9073 = vmatprep.mubr.f32.mxu0 %v12805_v34  ;;  %v10541_v10 = vld [vmem:[%s12760_s9 + $0x14] sm:$0xf] }
 0x4a6   : > { %9115 = vmatprep.subr.mxu0 %v9105_v14  ;;  %v9345_v36 = vpop.permute.xlu0 %9344  ;;  %v9335_v38 = vpop.permute.xlu1 %9334 }
 0x4a7   : > { %v9350_v6 = vsel %vm2214_vm7, %v9335_v38, %v9337_v41  ;;  %v9351_v54 = vsel %vm2214_vm7, %v9345_v36, %v9335_v38  ;;  %v12819_v41 = vld [vmem:[#allocation9_spill] sm:$0xff]  ;;  %v12821_v38 = vld [vmem:[#allocation12_spill] sm:$0xff] }
 0x4a8   : > { %10540 = vmatmul.mubr.msk.f32.vlgmr.msra.gmra.mrb[10].mxu0 %vm7933_vm12, %v10537_v43  ;;  %v9352_v51 = vmul.f32 %v9350_v6, %v11360_v39  ;;  %v9354_v39 = vmul.f32 %v9348_v1, %v12806_v25  ;;  %v9357_v2 = vmul.f32 %v9351_v54, %v12807_v12 }
 0x4a9   : > { %9116 = vmatpush1.msra.mxu0 %v9104_v63  ;;  %9179 = vmatprep.mubr.f32.mxu0 %v12805_v34 }
 0x4aa   : > { %9186 = vmatprep.subr.mxu0 %v9107_v42  ;;  %v9343_v44 = vpop.permute.xlu1 %9342  ;;  %v9587_v52 = vpop.permute.xlu0 %9586  ;;  %v12822_v42 = vld [vmem:[#allocation13_spill] sm:$0xff] }
 0x4ab   : > { %v9347_v26 = vsel %vm2214_vm7, %v9341_v11, %v9343_v44 }
 0x4ac   : > { %10542 = vmatmul.mubr.msk.f32.vlgmr.msra.gmra.mrb[6].mxu0 %vm7933_vm12, %v10541_v10  ;;  %v9355_v61 = vmul.f32 %v9347_v26, %v11356_v7  ;;  %v9346_v7 = vsel %vm2214_vm7, %v9343_v44, %v9345_v36 }
 0x4ad   : > { %9187 = vmatpush1.msra.mxu0 %v9106_v32  ;;  %9250 = vmatprep.mubr.f32.mxu0 %v12805_v34  ;;  %v9356_v28 = vmul.f32 %v9346_v7, %v12808_v4 }
 0x4ae   : > { %9257 = vmatprep.subr.mxu0 %v9109_v48  ;;  %v9585_v20 = vpop.permute.xlu1 %9584  ;;  %v9589_v60 = vpop.permute.xlu0 %9588 }
 0x4af   : > { %v9597_v8 = vsel %vm2516_vm8, %v9585_v20, %v9587_v52  ;;  %v9596_v4 = vsel %vm2516_vm8, %v9587_v52, %v9589_v60 }
 0x4b0   : > { %10543 = vmatmul.mubr.msk.f32.vlgmr.msra.gmra.mrb[8].mxu0 %vm7933_vm12, %v10541_v10  ;;  %v9601_v25 = vmul.f32 %v9597_v8, %v12809_v53 }
 0x4b1   : > { %9258 = vmatpush1.msra.mxu0 %v9108_v56  ;;  %9321 = vmatprep.mubr.f32.mxu0 %v12805_v34 }
 0x4b2   : > { %9363 = vmatprep.subr.mxu0 %v9353_v50  ;;  %v9583_v27 = vpop.permute.xlu1 %9582  ;;  %v9593_v18 = vpop.permute.xlu0 %9592 }
 0x4b3   : > { %v9598_v12 = vsel %vm2516_vm8, %v9583_v27, %v9585_v20  ;;  %v9599_v3 = vsel %vm2516_vm8, %v9593_v18, %v9583_v27 }
 0x4b4   : > { %10544 = vmatmul.mubr.msk.f32.vlgmr.msra.gmra.mrb[10].mxu0 %vm7933_vm12, %v10541_v10  ;;  %v9600_v59 = vmul.f32 %v9598_v12, %v11418_v23  ;;  %v9602_v23 = vmul.f32 %v9596_v4, %v11436_v16  ;;  %v9605_v15 = vmul.f32 %v9599_v3, %v11443_v31  ;;  %v10124_v4 = vld [vmem:[%s11536_s19] sm:$0xff] }
 0x4b5   : > { %9364 = vmatpush1.msra.mxu0 %v9352_v51  ;;  %9427 = vmatprep.mubr.f32.mxu0 %v12805_v34 }
 0x4b6   : > { %9434 = vmatprep.subr.mxu0 %v9355_v61  ;;  %v9591_v9 = vpop.permute.xlu1 %9590  ;;  %v9835_v13 = vpop.permute.xlu0 %9834 }
 0x4b7   : > { %v9595_v24 = vsel %vm2516_vm8, %v9589_v60, %v9591_v9 }
 0x4b8   : > { %10546 = vmatmul.mubr.msk.f32.vlgmr.msra.gmra.mrb[6].mxu0 %vm7933_vm12, %v10545_v57  ;;  %v9603_v53 = vmul.f32 %v9595_v24, %v11414_v45  ;;  %v9594_v45 = vsel %vm2516_vm8, %v9591_v9, %v9593_v18 }
 0x4b9   : > { %9435 = vmatpush1.msra.mxu0 %v9354_v39  ;;  %9498 = vmatprep.mubr.f32.mxu0 %v12805_v34  ;;  %v9604_v43 = vmul.f32 %v9594_v45, %v12810_v55 }
 0x4ba   : > { %9505 = vmatprep.subr.mxu0 %v9357_v2  ;;  %v9833_v22 = vpop.permute.xlu1 %9832  ;;  %v9837_v21 = vpop.permute.xlu0 %9836 }
 0x4bb   : > { %v9845_v35 = vsel %vm2818_vm9, %v9833_v22, %v9835_v13  ;;  %v9844_v55 = vsel %vm2818_vm9, %v9835_v13, %v9837_v21 }
 0x4bc   : > { %10547 = vmatmul.mubr.msk.f32.vlgmr.msra.gmra.mrb[8].mxu0 %vm7933_vm12, %v10545_v57  ;;  %v9849_v16 = vmul.f32 %v9845_v35, %v12811_v46  ;;  %v9850_v36 = vmul.f32 %v9844_v55, %v12820_v58  ;;  %v10137_v35 = vld [vmem:[%s11536_s19 + $0x10] sm:$0xff] }
 0x4bd   : > { %9506 = vmatpush1.msra.mxu0 %v9356_v28  ;;  %9569 = vmatprep.mubr.f32.mxu0 %v12805_v34 }
 0x4be   : > { %9611 = vmatprep.subr.mxu0 %v9601_v25  ;;  %v9831_v0 = vpop.permute.xlu1 %9830  ;;  %v9841_v30 = vpop.permute.xlu0 %9840 }
 0x4bf   : > { %v9846_v31 = vsel %vm2818_vm9, %v9831_v0, %v9833_v22  ;;  %v9847_v14 = vsel %vm2818_vm9, %v9841_v30, %v9831_v0 }
 0x4c0   : > { %10548 = vmatmul.mubr.msk.f32.vlgmr.msra.gmra.mrb[10].mxu0 %vm7933_vm12, %v10545_v57  ;;  %v9848_v11 = vmul.f32 %v9846_v31, %v12818_v47  ;;  %v9853_v63 = vmul.f32 %v9847_v14, %v12821_v38 }
 0x4c1   : > { %9612 = vmatpush1.msra.mxu0 %v9600_v59  ;;  %9675 = vmatprep.mubr.f32.mxu0 %v12805_v34 }
 0x4c2   : > { %9682 = vmatprep.subr.mxu0 %v9603_v53  ;;  %v9839_v37 = vpop.permute.xlu1 %9838 }
 0x4c3   : > { %v9843_v49 = vsel %vm2818_vm9, %v9837_v21, %v9839_v37  ;;  %v9842_v17 = vsel %vm2818_vm9, %v9839_v37, %v9841_v30 }
 0x4c4   : > { %10550 = vmatmul.mubr.msk.f32.vlgmr.msra.gmra.mrb[6].mxu0 %vm7933_vm12, %v10549_v5  ;;  %v9851_v46 = vmul.f32 %v9843_v49, %v12819_v41  ;;  %v9852_v40 = vmul.f32 %v9842_v17, %v12822_v42 }
 0x4c5   : > { %9683 = vmatpush1.msra.mxu0 %v9602_v23  ;;  %9746 = vmatprep.mubr.f32.mxu0 %v12805_v34 }
 0x4c6   : > { %9753 = vmatprep.subr.mxu0 %v9605_v15 }
 0x4c8   : > { %10551 = vmatmul.mubr.msk.f32.vlgmr.msra.gmra.mrb[8].mxu0 %vm7933_vm12, %v10549_v5 }
 0x4c9   : > { %9754 = vmatpush1.msra.mxu0 %v9604_v43  ;;  %9817 = vmatprep.mubr.f32.mxu0 %v12805_v34 }
 0x4ca   : > { %9859 = vmatprep.subr.mxu0 %v9849_v16 }
 0x4cc   : > { %10552 = vmatmul.mubr.msk.f32.vlgmr.msra.gmra.mrb[10].mxu0 %vm7933_vm12, %v10549_v5  ;;  %v10130_v5 = vld [vmem:[%s11536_s19 + $0x8] sm:$0xff] }
 0x4cd   : > { %9860 = vmatpush1.msra.mxu0 %v9848_v11  ;;  %9923 = vmatprep.mubr.f32.mxu0 %v12805_v34 }
 0x4ce   : > { %9930 = vmatprep.subr.mxu0 %v9851_v46 }
 0x4d0   : > { %10554 = vmatmul.mubr.msk.f32.vlgmr.msra.gmra.mrb[6].mxu0 %vm7933_vm12, %v10553_v33 }
 0x4d1   : > { %9931 = vmatpush1.msra.mxu0 %v9850_v36  ;;  %9994 = vmatprep.mubr.f32.mxu0 %v12805_v34 }
 0x4d2   : > { %10001 = vmatprep.subr.mxu0 %v9853_v63 }
 0x4d3   : > { %v10082_v32 = vpop.permute.xlu1 %10081 }
 0x4d4   : > { %10555 = vmatmul.mubr.msk.f32.vlgmr.msra.gmra.mrb[8].mxu0 %vm7933_vm12, %v10553_v33 }
 0x4d5   : > { %10002 = vmatpush1.msra.mxu0 %v9852_v40  ;;  %10065 = vmatprep.mubr.f32.mxu0 %v12805_v34 }
 0x4d8   : > { %10556 = vmatmul.mubr.msk.f32.vlgmr.msra.gmra.mrb[10].mxu0 %vm7933_vm12, %v10553_v33 }
 0x5a3   : > { %v9925_v10 = vpop.f32.mrb[6].mxu0 }
 0x5a4   : > { %v9927_v44 = vpop.f32.mrb[7].mxu0  ;;  %v10084_v48 = vadd.f32 %v10082_v32, %v9925_v10 }
 0x5a5   : > { %v10085_v62 = vadd.f32 %v10082_v32, %v9927_v44 }
 0x5a7   : > { %v9996_v19 = vpop.f32.mrb[8].mxu0 }
 0x5a8   : > { %v10086_v29 = vadd.f32 %v10082_v32, %v9996_v19  ;;  %v9998_v52 = vpop.f32.mrb[9].mxu0 }
 0x5a9   : > { %v10087_v20 = vadd.f32 %v10082_v32, %v9998_v52 }
 0x5aa   : > { %v10090_v56 = vmax.f32 %v10084_v48, %v10086_v29 }
 0x5ab   : > { %v10091_v50 = vmax.f32 %v10085_v62, %v10087_v20  ;;  %v10067_v6 = vpop.f32.mrb[10].mxu0 }
 0x5ac   : > { %v10088_v26 = vadd.f32 %v10082_v32, %v10067_v6  ;;  %v10069_v60 = vpop.f32.mrb[11].mxu0 }
 0x5ad   : > { %v10089_v27 = vadd.f32 %v10082_v32, %v10069_v60 }
 0x5ae   : > { %v10092_v51 = vmax.f32 %v10090_v56, %v10088_v26 }
 0x5af   : > { %v10093_v1 = vmax.f32 %v10091_v50, %v10089_v27 }
 0x5b0   : > { %v10094_v34 = vsub.f32 %v10084_v48, %v10092_v51  ;;  %v10100_v61 = vsub.f32 %v10086_v29, %v10092_v51  ;;  %v10106_v54 = vsub.f32 %v10088_v26, %v10092_v51 }
 0x5b1   : > { %v10095_v57 = vsub.f32 %v10085_v62, %v10093_v1  ;;  %v10101_v9 = vsub.f32 %v10087_v20, %v10093_v1  ;;  %v10107_v39 = vsub.f32 %v10089_v27, %v10093_v1 }
 0x5b2   : > { %v10096_v2 = vmul.f32 1.442695, %v10094_v34  ;;  %v10102_v7 = vmul.f32 1.442695, %v10100_v61  ;;  %v10108_v18 = vmul.f32 1.442695, %v10106_v54 }
 0x5b3   : > { %v10098_v8 = vmul.f32 1.442695, %v10095_v57  ;;  %v10104_v22 = vmul.f32 1.442695, %v10101_v9  ;;  %v10110_v28 = vmul.f32 1.442695, %v10107_v39 }
 0x5b4   : > { %10784 = vpow2.f32 %v10096_v2 }
 0x5b5   : > { %10786 = vpow2.f32 %v10102_v7 }
 0x5b6   : > { %10788 = vpow2.f32 %v10108_v18 }
 0x5b7   : > { %10790 = vpow2.f32 %v10098_v8 }
 0x5b8   : > { %10792 = vpow2.f32 %v10104_v22 }
 0x5b9   : > { %10794 = vpow2.f32 %v10110_v28 }
 0x5be   : > { %v10785_v25 = vpop.eup %10784 }
 0x5bf   : > { %v10787_v12 = vpop.eup %10786 }
 0x5c0   : > { %v10789_v24 = vpop.eup %10788  ;;  %v10112_v13 = vadd.f32 %v10787_v12, %v10785_v25 }
 0x5c1   : > { %v10791_v59 = vpop.eup %10790 }
 0x5c2   : > { %v10793_v53 = vpop.eup %10792  ;;  %v10114_v0 = vadd.f32 %v10789_v24, %v10112_v13  ;;  %v10127_v3 = vcombine.low %v10785_v25, %v10791_v59 }
 0x5c3   : > { %v10795_v23 = vpop.eup %10794  ;;  %v10113_v15 = vadd.f32 %v10793_v53, %v10791_v59  ;;  %v10133_v45 = vcombine.low %v10787_v12, %v10793_v53 }
 0x5c4   : > { %10796 = vrcp.f32 %v10114_v0  ;;  %v10129_v21 = vmul.f32 %v10127_v3, %v10124_v4  ;;  %v10140_v37 = vcombine.low %v10789_v24, %v10795_v23 }
 0x5c5   : > { %v10115_v43 = vadd.f32 %v10795_v23, %v10113_v15  ;;  %v10135_v16 = vmul.f32 %v10133_v45, %v10130_v5 }
 0x5c6   : > { %v10142_v49 = vmul.f32 %v10140_v37, %v10137_v35 }
 0x5c7   : > { %10798 = vrcp.f32 %v10115_v43  ;;  %v10136_v31 = vadd.f32 %v10135_v16, %v10129_v21 }
 0x5c9   : > { %v10143_v30 = vadd.f32 %v10142_v49, %v10136_v31 }
 0x5ce   : > { %v10797_v47 = vpop.eup %10796 }
 0x5cf   : > { %v10118_v11 = vmul.f32 %v10797_v47, %v10114_v0 }
 0x5d1   : > { %v10799_v55 = vpop.eup %10798  ;;  %v10120_v41 = vsub.f32 2.0, %v10118_v11 }
 0x5d2   : > { %v10119_v46 = vmul.f32 %v10799_v55, %v10115_v43 }
 0x5d3   : > { %v10122_v14 = vmul.f32 %v10797_v47, %v10120_v41 }
 0x5d4   : > { %v10121_v33 = vsub.f32 2.0, %v10119_v46 }
 0x5d6   : > { %v10123_v58 = vmul.f32 %v10799_v55, %v10121_v33 }
 0x5d8   : > { %v10146_v36 = vcombine.low %v10122_v14, %v10123_v58 }
 0x5da   : > { %v10148_v38 = vmul.f32 %v10146_v36, %v10143_v30 }
 0x5dc   : > { %10149 = vst [vmem:[%s426_s29] sm:$0xff] %v10148_v38 }
 0x5dd PF: > { %s21_s17 = sadd.s32 1, %s10806_s17  }
 0x5de   : > { %p18_p4 = scmp.ge.s32.totalorder %s21_s17, 4  }
 0x5e0   :  { %20 = sbr.rel (!%p18_p4) target bundleno = 1 (0x1), region = 139 }

</bundles_post_ra>
